<compile_context>
chip_gen: v7x
topology: tpu7x:2x2x1
jax: 0.10.0
libtpu: 0.0.40
codegen_flags: <defaults>
</compile_context>

<pallas_src>
import functools

import jax
import jax.numpy as jnp
from jax.experimental import pallas as pl
from jax.experimental.pallas import tpu as pltpu

_VMEM_LIMIT = 32 * 1024 * 1024  # safe on v5e/v6e (128 MiB phys) and v7x (64 MiB phys)


def _round_up(x, m):
    return (x + m - 1) // m * m


def _pad2d(a, rows, cols, dtype):
    a = jnp.asarray(a).astype(dtype)
    pr, pc = rows - a.shape[0], cols - a.shape[1]
    if pr or pc:
        a = jnp.pad(a, ((0, pr), (0, pc)))
    return a


# --------------------------------------------------------------------------------------
# Fused single-call kernel (graph fits in VMEM): adj / weights loaded once, no HBM
# round-trips for intermediates, cluster head fused.
# --------------------------------------------------------------------------------------

def igae_fused_kernel(x_ref, adj_ref, w1_ref, w2_ref, w3_ref, wc_ref, bc_ref,
                      z_ref, c_ref, *, n_clusters):
    f32 = jnp.float32
    cd = adj_ref.dtype
    adj = adj_ref[...]

    s1 = jnp.tanh(jnp.dot(x_ref[...], w1_ref[...], preferred_element_type=f32)).astype(cd)
    z1 = jnp.dot(adj, s1, preferred_element_type=f32).astype(cd)
    s2 = jnp.tanh(jnp.dot(z1, w2_ref[...], preferred_element_type=f32)).astype(cd)
    z2 = jnp.dot(adj, s2, preferred_element_type=f32).astype(cd)
    s3 = jnp.dot(z2, w3_ref[...], preferred_element_type=f32).astype(cd)
    z3 = jnp.dot(adj, s3, preferred_element_type=f32)                       # f32
    z_ref[...] = z3.astype(z_ref.dtype)

    logits = jnp.dot(z3.astype(cd), wc_ref[...], preferred_element_type=f32) + bc_ref[...]
    col = jax.lax.broadcasted_iota(jnp.int32, logits.shape, 1)
    logits = jnp.where(col < n_clusters, logits, jnp.float32(-1e30))        # mask pad lanes
    m = jnp.max(logits, axis=1, keepdims=True)
    e = jnp.exp(logits - m)
    c_ref[...] = (e / jnp.sum(e, axis=1, keepdims=True)).astype(c_ref.dtype)


def _igae_fused(x, adj, w1, w2, w3, wc, bc, *, n_clusters, z_dtype, c_dtype):
    Np = adj.shape[0]
    e3 = w3.shape[1]
    c_p = wc.shape[1]
    kernel = functools.partial(igae_fused_kernel, n_clusters=n_clusters)
    # No grid / specs: every operand is a full-array VMEM-resident ref (DMA'd once).
    return pl.pallas_call(
        kernel,
        out_shape=(jax.ShapeDtypeStruct((Np, e3), z_dtype),
                   jax.ShapeDtypeStruct((Np, c_p), c_dtype)),
        compiler_params=pltpu.CompilerParams(vmem_limit_bytes=_VMEM_LIMIT),
    )(x, adj, w1, w2, w3, wc, bc)


# --------------------------------------------------------------------------------------
# Tiled path (larger graphs)
# --------------------------------------------------------------------------------------

def support_kernel(h_ref, w_ref, s_ref, *, activate):
    """s = act(h @ W) for one row tile (computed exactly once per layer)."""
    s = jnp.dot(h_ref[...], w_ref[...], preferred_element_type=jnp.float32)
    if activate:
        s = jnp.tanh(s)
    s_ref[...] = s.astype(s_ref.dtype)


def _support_layer(h, w, *, tm, out_dtype, activate=True):
    Np, d_in = h.shape
    d_out = w.shape[1]
    return pl.pallas_call(
        functools.partial(support_kernel, activate=activate),
        out_shape=jax.ShapeDtypeStruct((Np, d_out), out_dtype),
        grid=(Np // tm,),
        in_specs=[pl.BlockSpec((tm, d_in), lambda i: (i, 0)),
                  pl.BlockSpec((d_in, d_out), lambda i: (0, 0))],
        out_specs=pl.BlockSpec((tm, d_out), lambda i: (i, 0)),
        compiler_params=pltpu.CompilerParams(
            dimension_semantics=("parallel",), vmem_limit_bytes=_VMEM_LIMIT),
    )(h, w)


def gnn_next_support_kernel(adj_ref, s_ref, wn_ref, sn_ref, acc_ref, *, tn, activate):
    """acc += adj[i,k] @ s[k]; at k==last emit the NEXT layer's support act(z @ W_next)."""
    k = pl.program_id(1)

    @pl.when(k == 0)
    def _():
        acc_ref[...] = jnp.zeros_like(acc_ref)

    ks = pl.multiple_of(k * tn, tn)
    acc_ref[...] += jnp.dot(adj_ref[...], s_ref[pl.ds(ks, tn), :],
                            preferred_element_type=jnp.float32)

    @pl.when(k == pl.num_programs(1) - 1)
    def _():
        z = acc_ref[...].astype(wn_ref.dtype)
        s_next = jnp.dot(z, wn_ref[...], preferred_element_type=jnp.float32)
        if activate:
            s_next = jnp.tanh(s_next)
        sn_ref[...] = s_next.astype(sn_ref.dtype)


def _gnn_next_support_layer(adj, s, w_next, *, tn, out_dtype, activate):
    Np = adj.shape[0]
    d_in = s.shape[1]
    d_next = w_next.shape[1]
    grid = (Np // tn, Np // tn)
    kernel = functools.partial(gnn_next_support_kernel, tn=tn, activate=activate)
    return pl.pallas_call(
        kernel,
        out_shape=jax.ShapeDtypeStruct((Np, d_next), out_dtype),
        grid=grid,
        in_specs=[
            pl.BlockSpec((tn, tn), lambda i, k: (i, k)),         # adj tile (streamed)
            pl.BlockSpec((Np, d_in), lambda i, k: (0, 0)),       # support, VMEM-resident
            pl.BlockSpec((d_in, d_next), lambda i, k: (0, 0)),   # W_next, VMEM-resident
        ],
        out_specs=pl.BlockSpec((tn, d_next), lambda i, k: (i, 0)),
        scratch_shapes=[pltpu.VMEM((tn, d_in), jnp.float32)],
        compiler_params=pltpu.CompilerParams(
            dimension_semantics=("parallel", "arbitrary"),
            vmem_limit_bytes=_VMEM_LIMIT),
    )(adj, s, w_next)


def gnn_cluster_kernel(adj_ref, s_ref, wc_ref, bc_ref, z_ref, c_ref, acc_ref,
                       *, tn, n_clusters):
    """Last layer: z = adj @ s3 fused with the cluster Linear + Softmax head."""
    k = pl.program_id(1)

    @pl.when(k == 0)
    def _():
        acc_ref[...] = jnp.zeros_like(acc_ref)

    ks = pl.multiple_of(k * tn, tn)
    acc_ref[...] += jnp.dot(adj_ref[...], s_ref[pl.ds(ks, tn), :],
                            preferred_element_type=jnp.float32)

    @pl.when(k == pl.num_programs(1) - 1)
    def _():
        z = acc_ref[...]                                          # (tn, e3_p) f32
        z_ref[...] = z.astype(z_ref.dtype)
        logits = jnp.dot(z.astype(wc_ref.dtype), wc_ref[...],
                         preferred_element_type=jnp.float32) + bc_ref[...]
        col = jax.lax.broadcasted_iota(jnp.int32, logits.shape, 1)
        logits = jnp.where(col < n_clusters, logits, jnp.float32(-1e30))
        m = jnp.max(logits, axis=1, keepdims=True)
        e = jnp.exp(logits - m)
        c_ref[...] = (e / jnp.sum(e, axis=1, keepdims=True)).astype(c_ref.dtype)


def _gnn_cluster_layer(adj, s, wc, bc, *, n_clusters, tn, z_dtype, c_dtype):
    Np = adj.shape[0]
    d_in = s.shape[1]
    c_p = wc.shape[1]
    grid = (Np // tn, Np // tn)
    kernel = functools.partial(gnn_cluster_kernel, tn=tn, n_clusters=n_clusters)
    return pl.pallas_call(
        kernel,
        out_shape=(jax.ShapeDtypeStruct((Np, d_in), z_dtype),
                   jax.ShapeDtypeStruct((Np, c_p), c_dtype)),
        grid=grid,
        in_specs=[
            pl.BlockSpec((tn, tn), lambda i, k: (i, k)),          # adj tile (streamed)
            pl.BlockSpec((Np, d_in), lambda i, k: (0, 0)),        # s3, VMEM-resident
            pl.BlockSpec((d_in, c_p), lambda i, k: (0, 0)),       # Wc
            pl.BlockSpec((1, c_p), lambda i, k: (0, 0)),          # bc (VMEM, not SMEM)
        ],
        out_specs=(pl.BlockSpec((tn, d_in), lambda i, k: (i, 0)),  # z_igae (lane-dense)
                   pl.BlockSpec((tn, c_p), lambda i, k: (i, 0))),  # c      (lane-dense)
        scratch_shapes=[pltpu.VMEM((tn, d_in), jnp.float32)],
        compiler_params=pltpu.CompilerParams(
            dimension_semantics=("parallel", "arbitrary"),
            vmem_limit_bytes=_VMEM_LIMIT),
    )(adj, s, wc, bc)


# --------------------------------------------------------------------------------------
# Top-level forward
# --------------------------------------------------------------------------------------

def igae_forward(x, adj, params, *, tn=512, compute_dtype=jnp.bfloat16,
                 mode="auto", z_dtype=jnp.bfloat16, c_dtype=jnp.float32):
    """IGAE forward.  x: (N, n_input), adj: (N, N).  Returns (z_igae, c)."""
    N, n_input = x.shape
    enc1 = params["w1"].shape[1]
    enc2 = params["w2"].shape[1]
    enc3 = params["w3"].shape[1]
    n_clusters = params["wc"].shape[1]

    d_in_p = _round_up(n_input, 128)
    e1_p, e2_p, e3_p = (_round_up(d, 128) for d in (enc1, enc2, enc3))
    c_p = _round_up(n_clusters, 128)

    if mode == "auto":
        Np_f = _round_up(N, 128)
        est = Np_f * Np_f * jnp.dtype(compute_dtype).itemsize          # adj (dominant)
        est += Np_f * (d_in_p + e1_p + e2_p + e3_p + c_p) * 4          # activations (f32 bound)
        mode = "fused" if est <= 24 * 1024 * 1024 else "tiled"

    if mode == "fused":
        Np = _round_up(N, 128)
    else:
        assert tn % 128 == 0, "tn must be a multiple of 128"
        Np = _round_up(N, tn)

    # Zero padding is numerically inert: tanh(0)=0, zero weight rows/cols and zero adj
    # rows/cols contribute nothing; padded softmax lanes are masked in-kernel.
    x_p = _pad2d(x, Np, d_in_p, compute_dtype)
    adj_p = _pad2d(adj, Np, Np, compute_dtype)
    w1_p = _pad2d(params["w1"], d_in_p, e1_p, compute_dtype)
    w2_p = _pad2d(params["w2"], e1_p, e2_p, compute_dtype)
    w3_p = _pad2d(params["w3"], e2_p, e3_p, compute_dtype)
    wc_p = _pad2d(params["wc"], e3_p, c_p, compute_dtype)
    bc_p = _pad2d(params["bc"], 1, c_p, jnp.float32)

    if mode == "fused":
        z_p, c_full = _igae_fused(x_p, adj_p, w1_p, w2_p, w3_p, wc_p, bc_p,
                                  n_clusters=n_clusters, z_dtype=z_dtype, c_dtype=c_dtype)
    else:
        s1 = _support_layer(x_p, w1_p, tm=tn, out_dtype=compute_dtype, activate=True)
        s2 = _gnn_next_support_layer(adj_p, s1, w2_p, tn=tn,
                                     out_dtype=compute_dtype, activate=True)
        s3 = _gnn_next_support_layer(adj_p, s2, w3_p, tn=tn,
                                     out_dtype=compute_dtype, activate=False)
        z_p, c_full = _gnn_cluster_layer(adj_p, s3, wc_p, bc_p, n_clusters=n_clusters,
                                         tn=tn, z_dtype=z_dtype, c_dtype=c_dtype)

    return z_p[:N, :enc3], c_full[:N, :n_clusters]


# --------------------------------------------------------------------------------------
# Parameter init + pure-JAX reference (mirrors the bf16/f32 compute pipeline)
# --------------------------------------------------------------------------------------

def init_igae_params(key, gae_n_enc_1, gae_n_enc_2, gae_n_enc_3, n_input, clusters):
    """Weights stored pre-transposed as (in, out): y = h @ W == F.linear(h, W_pt)."""
    def xavier(k, fi, fo):
        bound = (6.0 / (fi + fo)) ** 0.5
        return jax.random.uniform(k, (fi, fo), jnp.float32, -bound, bound)

    k1, k2, k3, k4, k5 = jax.random.split(key, 5)
    params = {
        "w1": xavier(k1, n_input, gae_n_enc_1),
        "w2": xavier(k2, gae_n_enc_1, gae_n_enc_2),
        "w3": xavier(k3, gae_n_enc_2, gae_n_enc_3),
    }
    bound = 1.0 / (gae_n_enc_3 ** 0.5)   # PyTorch Linear default init scale
    params["wc"] = jax.random.uniform(k4, (gae_n_enc_3, clusters), jnp.float32, -bound, bound)
    params["bc"] = jax.random.uniform(k5, (1, clusters), jnp.float32, -bound, bound)
    return params


def igae_reference(x, adj, params, *, compute_dtype=jnp.bfloat16):
    cd, f32 = compute_dtype, jnp.float32
    adjb = adj.astype(cd)

    def gnn(h, w, active):
        s = jnp.dot(h.astype(cd), w.astype(cd), preferred_element_type=f32)
        if active:
            s = jnp.tanh(s)
        return jnp.dot(adjb, s.astype(cd), preferred_element_type=f32)

    z1 = gnn(x, params["w1"], True).astype(cd)
    z2 = gnn(z1, params["w2"], True).astype(cd)
    z3 = gnn(z2, params["w3"], False)                    # f32
    logits = jnp.dot(z3.astype(cd), params["wc"].astype(cd),
                     preferred_element_type=f32) + params["bc"]
    c = jax.nn.softmax(logits, axis=1)
    return z3, c


if __name__ == "__main__":
    N = 512
    n_input = 64
    gae_n_enc_1, gae_n_enc_2, gae_n_enc_3 = 128, 64, 32
    clusters = 8

    key = jax.random.PRNGKey(0)
    kx, ka, kp = jax.random.split(key, 3)
    x = jax.random.normal(kx, (N, n_input), dtype=jnp.float32)

    # Row-normalized random adjacency with self loops (GCN-style).
    a = (jax.random.uniform(ka, (N, N)) < 0.05).astype(jnp.float32)
    a = jnp.minimum(a + a.T + jnp.eye(N, dtype=jnp.float32), 1.0)
    adj = a / jnp.sum(a, axis=1, keepdims=True)

    params = init_igae_params(kp, gae_n_enc_1, gae_n_enc_2, gae_n_enc_3, n_input, clusters)
    z_ref, c_ref = igae_reference(x, adj, params)

    # Path 1: fused single-kernel path (what the demo graph size should use).
    z_f, c_f = igae_forward(x, adj, params, mode="fused")
    z_f, c_f = jax.block_until_ready(z_f), jax.block_until_ready(c_f)

    # Path 2: tiled multi-kernel path for larger graphs (forced here). tn=128 gives a
    # 4x4 grid so the parallel row axis has >=2 i-tiles per v7x TensorCore; default
    # tn for realistic N is 512.
    z_t, c_t = igae_forward(x, adj, params, mode="tiled", tn=128)
    z_t, c_t = jax.block_until_ready(z_t), jax.block_until_ready(c_t)

    for name, (z, c) in {"fused": (z_f, c_f), "tiled": (z_t, c_t)}.items():
        assert z.shape == (N, gae_n_enc_3) and c.shape == (N, clusters), name
        assert jnp.allclose(z.astype(jnp.float32), z_ref, atol=2e-2, rtol=2e-2), \
            f"{name}: z_igae mismatch"
        assert jnp.allclose(c.astype(jnp.float32), c_ref, atol=1e-2, rtol=1e-2), \
            f"{name}: cluster softmax mismatch"
        assert jnp.allclose(jnp.sum(c.astype(jnp.float32), axis=1), 1.0, atol=1e-3), \
            f"{name}: softmax rows must sum to 1"

    print("KERNEL_OK")
</pallas_src>

<mosaic_0001>
module attributes {stable_mosaic.version = 11 : i64} {
  func.func @igae_fused_kernel(%arg0: memref<512x128xbf16, #tpu.memory_space<vmem>>, %arg1: memref<512x512xbf16, #tpu.memory_space<vmem>>, %arg2: memref<128x128xbf16, #tpu.memory_space<vmem>>, %arg3: memref<128x128xbf16, #tpu.memory_space<vmem>>, %arg4: memref<128x128xbf16, #tpu.memory_space<vmem>>, %arg5: memref<128x128xbf16, #tpu.memory_space<vmem>>, %arg6: memref<1x128xf32, #tpu.memory_space<vmem>>, %arg7: memref<512x128xbf16, #tpu.memory_space<vmem>>, %arg8: memref<512x128xf32, #tpu.memory_space<vmem>>) attributes {dimension_semantics = [], scalar_prefetch = 0 : i64, scratch_operands = 0 : i64, tpu.core_type = #tpu.core_type<tc>} {
    %c0 = arith.constant 0 : index
    %c0_0 = arith.constant 0 : index
    %0 = vector.load %arg1[%c0, %c0_0] : memref<512x512xbf16, #tpu.memory_space<vmem>>, vector<512x512xbf16>
    %c0_1 = arith.constant 0 : index
    %c0_2 = arith.constant 0 : index
    %1 = vector.load %arg0[%c0_1, %c0_2] : memref<512x128xbf16, #tpu.memory_space<vmem>>, vector<512x128xbf16>
    %c0_3 = arith.constant 0 : index
    %c0_4 = arith.constant 0 : index
    %2 = vector.load %arg2[%c0_3, %c0_4] : memref<128x128xbf16, #tpu.memory_space<vmem>>, vector<128x128xbf16>
    %cst = arith.constant dense<0.000000e+00> : vector<512x128xf32>
    %3 = tpu.matmul %1, %2, %cst {dimension_numbers = #tpu.dot_dimension_numbers<[1], [0], [0], [1], [0, 0, 1, 1], [], []>} : vector<512x128xbf16>, vector<128x128xbf16>, vector<512x128xf32> -> vector<512x128xf32>
    %4 = math.tanh %3 : vector<512x128xf32>
    %5 = arith.truncf %4 : vector<512x128xf32> to vector<512x128xbf16>
    %cst_5 = arith.constant dense<0.000000e+00> : vector<512x128xf32>
    %6 = tpu.matmul %0, %5, %cst_5 {dimension_numbers = #tpu.dot_dimension_numbers<[1], [0], [0], [1], [0, 0, 1, 1], [], []>} : vector<512x512xbf16>, vector<512x128xbf16>, vector<512x128xf32> -> vector<512x128xf32>
    %7 = arith.truncf %6 : vector<512x128xf32> to vector<512x128xbf16>
    %c0_6 = arith.constant 0 : index
    %c0_7 = arith.constant 0 : index
    %8 = vector.load %arg3[%c0_6, %c0_7] : memref<128x128xbf16, #tpu.memory_space<vmem>>, vector<128x128xbf16>
    %cst_8 = arith.constant dense<0.000000e+00> : vector<512x128xf32>
    %9 = tpu.matmul %7, %8, %cst_8 {dimension_numbers = #tpu.dot_dimension_numbers<[1], [0], [0], [1], [0, 0, 1, 1], [], []>} : vector<512x128xbf16>, vector<128x128xbf16>, vector<512x128xf32> -> vector<512x128xf32>
    %10 = math.tanh %9 : vector<512x128xf32>
    %11 = arith.truncf %10 : vector<512x128xf32> to vector<512x128xbf16>
    %cst_9 = arith.constant dense<0.000000e+00> : vector<512x128xf32>
    %12 = tpu.matmul %0, %11, %cst_9 {dimension_numbers = #tpu.dot_dimension_numbers<[1], [0], [0], [1], [0, 0, 1, 1], [], []>} : vector<512x512xbf16>, vector<512x128xbf16>, vector<512x128xf32> -> vector<512x128xf32>
    %13 = arith.truncf %12 : vector<512x128xf32> to vector<512x128xbf16>
    %c0_10 = arith.constant 0 : index
    %c0_11 = arith.constant 0 : index
    %14 = vector.load %arg4[%c0_10, %c0_11] : memref<128x128xbf16, #tpu.memory_space<vmem>>, vector<128x128xbf16>
    %cst_12 = arith.constant dense<0.000000e+00> : vector<512x128xf32>
    %15 = tpu.matmul %13, %14, %cst_12 {dimension_numbers = #tpu.dot_dimension_numbers<[1], [0], [0], [1], [0, 0, 1, 1], [], []>} : vector<512x128xbf16>, vector<128x128xbf16>, vector<512x128xf32> -> vector<512x128xf32>
    %16 = arith.truncf %15 : vector<512x128xf32> to vector<512x128xbf16>
    %cst_13 = arith.constant dense<0.000000e+00> : vector<512x128xf32>
    %17 = tpu.matmul %0, %16, %cst_13 {dimension_numbers = #tpu.dot_dimension_numbers<[1], [0], [0], [1], [0, 0, 1, 1], [], []>} : vector<512x512xbf16>, vector<512x128xbf16>, vector<512x128xf32> -> vector<512x128xf32>
    %18 = arith.truncf %17 : vector<512x128xf32> to vector<512x128xbf16>
    %c0_14 = arith.constant 0 : index
    %c0_15 = arith.constant 0 : index
    %19 = vector.load %arg7[%c0_14, %c0_15] : memref<512x128xbf16, #tpu.memory_space<vmem>>, vector<512x128xbf16>
    tpu.vector_store %arg7[%c0_14, %c0_15], %18 {strides = array<i32>} : memref<512x128xbf16, #tpu.memory_space<vmem>>, vector<512x128xbf16>,
    %20 = arith.truncf %17 : vector<512x128xf32> to vector<512x128xbf16>
    %c0_16 = arith.constant 0 : index
    %c0_17 = arith.constant 0 : index
    %21 = vector.load %arg5[%c0_16, %c0_17] : memref<128x128xbf16, #tpu.memory_space<vmem>>, vector<128x128xbf16>
    %cst_18 = arith.constant dense<0.000000e+00> : vector<512x128xf32>
    %22 = tpu.matmul %20, %21, %cst_18 {dimension_numbers = #tpu.dot_dimension_numbers<[1], [0], [0], [1], [0, 0, 1, 1], [], []>} : vector<512x128xbf16>, vector<128x128xbf16>, vector<512x128xf32> -> vector<512x128xf32>
    %c0_19 = arith.constant 0 : index
    %c0_20 = arith.constant 0 : index
    %23 = vector.load %arg6[%c0_19, %c0_20] : memref<1x128xf32, #tpu.memory_space<vmem>>, vector<1x128xf32>
    %24 = vector.broadcast %23 : vector<1x128xf32> to vector<512x128xf32>
    %25 = arith.addf %22, %24 : vector<512x128xf32>
    %26 = tpu.iota {dimensions = array<i32: 1>} : vector<512x128xi32>
    %c8_i32 = arith.constant 8 : i32
    %27 = vector.broadcast %c8_i32 : i32 to vector<512x128xi32>
    %28 = arith.cmpi slt, %26, %27 : vector<512x128xi32>
    %cst_21 = arith.constant -1.000000e+30 : f32
    %29 = vector.broadcast %cst_21 : f32 to vector<512x128xf32>
    %30 = arith.select %28, %25, %29 : vector<512x128xi1>, vector<512x128xf32>
    %cst_22 = arith.constant dense<0xFF800000> : vector<512xf32>
    %31 = vector.multi_reduction <maximumf>, %30, %cst_22 [1] : vector<512x128xf32> to vector<512xf32>
    %32 = vector.shape_cast %31 : vector<512xf32> to vector<512x1xf32>
    %33 = vector.broadcast %32 : vector<512x1xf32> to vector<512x128xf32>
    %34 = arith.subf %30, %33 : vector<512x128xf32>
    %35 = math.exp %34 : vector<512x128xf32>
    %cst_23 = arith.constant dense<0.000000e+00> : vector<512xf32>
    %36 = vector.multi_reduction <add>, %35, %cst_23 [1] : vector<512x128xf32> to vector<512xf32>
    %37 = vector.shape_cast %36 : vector<512xf32> to vector<512x1xf32>
    %38 = vector.broadcast %37 : vector<512x1xf32> to vector<512x128xf32>
    %39 = arith.divf %35, %38 : vector<512x128xf32>
    %c0_24 = arith.constant 0 : index
    %c0_25 = arith.constant 0 : index
    %40 = vector.load %arg8[%c0_24, %c0_25] : memref<512x128xf32, #tpu.memory_space<vmem>>, vector<512x128xf32>
    tpu.vector_store %arg8[%c0_24, %c0_25], %39 {strides = array<i32>} : memref<512x128xf32, #tpu.memory_space<vmem>>, vector<512x128xf32>,
    return
  }
}

</mosaic_0001>

<bundles_post_ra>
// kernel: tpu_custom_call.1
= control target key start
LH: loop header
LB: loop body
LE: loop exit
PB: predicated region body
PF: predicated region fallthrough
CT: control target
= control target key end

     0   :  { %14 = vsyncpa [#allocation3], 0  ;;  %s9652_s0 = inlined_call_operand.hbm [shape: bf16[512,128], index: 0, kind: input, shape index: {}]   ;;  %s9653_s1 = inlined_call_operand.hbm [shape: bf16[512,512], index: 1, kind: input, shape index: {}]   ;;  %s9654_s2 = inlined_call_operand.hbm [shape: bf16[128,128], index: 2, kind: input, shape index: {}]   ;;  %s9655_s3 = inlined_call_operand.hbm [shape: bf16[128,128], index: 3, kind: input, shape index: {}]   ;;  %s9656_s4 = inlined_call_operand.hbm [shape: bf16[128,128], index: 4, kind: input, shape index: {}]   ;;  %s9657_s5 = inlined_call_operand.hbm [shape: bf16[128,128], index: 5, kind: input, shape index: {}]   ;;  %s9658_s6 = inlined_call_operand.vmem [shape: f32[1,128], index: 6, kind: input, shape index: {}]   ;;  %s9659_s7 = inlined_call_operand.hbm [shape: bf16[512,128], index: 7, kind: output, shape index: {0}]   ;;  %s9660_s8 = inlined_call_operand.hbm [shape: f32[512,128], index: 8, kind: output, shape index: {1}]  }
   0x1   :  { %15 = vsyncpa [#allocation6], 0 }
   0x2   :  { %16 = vsyncpa [#allocation9], 0 }
   0x3   :  { %17 = vsyncpa [#allocation12], 0 }
   0x4   :  { %18 = vsyncpa [#allocation4], 0 }
   0x5   :  { %19 = vsyncpa [#allocation15], 0  ;;  %s8138_s27 = smov [#allocation5]   ;;  %s7950_s9 = scalar_lea.hbm %s9653_s1, 16384 }
   0x6   :  { %s37_s28 = sshll.u32 %s8138_s27, 4  ;;  %p7951_p0 = scmp.ne.s32.totalorder %s9653_s1, %s7950_s9  ;;  %s38_s28 = int_to_ptr.vmem [resolvable:$true] %s37_s28 }
   0x7   :  { %p7954_p1 = scmp.lt.u32.totalorder %s7950_s9, %s9653_s1 }
   0x9   :  { %p7956_p2 = pnand %p7954_p1, %p7951_p0 }
   0xb   :  { %7959 = shalt.err (!%p7956_p2)
}
   0xc   :  { %s7960_s14 = scalar_lea.vmem %s38_s28, 16384  ;;  %p7965_p4 = scmp.lt.s32.totalorder %s38_s28, %s38_s28 }
   0xd   :  { %p7961_p3 = scmp.ne.s32.totalorder %s38_s28, %s7960_s14  ;;  %p7966_p5 = scmp.lt.s32.totalorder %s7960_s14, %s7960_s14 }
   0xf   :  { %p7967_p6 = por %p7966_p5, %p7965_p4 }
  0x11   :  { %p7968_p7 = pnand %p7967_p6, %p7961_p3 }
  0x13   :  { %7971 = shalt.err (!%p7968_p7)
}
  0x14   :  { %s8139_s15 = smov 256   ;;  %s8140_s16 = smov 16  }
  0x15   :  { %43 = dma.hbm_to_vmem [thread:$0]  %s9653_s1, 16384, %s38_s28, [#allocation6], %s8139_s15, %s8139_s15, %s8140_s16  }
  0x16   :  { %s8141_s19 = smov [#allocation8]   ;;  %s8142_s21 = smov [#allocation2]  }
  0x17   :  { %s61_s20 = sshll.u32 %s8141_s19, 4  ;;  %s25_s22 = sshll.u32 %s8142_s21, 4  ;;  %s62_s20 = int_to_ptr.vmem [resolvable:$true] %s61_s20  ;;  %s26_s22 = int_to_ptr.vmem [resolvable:$true] %s25_s22 }
  0x18   :  { %s7972_s25 = scalar_lea.hbm %s9655_s3, 1024 }
  0x19   :  { %p7973_p8 = scmp.ne.s32.totalorder %s9655_s3, %s7972_s25  ;;  %p7976_p9 = scmp.lt.u32.totalorder %s7972_s25, %s9655_s3 }
  0x1b   :  { %p7978_p10 = pnand %p7976_p9, %p7973_p8 }
  0x1d   :  { %7981 = shalt.err (!%p7978_p10)
}
  0x1e   :  { %s7982_s1 = scalar_lea.vmem %s62_s20, 1024  ;;  %p7987_p12 = scmp.lt.s32.totalorder %s62_s20, %s62_s20 }
  0x1f   :  { %p7983_p11 = scmp.ne.s32.totalorder %s62_s20, %s7982_s1  ;;  %p7988_p13 = scmp.lt.s32.totalorder %s7982_s1, %s7982_s1 }
  0x21   :  { %p7989_p0 = por %p7988_p13, %p7987_p12 }
  0x23   :  { %p7990_p1 = pnand %p7989_p0, %p7983_p11 }
  0x25   :  { %7993 = shalt.err (!%p7990_p1)
}
  0x26   :  { %s8143_s28 = smov 64   ;;  %s8144_s9 = smov 4  }
  0x27   :  { %67 = dma.hbm_to_vmem [thread:$0]  %s9655_s3, 1024, %s62_s20, [#allocation9], %s8143_s28, %s8143_s28, %s8144_s9  }
  0x28   :  { %s7994_s14 = scalar_lea.hbm %s9652_s0, 4096 }
  0x29   :  { %p7995_p2 = scmp.ne.s32.totalorder %s9652_s0, %s7994_s14  ;;  %p7998_p3 = scmp.lt.u32.totalorder %s7994_s14, %s9652_s0 }
  0x2b   :  { %p8000_p4 = pnand %p7998_p3, %p7995_p2 }
  0x2d   :  { %8003 = shalt.err (!%p8000_p4)
}
  0x2e   :  { %s8004_s19 = scalar_lea.vmem %s26_s22, 4096  ;;  %p8009_p6 = scmp.lt.s32.totalorder %s26_s22, %s26_s22 }
  0x2f   :  { %p8005_p5 = scmp.ne.s32.totalorder %s26_s22, %s8004_s19  ;;  %p8010_p7 = scmp.lt.s32.totalorder %s8004_s19, %s8004_s19 }
  0x31   :  { %p8011_p8 = por %p8010_p7, %p8009_p6 }
  0x33   :  { %p8012_p9 = pnand %p8011_p8, %p8005_p5 }
  0x35   :  { %8015 = shalt.err (!%p8012_p9)
}
  0x36   :  { %31 = dma.hbm_to_vmem [thread:$0]  %s9652_s0, 4096, %s26_s22, [#allocation3], %s8143_s28, %s8143_s28, %s8144_s9  }
  0x37   :  { %s8145_s21 = smov [#allocation7]   ;;  %s8146_s24 = smov [#allocation10]  }
  0x38   :  { %s49_s23 = sshll.u32 %s8145_s21, 4  ;;  %s73_s25 = sshll.u32 %s8146_s24, 4  ;;  %s50_s23 = int_to_ptr.vmem [resolvable:$true] %s49_s23  ;;  %s74_s25 = int_to_ptr.vmem [resolvable:$true] %s73_s25 }
  0x39   :  { %s8016_s29 = scalar_lea.hbm %s9654_s2, 1024 }
  0x3a   :  { %p8017_p10 = scmp.ne.s32.totalorder %s9654_s2, %s8016_s29  ;;  %p8020_p11 = scmp.lt.u32.totalorder %s8016_s29, %s9654_s2 }
  0x3c   :  { %p8022_p12 = pnand %p8020_p11, %p8017_p10 }
  0x3e   :  { %8025 = shalt.err (!%p8022_p12)
}
  0x3f   :  { %s8026_s0 = scalar_lea.vmem %s50_s23, 1024  ;;  %p8031_p0 = scmp.lt.s32.totalorder %s50_s23, %s50_s23 }
  0x40   :  { %p8027_p13 = scmp.ne.s32.totalorder %s50_s23, %s8026_s0  ;;  %p8032_p1 = scmp.lt.s32.totalorder %s8026_s0, %s8026_s0 }
  0x42   :  { %p8033_p2 = por %p8032_p1, %p8031_p0 }
  0x44   :  { %p8034_p3 = pnand %p8033_p2, %p8027_p13 }
  0x46   :  { %8037 = shalt.err (!%p8034_p3)
}
  0x47   :  { %55 = dma.hbm_to_vmem [thread:$0]  %s9654_s2, 1024, %s50_s23, [#allocation6], %s8143_s28, %s8143_s28, %s8144_s9  }
  0x48   :  { %s8038_s15 = scalar_lea.hbm %s9656_s4, 1024 }
  0x49   :  { %p8039_p4 = scmp.ne.s32.totalorder %s9656_s4, %s8038_s15  ;;  %p8042_p5 = scmp.lt.u32.totalorder %s8038_s15, %s9656_s4 }
  0x4b   :  { %p8044_p6 = pnand %p8042_p5, %p8039_p4 }
  0x4d   :  { %8047 = shalt.err (!%p8044_p6)
}
  0x4e   :  { %s8048_s3 = scalar_lea.vmem %s74_s25, 1024  ;;  %p8053_p8 = scmp.lt.s32.totalorder %s74_s25, %s74_s25 }
  0x4f   :  { %p8049_p7 = scmp.ne.s32.totalorder %s74_s25, %s8048_s3  ;;  %p8054_p9 = scmp.lt.s32.totalorder %s8048_s3, %s8048_s3 }
  0x51   :  { %p8055_p10 = por %p8054_p9, %p8053_p8 }
  0x53   :  { %p8056_p11 = pnand %p8055_p10, %p8049_p7 }
  0x55   :  { %8059 = shalt.err (!%p8056_p11)
}
  0x56   :  { %79 = dma.hbm_to_vmem [thread:$0]  %s9656_s4, 1024, %s74_s25, [#allocation9], %s8143_s28, %s8143_s28, %s8144_s9  }
  0x57   :  { %s8147_s21 = smov [#allocation11]   ;;  %s8060_s27 = scalar_lea.hbm %s9657_s5, 1024 }
  0x58   :  { %s85_s23 = sshll.u32 %s8147_s21, 4  ;;  %p8061_p12 = scmp.ne.s32.totalorder %s9657_s5, %s8060_s27  ;;  %s86_s23 = int_to_ptr.vmem [resolvable:$true] %s85_s23 }
  0x59   :  { %p8064_p13 = scmp.lt.u32.totalorder %s8060_s27, %s9657_s5 }
  0x5b   :  { %p8066_p0 = pnand %p8064_p13, %p8061_p12 }
  0x5d   :  { %8069 = shalt.err (!%p8066_p0)
}
  0x5e   :  { %s8070_s11 = scalar_lea.vmem %s86_s23, 1024  ;;  %p8075_p2 = scmp.lt.s32.totalorder %s86_s23, %s86_s23 }
  0x5f   :  { %p8071_p1 = scmp.ne.s32.totalorder %s86_s23, %s8070_s11  ;;  %p8076_p3 = scmp.lt.s32.totalorder %s8070_s11, %s8070_s11 }
  0x61   :  { %p8077_p4 = por %p8076_p3, %p8075_p2 }
  0x63   :  { %p8078_p5 = pnand %p8077_p4, %p8071_p1 }
  0x65   :  { %8081 = shalt.err (!%p8078_p5)
}
  0x66   :  { %91 = dma.hbm_to_vmem [thread:$0]  %s9657_s5, 1024, %s86_s23, [#allocation12], %s8143_s28, %s8143_s28, %s8144_s9  }
  0x67   :  { %8126 = dma.done.wait [#allocation3], 4096  }
  0x68   :  { %8127 = vsyncadd [#allocation3], 4294963200 }
  0x69   :  { %8128 = dma.done.wait [#allocation6], 17408  }
  0x6a   :  { %8129 = vsyncadd [#allocation6], 4294949888 }
  0x6b   :  { %8130 = dma.done.wait [#allocation9], 2048  }
  0x6c   :  { %8131 = vsyncadd [#allocation9], 4294965248 }
  0x6d   :  { %8132 = dma.done.wait [#allocation12], 1024  }
  0x6e   :  { %8133 = vsyncadd [#allocation12], 4294966272  ;;  %v7028_v0 = vld [vmem:[#allocation7] sm:$0xff]   ;;  %v7029_v1 = vld [vmem:[#allocation7 + $0x8] sm:$0xff]   ;;  %v9661_v35 = vmov 0  }
  0x6f   :  { %6313 = vmatprep.subr.bf16.mxu0 %v7028_v0  ;;  %v7030_v2 = vld [vmem:[#allocation7 + $0x10] sm:$0xff]   ;;  %v7031_v3 = vld [vmem:[#allocation7 + $0x18] sm:$0xff]   ;;  %v7036_v4 = vld [vmem:[#allocation2] sm:$0xff]   ;;  %6633 = vmatprep.subr.bf16.mxu1 %v9661_v35 }
  0x70   :  { %6314 = vmatpush3.bf16.msra.mxu0 %v7028_v0  ;;  %6329 = vmatprep.mubr.bf16.mxu0 %v7036_v4  ;;  %v7032_v5 = vld [vmem:[#allocation7 + $0x20] sm:$0xff]   ;;  %v7033_v6 = vld [vmem:[#allocation7 + $0x28] sm:$0xff]   ;;  %v7034_v7 = vld [vmem:[#allocation7 + $0x30] sm:$0xff]  }
  0x71   :  { %6315 = vmatprep.subr.bf16.mxu0 %v7029_v1  ;;  %v7035_v8 = vld [vmem:[#allocation7 + $0x38] sm:$0xff]   ;;  %v7037_v9 = vld [vmem:[#allocation2 + $0x8] sm:$0xff]   ;;  %v7038_v10 = vld [vmem:[#allocation2 + $0x10] sm:$0xff]  }
  0x72   :  { %v7039_v11 = vld [vmem:[#allocation2 + $0x18] sm:$0xff]   ;;  %v7040_v12 = vld [vmem:[#allocation2 + $0x20] sm:$0xff]   ;;  %v7041_v13 = vld [vmem:[#allocation2 + $0x28] sm:$0xff]  }
  0x73   :  { %v7042_v14 = vld [vmem:[#allocation2 + $0x30] sm:$0xff]   ;;  %v7043_v15 = vld [vmem:[#allocation2 + $0x38] sm:$0xff]   ;;  %v7044_v16 = vld [vmem:[#allocation2 + $0x40] sm:$0xff]  }
  0x74   :  { %6316 = vmatpush3.bf16.msra.mxu0 %v7029_v1  ;;  %v7045_v17 = vld [vmem:[#allocation2 + $0x48] sm:$0xff]   ;;  %v7046_v18 = vld [vmem:[#allocation2 + $0x50] sm:$0xff]   ;;  %v7047_v19 = vld [vmem:[#allocation2 + $0x58] sm:$0xff]  }
  0x75   :  { %6317 = vmatprep.subr.bf16.mxu0 %v7030_v2  ;;  %v7048_v20 = vld [vmem:[#allocation2 + $0x60] sm:$0xff]   ;;  %v7049_v21 = vld [vmem:[#allocation2 + $0x68] sm:$0xff]   ;;  %v7050_v22 = vld [vmem:[#allocation2 + $0x70] sm:$0xff]  }
  0x76   :  { %v7051_v23 = vld [vmem:[#allocation2 + $0x78] sm:$0xff]   ;;  %v7052_v24 = vld [vmem:[#allocation2 + $0x80] sm:$0xff]   ;;  %v7053_v25 = vld [vmem:[#allocation2 + $0x88] sm:$0xff]  }
  0x77   :  { %v7054_v26 = vld [vmem:[#allocation2 + $0x90] sm:$0xff]   ;;  %v7055_v27 = vld [vmem:[#allocation2 + $0x98] sm:$0xff]   ;;  %v7056_v28 = vld [vmem:[#allocation2 + $0xa0] sm:$0xff]  }
  0x78   :  { %6318 = vmatpush3.bf16.msra.mxu0 %v7030_v2  ;;  %v7057_v29 = vld [vmem:[#allocation2 + $0xa8] sm:$0xff]   ;;  %v7058_v30 = vld [vmem:[#allocation2 + $0xb0] sm:$0xff]   ;;  %v7059_v31 = vld [vmem:[#allocation2 + $0xb8] sm:$0xff]  }
  0x79   :  { %6319 = vmatprep.subr.bf16.mxu0 %v7031_v3  ;;  %v7060_v32 = vld [vmem:[#allocation2 + $0xc0] sm:$0xff]   ;;  %v7061_v33 = vld [vmem:[#allocation2 + $0xc8] sm:$0xff]   ;;  %v7062_v34 = vld [vmem:[#allocation2 + $0xd0] sm:$0xff]  }
  0x7a   :  { %v7063_v36 = vld [vmem:[#allocation2 + $0xd8] sm:$0xff]   ;;  %v7064_v37 = vld [vmem:[#allocation2 + $0xe0] sm:$0xff]   ;;  %v7065_v38 = vld [vmem:[#allocation2 + $0xe8] sm:$0xff]  }
  0x7b   :  { %v7066_v39 = vld [vmem:[#allocation2 + $0xf0] sm:$0xff]   ;;  %v7067_v40 = vld [vmem:[#allocation2 + $0xf8] sm:$0xff]  }
  0x7c   :  { %6320 = vmatpush3.bf16.msra.mxu0 %v7031_v3  ;;  %v7068_v41 = vld [vmem:[#allocation5 + $0x244] ss:$16 sps:$4 sm:$0xff]  }
  0x7d   :  { %6321 = vmatprep.subr.bf16.mxu0 %v7032_v5  ;;  %1762 = vmatprep.mubr.bf16.mxu1 %v7068_v41 }
  0x80   :  { %6322 = vmatpush3.bf16.msra.mxu0 %v7032_v5 }
  0x81   :  { %6323 = vmatprep.subr.bf16.mxu0 %v7033_v6 }
  0x84   :  { %6324 = vmatpush3.bf16.msra.mxu0 %v7033_v6 }
  0x85   :  { %6325 = vmatprep.subr.bf16.mxu0 %v7034_v7 }
  0x88   :  { %6326 = vmatpush3.bf16.msra.mxu0 %v7034_v7 }
  0x89   :  { %6327 = vmatprep.subr.bf16.mxu0 %v7035_v8 }
  0x8c   :  { %6328 = vmatpush3.bf16.msra.mxu0 %v7035_v8 }
  0x8d   :  { %1586 = vmatprep.subr.bf16.mxu0 %v9661_v35 }
  0x8f   :  { %6330 = vmatmul.mubr.bf16.vlgmr.msra.gmra.mrb[0].mxu0 %v7037_v9 }
  0x90   :  { %6333 = vmatprep.mubr.bf16.mxu0 %v7038_v10 }
  0x97   :  { %6334 = vmatmul.mubr.bf16.gmra.mrb[4].mxu0 %v7039_v11 }
  0x98   :  { %6337 = vmatprep.mubr.bf16.mxu0 %v7040_v12 }
  0x9f   :  { %6338 = vmatmul.mubr.bf16.gmra.mrb[8].mxu0 %v7041_v13 }
  0xa0   :  { %6341 = vmatprep.mubr.bf16.mxu0 %v7042_v14 }
  0xa7   :  { %6342 = vmatmul.mubr.bf16.gmra.mrb[12].mxu0 %v7043_v15 }
  0xa8   :  { %6345 = vmatprep.mubr.bf16.mxu0 %v7044_v16 }
  0xaf   :  { %6346 = vmatmul.mubr.bf16.gmra.mrb[16].mxu0 %v7045_v17 }
  0xb0   :  { %6349 = vmatprep.mubr.bf16.mxu0 %v7046_v18 }
  0xb7   :  { %6350 = vmatmul.mubr.bf16.gmra.mrb[20].mxu0 %v7047_v19 }
  0xb8   :  { %6353 = vmatprep.mubr.bf16.mxu0 %v7048_v20 }
  0xbf   :  { %6354 = vmatmul.mubr.bf16.gmra.mrb[24].mxu0 %v7049_v21 }
  0xc0   :  { %6357 = vmatprep.mubr.bf16.mxu0 %v7050_v22 }
  0xc7   :  { %6358 = vmatmul.mubr.bf16.gmra.mrb[28].mxu0 %v7051_v23 }
  0xc8   :  { %6361 = vmatprep.mubr.bf16.mxu0 %v7052_v24 }
  0xcf   :  { %6362 = vmatmul.mubr.bf16.gmra.mrb[32].mxu0 %v7053_v25 }
  0xd0   :  { %6365 = vmatprep.mubr.bf16.mxu0 %v7054_v26 }
  0xd7   :  { %6366 = vmatmul.mubr.bf16.gmra.mrb[36].mxu0 %v7055_v27 }
  0xd8   :  { %6369 = vmatprep.mubr.bf16.mxu0 %v7056_v28 }
  0xdf   :  { %6370 = vmatmul.mubr.bf16.gmra.mrb[40].mxu0 %v7057_v29 }
  0xe0   :  { %6373 = vmatprep.mubr.bf16.mxu0 %v7058_v30 }
  0xe7   :  { %6374 = vmatmul.mubr.bf16.gmra.mrb[44].mxu0 %v7059_v31 }
  0xe8   :  { %6377 = vmatprep.mubr.bf16.mxu0 %v7060_v32 }
  0xef   :  { %6378 = vmatmul.mubr.bf16.gmra.mrb[48].mxu0 %v7061_v33 }
  0xf0   :  { %6381 = vmatprep.mubr.bf16.mxu0 %v7062_v34 }
  0xf7   :  { %6382 = vmatmul.mubr.bf16.gmra.mrb[52].mxu0 %v7063_v36 }
  0xf8   :  { %6385 = vmatprep.mubr.bf16.mxu0 %v7064_v37 }
  0xff   :  { %6386 = vmatmul.mubr.bf16.gmra.mrb[56].mxu0 %v7065_v38 }
 0x100   :  { %6389 = vmatprep.mubr.bf16.mxu0 %v7066_v39 }
 0x107   :  { %6390 = vmatmul.mubr.bf16.gmra.mrb[60].mxu0 %v7067_v40 }
 0x162   :  { %v6331_v42 = vpop.f32.mrb[0].mxu0 }
 0x163   :  { %7284 = vtanh.f32 %v6331_v42  ;;  %v595_v43 = vpop.f32.mrb[1].mxu0 }
 0x164   :  { %7286 = vtanh.f32 %v595_v43  ;;  %v6332_v44 = vpop.f32.mrb[2].mxu0 }
 0x165   :  { %7288 = vtanh.f32 %v6332_v44  ;;  %v598_v45 = vpop.f32.mrb[3].mxu0  ;;  %v7112_v44 = vld [vmem:[#allocation5 + $0x4] ss:$16 sps:$4 sm:$0xff]  }
 0x166   :  { %7290 = vtanh.f32 %v598_v45  ;;  %1618 = vmatprep.mubr.bf16.mxu0 %v7112_v44 }
 0x16a   :  { %v6335_v46 = vpop.f32.mrb[4].mxu0 }
 0x16b   :  { %7292 = vtanh.f32 %v6335_v46  ;;  %v611_v47 = vpop.f32.mrb[5].mxu0 }
 0x16c   :  { %7294 = vtanh.f32 %v611_v47  ;;  %v6336_v48 = vpop.f32.mrb[6].mxu0 }
 0x16d   :  { %v7285_v49 = vpop.eup %7284  ;;  %7296 = vtanh.f32 %v6336_v48  ;;  %v614_v50 = vpop.f32.mrb[7].mxu0 }
 0x16e   :  { %v7287_v51 = vpop.eup %7286  ;;  %7298 = vtanh.f32 %v614_v50 }
 0x16f   :  { %v7289_v52 = vpop.eup %7288 }
 0x170   :  { %v7291_v53 = vpop.eup %7290  ;;  %v915_v54 = vpack.c.bf16 %v7289_v52, %v7285_v49 }
 0x171   :  { %v914_v55 = vpack.c.bf16 %v7291_v53, %v7287_v51 }
 0x172   :  { %v6339_v56 = vpop.f32.mrb[8].mxu0 }
 0x173   :  { %7300 = vtanh.f32 %v6339_v56  ;;  %v627_v57 = vpop.f32.mrb[9].mxu0  ;;  %1587 = vmatpush1.bf16.msra.mxu0 %v914_v55  ;;  %6649 = vmatpush1.bf16.msra.mxu1 %v914_v55 }
 0x174   :  { %7302 = vtanh.f32 %v627_v57  ;;  %v6340_v58 = vpop.f32.mrb[10].mxu0  ;;  %1588 = vmatprep.subr.bf16.mxu0 %v9661_v35  ;;  %6634 = vmatprep.subr.bf16.mxu1 %v9661_v35 }
 0x175   :  { %v7293_v59 = vpop.eup %7292  ;;  %7304 = vtanh.f32 %v6340_v58  ;;  %v630_v60 = vpop.f32.mrb[11].mxu0 }
 0x176   :  { %v7295_v61 = vpop.eup %7294  ;;  %7306 = vtanh.f32 %v630_v60 }
 0x177   :  { %v7297_v62 = vpop.eup %7296  ;;  %1589 = vmatpush1.bf16.msra.mxu0 %v915_v54  ;;  %6650 = vmatpush1.bf16.msra.mxu1 %v915_v54 }
 0x178   :  { %v7299_v63 = vpop.eup %7298  ;;  %1590 = vmatprep.subr.bf16.mxu0 %v9661_v35  ;;  %6635 = vmatprep.subr.bf16.mxu1 %v9661_v35  ;;  %v917_v0 = vpack.c.bf16 %v7297_v62, %v7293_v59 }
 0x179   :  { %v916_v1 = vpack.c.bf16 %v7299_v63, %v7295_v61 }
 0x17a   :  { %v6343_v2 = vpop.f32.mrb[12].mxu0 }
 0x17b   :  { %7308 = vtanh.f32 %v6343_v2  ;;  %v643_v3 = vpop.f32.mrb[13].mxu0  ;;  %1591 = vmatpush1.bf16.msra.mxu0 %v916_v1  ;;  %6651 = vmatpush1.bf16.msra.mxu1 %v916_v1 }
 0x17c   :  { %7310 = vtanh.f32 %v643_v3  ;;  %v6344_v4 = vpop.f32.mrb[14].mxu0  ;;  %1592 = vmatprep.subr.bf16.mxu0 %v9661_v35  ;;  %6636 = vmatprep.subr.bf16.mxu1 %v9661_v35 }
 0x17d   :  { %v7301_v5 = vpop.eup %7300  ;;  %7312 = vtanh.f32 %v6344_v4  ;;  %v646_v6 = vpop.f32.mrb[15].mxu0 }
 0x17e   :  { %v7303_v7 = vpop.eup %7302  ;;  %7314 = vtanh.f32 %v646_v6  ;;  %v7070_v6 = vld [vmem:[#allocation5 + $0x240] ss:$16 sps:$4 sm:$0xff]  }
 0x17f   :  { %v7305_v8 = vpop.eup %7304  ;;  %1593 = vmatpush1.bf16.msra.mxu0 %v917_v0  ;;  %6652 = vmatpush1.bf16.msra.mxu1 %v917_v0 }
 0x180   :  { %v7307_v9 = vpop.eup %7306  ;;  %1594 = vmatprep.subr.bf16.mxu0 %v9661_v35  ;;  %6637 = vmatprep.subr.bf16.mxu1 %v9661_v35  ;;  %v919_v10 = vpack.c.bf16 %v7305_v8, %v7301_v5 }
 0x181   :  { %v918_v11 = vpack.c.bf16 %v7307_v9, %v7303_v7  ;;  %v7110_v7 = vld [vmem:[#allocation5] ss:$16 sps:$4 sm:$0xff]   ;;  %v7071_v9 = vld [vmem:[#allocation5 + $0x264] ss:$16 sps:$4 sm:$0xff]  }
 0x182   :  { %v6347_v12 = vpop.f32.mrb[16].mxu0 }
 0x183   :  { %7316 = vtanh.f32 %v6347_v12  ;;  %v659_v13 = vpop.f32.mrb[17].mxu0  ;;  %1595 = vmatpush1.bf16.msra.mxu0 %v918_v11  ;;  %6653 = vmatpush1.bf16.msra.mxu1 %v918_v11  ;;  %v7116_v12 = vld [vmem:[#allocation5 + $0x24] ss:$16 sps:$4 sm:$0xff]  }
 0x184   :  { %7318 = vtanh.f32 %v659_v13  ;;  %v6348_v14 = vpop.f32.mrb[18].mxu0  ;;  %1596 = vmatprep.subr.bf16.mxu0 %v9661_v35  ;;  %6638 = vmatprep.subr.bf16.mxu1 %v9661_v35 }
 0x185   :  { %v7309_v15 = vpop.eup %7308  ;;  %7320 = vtanh.f32 %v6348_v14  ;;  %v662_v16 = vpop.f32.mrb[19].mxu0 }
 0x186   :  { %v7311_v17 = vpop.eup %7310  ;;  %7322 = vtanh.f32 %v662_v16 }
 0x187   :  { %v7313_v18 = vpop.eup %7312  ;;  %1597 = vmatpush1.bf16.msra.mxu0 %v919_v10  ;;  %6654 = vmatpush1.bf16.msra.mxu1 %v919_v10 }
 0x188   :  { %v7315_v19 = vpop.eup %7314  ;;  %1598 = vmatprep.subr.bf16.mxu0 %v9661_v35  ;;  %6639 = vmatprep.subr.bf16.mxu1 %v9661_v35  ;;  %v921_v20 = vpack.c.bf16 %v7313_v18, %v7309_v15 }
 0x189   :  { %v920_v21 = vpack.c.bf16 %v7315_v19, %v7311_v17 }
 0x18a   :  { %v6351_v22 = vpop.f32.mrb[20].mxu0 }
 0x18b   :  { %7324 = vtanh.f32 %v6351_v22  ;;  %v675_v23 = vpop.f32.mrb[21].mxu0  ;;  %1599 = vmatpush1.bf16.msra.mxu0 %v920_v21  ;;  %6655 = vmatpush1.bf16.msra.mxu1 %v920_v21  ;;  %v7118_v21 = vld [vmem:[#allocation5 + $0x20] ss:$16 sps:$4 sm:$0xff]  }
 0x18c   :  { %7326 = vtanh.f32 %v675_v23  ;;  %v6352_v24 = vpop.f32.mrb[22].mxu0  ;;  %1600 = vmatprep.subr.bf16.mxu0 %v9661_v35  ;;  %6640 = vmatprep.subr.bf16.mxu1 %v9661_v35  ;;  %v7074_v23 = vld [vmem:[#allocation5 + $0x284] ss:$16 sps:$4 sm:$0xff]  }
 0x18d   :  { %v7317_v25 = vpop.eup %7316  ;;  %7328 = vtanh.f32 %v6352_v24  ;;  %v678_v26 = vpop.f32.mrb[23].mxu0 }
 0x18e   :  { %v7319_v27 = vpop.eup %7318  ;;  %7330 = vtanh.f32 %v678_v26  ;;  %v7122_v26 = vld [vmem:[#allocation5 + $0x44] ss:$16 sps:$4 sm:$0xff]  }
 0x18f   :  { %v7321_v28 = vpop.eup %7320  ;;  %1601 = vmatpush1.bf16.msra.mxu0 %v921_v20  ;;  %6656 = vmatpush1.bf16.msra.mxu1 %v921_v20  ;;  %v7073_v20 = vld [vmem:[#allocation5 + $0x260] ss:$16 sps:$4 sm:$0xff]  }
 0x190   :  { %v7323_v29 = vpop.eup %7322  ;;  %1602 = vmatprep.subr.bf16.mxu0 %v9661_v35  ;;  %6641 = vmatprep.subr.bf16.mxu1 %v9661_v35  ;;  %v923_v30 = vpack.c.bf16 %v7321_v28, %v7317_v25 }
 0x191   :  { %v922_v31 = vpack.c.bf16 %v7323_v29, %v7319_v27 }
 0x192   :  { %v6355_v32 = vpop.f32.mrb[24].mxu0 }
 0x193   :  { %7332 = vtanh.f32 %v6355_v32  ;;  %v691_v33 = vpop.f32.mrb[25].mxu0  ;;  %1603 = vmatpush1.bf16.msra.mxu0 %v922_v31  ;;  %6657 = vmatpush1.bf16.msra.mxu1 %v922_v31 }
 0x194   :  { %7334 = vtanh.f32 %v691_v33  ;;  %v6356_v34 = vpop.f32.mrb[26].mxu0  ;;  %1604 = vmatprep.subr.bf16.mxu0 %v9661_v35  ;;  %6642 = vmatprep.subr.bf16.mxu1 %v9661_v35 }
 0x195   :  { %v7325_v36 = vpop.eup %7324  ;;  %7336 = vtanh.f32 %v6356_v34  ;;  %v694_v37 = vpop.f32.mrb[27].mxu0  ;;  %v7076_v34 = vld [vmem:[#allocation5 + $0x280] ss:$16 sps:$4 sm:$0xff]  }
 0x196   :  { %v7327_v38 = vpop.eup %7326  ;;  %7338 = vtanh.f32 %v694_v37 }
 0x197   :  { %v7329_v39 = vpop.eup %7328  ;;  %1605 = vmatpush1.bf16.msra.mxu0 %v923_v30  ;;  %6658 = vmatpush1.bf16.msra.mxu1 %v923_v30 }
 0x198   :  { %v7331_v40 = vpop.eup %7330  ;;  %1606 = vmatprep.subr.bf16.mxu0 %v9661_v35  ;;  %6643 = vmatprep.subr.bf16.mxu1 %v9661_v35  ;;  %v925_v41 = vpack.c.bf16 %v7329_v39, %v7325_v36  ;;  %v7124_v36 = vld [vmem:[#allocation5 + $0x40] ss:$16 sps:$4 sm:$0xff]  }
 0x199   :  { %v924_v42 = vpack.c.bf16 %v7331_v40, %v7327_v38  ;;  %v7077_v38 = vld [vmem:[#allocation5 + $0x2a4] ss:$16 sps:$4 sm:$0xff]  }
 0x19a   :  { %v6359_v43 = vpop.f32.mrb[28].mxu0 }
 0x19b   :  { %7340 = vtanh.f32 %v6359_v43  ;;  %v707_v45 = vpop.f32.mrb[29].mxu0  ;;  %1607 = vmatpush1.bf16.msra.mxu0 %v924_v42  ;;  %6659 = vmatpush1.bf16.msra.mxu1 %v924_v42 }
 0x19c   :  { %7342 = vtanh.f32 %v707_v45  ;;  %v6360_v46 = vpop.f32.mrb[30].mxu0  ;;  %1608 = vmatprep.subr.bf16.mxu0 %v9661_v35  ;;  %6644 = vmatprep.subr.bf16.mxu1 %v9661_v35 }
 0x19d   :  { %v7333_v47 = vpop.eup %7332  ;;  %7344 = vtanh.f32 %v6360_v46  ;;  %v710_v48 = vpop.f32.mrb[31].mxu0 }
 0x19e   :  { %v7335_v49 = vpop.eup %7334  ;;  %7346 = vtanh.f32 %v710_v48 }
 0x19f   :  { %v7337_v50 = vpop.eup %7336  ;;  %1609 = vmatpush1.bf16.msra.mxu0 %v925_v41  ;;  %6660 = vmatpush1.bf16.msra.mxu1 %v925_v41  ;;  %v7128_v41 = vld [vmem:[#allocation5 + $0x64] ss:$16 sps:$4 sm:$0xff]  }
 0x1a0   :  { %v7339_v51 = vpop.eup %7338  ;;  %1610 = vmatprep.subr.bf16.mxu0 %v9661_v35  ;;  %6645 = vmatprep.subr.bf16.mxu1 %v9661_v35  ;;  %v927_v52 = vpack.c.bf16 %v7337_v50, %v7333_v47  ;;  %v7130_v50 = vld [vmem:[#allocation5 + $0x60] ss:$16 sps:$4 sm:$0xff]  }
 0x1a1   :  { %v926_v53 = vpack.c.bf16 %v7339_v51, %v7335_v49  ;;  %v7079_v49 = vld [vmem:[#allocation5 + $0x2a0] ss:$16 sps:$4 sm:$0xff]  }
 0x1a2   :  { %v6363_v54 = vpop.f32.mrb[32].mxu0 }
 0x1a3   :  { %7348 = vtanh.f32 %v6363_v54  ;;  %1611 = vmatpush1.bf16.msra.mxu0 %v926_v53  ;;  %6661 = vmatpush1.bf16.msra.mxu1 %v926_v53  ;;  %v723_v55 = vpop.f32.mrb[33].mxu0 }
 0x1a4   :  { %7350 = vtanh.f32 %v723_v55  ;;  %v6364_v56 = vpop.f32.mrb[34].mxu0  ;;  %1612 = vmatprep.subr.bf16.mxu0 %v9661_v35  ;;  %6646 = vmatprep.subr.bf16.mxu1 %v9661_v35  ;;  %v7134_v55 = vld [vmem:[#allocation5 + $0x84] ss:$16 sps:$4 sm:$0xff]  }
 0x1a5   :  { %v7341_v57 = vpop.eup %7340  ;;  %7352 = vtanh.f32 %v6364_v56  ;;  %v726_v58 = vpop.f32.mrb[35].mxu0 }
 0x1a6   :  { %v7343_v59 = vpop.eup %7342  ;;  %7354 = vtanh.f32 %v726_v58 }
 0x1a7   :  { %v7345_v60 = vpop.eup %7344  ;;  %1613 = vmatpush1.bf16.msra.mxu0 %v927_v52  ;;  %6662 = vmatpush1.bf16.msra.mxu1 %v927_v52  ;;  %v7080_v52 = vld [vmem:[#allocation5 + $0x2c4] ss:$16 sps:$4 sm:$0xff]  }
 0x1a8   :  { %v7347_v61 = vpop.eup %7346  ;;  %1614 = vmatprep.subr.bf16.mxu0 %v9661_v35  ;;  %6647 = vmatprep.subr.bf16.mxu1 %v9661_v35  ;;  %v929_v62 = vpack.c.bf16 %v7345_v60, %v7341_v57 }
 0x1a9   :  { %v928_v63 = vpack.c.bf16 %v7347_v61, %v7343_v59 }
 0x1aa   :  { %v6367_v0 = vpop.f32.mrb[36].mxu0 }
 0x1ab   :  { %1615 = vmatpush1.bf16.msra.mxu0 %v928_v63  ;;  %6663 = vmatpush1.bf16.msra.mxu1 %v928_v63  ;;  %7356 = vtanh.f32 %v6367_v0  ;;  %v739_v1 = vpop.f32.mrb[37].mxu0  ;;  %v7082_v63 = vld [vmem:[#allocation5 + $0x2c0] ss:$16 sps:$4 sm:$0xff]  }
 0x1ac   :  { %1616 = vmatprep.subr.bf16.mxu0 %v9661_v35  ;;  %6648 = vmatprep.subr.bf16.mxu1 %v9661_v35  ;;  %7358 = vtanh.f32 %v739_v1  ;;  %v6368_v2 = vpop.f32.mrb[38].mxu0  ;;  %v7136_v0 = vld [vmem:[#allocation5 + $0x80] ss:$16 sps:$4 sm:$0xff]  }
 0x1ad   :  { %v7349_v3 = vpop.eup %7348  ;;  %7360 = vtanh.f32 %v6368_v2  ;;  %v742_v4 = vpop.f32.mrb[39].mxu0  ;;  %v7083_v2 = vld [vmem:[#allocation5 + $0x2e4] ss:$16 sps:$4 sm:$0xff]  }
 0x1ae   :  { %v7351_v5 = vpop.eup %7350  ;;  %7362 = vtanh.f32 %v742_v4 }
 0x1af   :  { %v7353_v8 = vpop.eup %7352  ;;  %1617 = vmatpush1.bf16.msra.mxu0 %v929_v62  ;;  %6664 = vmatpush1.bf16.msra.mxu1 %v929_v62 }
 0x1b0   :  { %v7355_v10 = vpop.eup %7354  ;;  %1875 = vmatprep.subr.bf16.mxu1 %v9661_v35  ;;  %v931_v11 = vpack.c.bf16 %v7353_v8, %v7349_v3 }
 0x1b1   :  { %v930_v13 = vpack.c.bf16 %v7355_v10, %v7351_v5  ;;  %v7140_v5 = vld [vmem:[#allocation5 + $0xa4] ss:$16 sps:$4 sm:$0xff]  }
 0x1b2   :  { %1763 = vmatmul.mubr.bf16.vlgmr.msra.gmra.mrb[0].mxu1 %v7070_v6  ;;  %v6371_v14 = vpop.f32.mrb[40].mxu0  ;;  %1619 = vmatmul.mubr.bf16.vlgmr.msra.gmra.mrb[64].mxu0 %v7110_v7 }
 0x1b3   :  { %1876 = vmatpush1.bf16.msra.mxu1 %v930_v13  ;;  %1770 = vmatprep.mubr.bf16.mxu1 %v7071_v9  ;;  %7364 = vtanh.f32 %v6371_v14  ;;  %v755_v15 = vpop.f32.mrb[41].mxu0  ;;  %v7085_v13 = vld [vmem:[#allocation5 + $0x2e0] ss:$16 sps:$4 sm:$0xff]  }
 0x1b4   :  { %1877 = vmatprep.subr.bf16.mxu1 %v9661_v35  ;;  %7366 = vtanh.f32 %v755_v15  ;;  %v6372_v16 = vpop.f32.mrb[42].mxu0  ;;  %1626 = vmatprep.mubr.bf16.mxu0 %v7116_v12  ;;  %v7142_v14 = vld [vmem:[#allocation5 + $0xa0] ss:$16 sps:$4 sm:$0xff]  }
 0x1b5   :  { %v7357_v17 = vpop.eup %7356  ;;  %7368 = vtanh.f32 %v6372_v16  ;;  %v758_v18 = vpop.f32.mrb[43].mxu0  ;;  %v7086_v16 = vld [vmem:[#allocation5 + $0x304] ss:$16 sps:$4 sm:$0xff]  }
 0x1b6   :  { %v7359_v19 = vpop.eup %7358  ;;  %7370 = vtanh.f32 %v758_v18 }
 0x1b7   :  { %v7361_v22 = vpop.eup %7360  ;;  %1878 = vmatpush1.bf16.msra.mxu1 %v931_v11 }
 0x1b8   :  { %v7363_v24 = vpop.eup %7362  ;;  %1879 = vmatprep.subr.bf16.mxu1 %v9661_v35  ;;  %v933_v25 = vpack.c.bf16 %v7361_v22, %v7357_v17 }
 0x1b9   :  { %v932_v27 = vpack.c.bf16 %v7363_v24, %v7359_v19  ;;  %v7146_v19 = vld [vmem:[#allocation5 + $0xc4] ss:$16 sps:$4 sm:$0xff]  }
 0x1ba   :  { %1771 = vmatmul.mubr.bf16.gmra.mrb[4].mxu1 %v7073_v20  ;;  %v6375_v28 = vpop.f32.mrb[44].mxu0  ;;  %1627 = vmatmul.mubr.bf16.gmra.mrb[68].mxu0 %v7118_v21 }
 0x1bb   :  { %1778 = vmatprep.mubr.bf16.mxu1 %v7074_v23  ;;  %1880 = vmatpush1.bf16.msra.mxu1 %v932_v27  ;;  %7372 = vtanh.f32 %v6375_v28  ;;  %v771_v29 = vpop.f32.mrb[45].mxu0  ;;  %v7088_v27 = vld [vmem:[#allocation5 + $0x300] ss:$16 sps:$4 sm:$0xff]  }
 0x1bc   :  { %1881 = vmatprep.subr.bf16.mxu1 %v9661_v35  ;;  %7374 = vtanh.f32 %v771_v29  ;;  %v6376_v30 = vpop.f32.mrb[46].mxu0  ;;  %1634 = vmatprep.mubr.bf16.mxu0 %v7122_v26  ;;  %v7148_v28 = vld [vmem:[#allocation5 + $0xc0] ss:$16 sps:$4 sm:$0xff]  }
 0x1bd   :  { %v7365_v31 = vpop.eup %7364  ;;  %7376 = vtanh.f32 %v6376_v30  ;;  %v774_v32 = vpop.f32.mrb[47].mxu0  ;;  %v7089_v30 = vld [vmem:[#allocation5 + $0x324] ss:$16 sps:$4 sm:$0xff]  }
 0x1be   :  { %v7367_v33 = vpop.eup %7366  ;;  %7378 = vtanh.f32 %v774_v32 }
 0x1bf   :  { %v7369_v37 = vpop.eup %7368  ;;  %1882 = vmatpush1.bf16.msra.mxu1 %v933_v25 }
 0x1c0   :  { %v7371_v39 = vpop.eup %7370  ;;  %1883 = vmatprep.subr.bf16.mxu1 %v9661_v35  ;;  %v935_v40 = vpack.c.bf16 %v7369_v37, %v7365_v31 }
 0x1c1   :  { %v934_v42 = vpack.c.bf16 %v7371_v39, %v7367_v33  ;;  %v7152_v33 = vld [vmem:[#allocation5 + $0xe4] ss:$16 sps:$4 sm:$0xff]   ;;  %v7154_v39 = vld [vmem:[#allocation5 + $0xe0] ss:$16 sps:$4 sm:$0xff]  }
 0x1c2   :  { %1779 = vmatmul.mubr.bf16.gmra.mrb[8].mxu1 %v7076_v34  ;;  %v6379_v43 = vpop.f32.mrb[48].mxu0  ;;  %1635 = vmatmul.mubr.bf16.gmra.mrb[72].mxu0 %v7124_v36 }
 0x1c3   :  { %1786 = vmatprep.mubr.bf16.mxu1 %v7077_v38  ;;  %1884 = vmatpush1.bf16.msra.mxu1 %v934_v42  ;;  %7380 = vtanh.f32 %v6379_v43  ;;  %v787_v44 = vpop.f32.mrb[49].mxu0  ;;  %v7091_v38 = vld [vmem:[#allocation5 + $0x320] ss:$16 sps:$4 sm:$0xff]  }
 0x1c4   :  { %1885 = vmatprep.subr.bf16.mxu1 %v9661_v35  ;;  %7382 = vtanh.f32 %v787_v44  ;;  %v6380_v45 = vpop.f32.mrb[50].mxu0  ;;  %1642 = vmatprep.mubr.bf16.mxu0 %v7128_v41  ;;  %v7092_v41 = vld [vmem:[#allocation5 + $0x344] ss:$16 sps:$4 sm:$0xff]  }
 0x1c5   :  { %v7373_v46 = vpop.eup %7372  ;;  %7384 = vtanh.f32 %v6380_v45  ;;  %v790_v47 = vpop.f32.mrb[51].mxu0  ;;  %v7158_v44 = vld [vmem:[#allocation5 + $0x104] ss:$16 sps:$4 sm:$0xff]  }
 0x1c6   :  { %v7375_v48 = vpop.eup %7374  ;;  %7386 = vtanh.f32 %v790_v47  ;;  %v7160_v47 = vld [vmem:[#allocation5 + $0x100] ss:$16 sps:$4 sm:$0xff]  }
 0x1c7   :  { %v7377_v51 = vpop.eup %7376  ;;  %1886 = vmatpush1.bf16.msra.mxu1 %v935_v40 }
 0x1c8   :  { %v7379_v53 = vpop.eup %7378  ;;  %1887 = vmatprep.subr.bf16.mxu1 %v9661_v35  ;;  %v937_v54 = vpack.c.bf16 %v7377_v51, %v7373_v46  ;;  %v7094_v46 = vld [vmem:[#allocation5 + $0x340] ss:$16 sps:$4 sm:$0xff]  }
 0x1c9   :  { %v936_v56 = vpack.c.bf16 %v7379_v53, %v7375_v48  ;;  %v7095_v48 = vld [vmem:[#allocation5 + $0x364] ss:$16 sps:$4 sm:$0xff]   ;;  %v7166_v51 = vld [vmem:[#allocation5 + $0x120] ss:$16 sps:$4 sm:$0xff]  }
 0x1ca   :  { %1787 = vmatmul.mubr.bf16.gmra.mrb[12].mxu1 %v7079_v49  ;;  %v6383_v57 = vpop.f32.mrb[52].mxu0  ;;  %1643 = vmatmul.mubr.bf16.gmra.mrb[76].mxu0 %v7130_v50  ;;  %v7164_v49 = vld [vmem:[#allocation5 + $0x124] ss:$16 sps:$4 sm:$0xff]   ;;  %v7097_v50 = vld [vmem:[#allocation5 + $0x360] ss:$16 sps:$4 sm:$0xff]  }
 0x1cb   :  { %1794 = vmatprep.mubr.bf16.mxu1 %v7080_v52  ;;  %1888 = vmatpush1.bf16.msra.mxu1 %v936_v56  ;;  %7388 = vtanh.f32 %v6383_v57  ;;  %v803_v58 = vpop.f32.mrb[53].mxu0  ;;  %v7098_v52 = vld [vmem:[#allocation5 + $0x384] ss:$16 sps:$4 sm:$0xff]  }
 0x1cc   :  { %1889 = vmatprep.subr.bf16.mxu1 %v9661_v35  ;;  %7390 = vtanh.f32 %v803_v58  ;;  %v6384_v59 = vpop.f32.mrb[54].mxu0  ;;  %1650 = vmatprep.mubr.bf16.mxu0 %v7134_v55  ;;  %v7170_v53 = vld [vmem:[#allocation5 + $0x144] ss:$16 sps:$4 sm:$0xff]   ;;  %v7172_v55 = vld [vmem:[#allocation5 + $0x140] ss:$16 sps:$4 sm:$0xff]  }
 0x1cd   :  { %v7381_v60 = vpop.eup %7380  ;;  %7392 = vtanh.f32 %v6384_v59  ;;  %v806_v61 = vpop.f32.mrb[55].mxu0  ;;  %v7101_v56 = vld [vmem:[#allocation5 + $0x3a4] ss:$16 sps:$4 sm:$0xff]   ;;  %v7103_v58 = vld [vmem:[#allocation5 + $0x3a0] ss:$16 sps:$4 sm:$0xff]  }
 0x1ce   :  { %v7383_v62 = vpop.eup %7382  ;;  %7394 = vtanh.f32 %v806_v61  ;;  %v7176_v57 = vld [vmem:[#allocation5 + $0x164] ss:$16 sps:$4 sm:$0xff]   ;;  %v7178_v59 = vld [vmem:[#allocation5 + $0x160] ss:$16 sps:$4 sm:$0xff]  }
 0x1cf   :  { %v7385_v1 = vpop.eup %7384  ;;  %1890 = vmatpush1.bf16.msra.mxu1 %v937_v54  ;;  %v7100_v54 = vld [vmem:[#allocation5 + $0x380] ss:$16 sps:$4 sm:$0xff]   ;;  %v7182_v61 = vld [vmem:[#allocation5 + $0x184] ss:$16 sps:$4 sm:$0xff]  }
 0x1d0   :  { %v7387_v3 = vpop.eup %7386  ;;  %1891 = vmatprep.subr.bf16.mxu1 %v9661_v35  ;;  %v939_v4 = vpack.c.bf16 %v7385_v1, %v7381_v60  ;;  %v7104_v60 = vld [vmem:[#allocation5 + $0x3c4] ss:$16 sps:$4 sm:$0xff]  }
 0x1d1   :  { %v938_v6 = vpack.c.bf16 %v7387_v3, %v7383_v62  ;;  %v7106_v62 = vld [vmem:[#allocation5 + $0x3c0] ss:$16 sps:$4 sm:$0xff]   ;;  %v7188_v1 = vld [vmem:[#allocation5 + $0x1a4] ss:$16 sps:$4 sm:$0xff]  }
 0x1d2   :  { %1795 = vmatmul.mubr.bf16.gmra.mrb[16].mxu1 %v7082_v63  ;;  %v6387_v7 = vpop.f32.mrb[56].mxu0  ;;  %1651 = vmatmul.mubr.bf16.gmra.mrb[80].mxu0 %v7136_v0  ;;  %v7184_v63 = vld [vmem:[#allocation5 + $0x180] ss:$16 sps:$4 sm:$0xff]   ;;  %v7107_v0 = vld [vmem:[#allocation5 + $0x3e4] ss:$16 sps:$4 sm:$0xff]  }
 0x1d3   :  { %1802 = vmatprep.mubr.bf16.mxu1 %v7083_v2  ;;  %1892 = vmatpush1.bf16.msra.mxu1 %v938_v6  ;;  %7396 = vtanh.f32 %v6387_v7  ;;  %v819_v8 = vpop.f32.mrb[57].mxu0  ;;  %v7109_v2 = vld [vmem:[#allocation5 + $0x3e0] ss:$16 sps:$4 sm:$0xff]   ;;  %v7113_v6 = vld [vmem:[#allocation5 + $0x8] ss:$16 sps:$4 sm:$0xff]  }
 0x1d4   :  { %1893 = vmatprep.subr.bf16.mxu1 %v9661_v35  ;;  %7398 = vtanh.f32 %v819_v8  ;;  %v6388_v9 = vpop.f32.mrb[58].mxu0  ;;  %1658 = vmatprep.mubr.bf16.mxu0 %v7140_v5  ;;  %v7190_v3 = vld [vmem:[#allocation5 + $0x1a0] ss:$16 sps:$4 sm:$0xff]   ;;  %v7194_v5 = vld [vmem:[#allocation5 + $0x1c4] ss:$16 sps:$4 sm:$0xff]  }
 0x1d5   :  { %v7389_v10 = vpop.eup %7388  ;;  %7400 = vtanh.f32 %v6388_v9  ;;  %v822_v11 = vpop.f32.mrb[59].mxu0  ;;  %v7196_v7 = vld [vmem:[#allocation5 + $0x1c0] ss:$16 sps:$4 sm:$0xff]   ;;  %v7119_v8 = vld [vmem:[#allocation5 + $0x2c] ss:$16 sps:$4 sm:$0xff]  }
 0x1d6   :  { %v7391_v12 = vpop.eup %7390  ;;  %7402 = vtanh.f32 %v822_v11  ;;  %v7200_v9 = vld [vmem:[#allocation5 + $0x1e4] ss:$16 sps:$4 sm:$0xff]   ;;  %v7202_v11 = vld [vmem:[#allocation5 + $0x1e0] ss:$16 sps:$4 sm:$0xff]  }
 0x1d7   :  { %v7393_v15 = vpop.eup %7392  ;;  %1894 = vmatpush1.bf16.msra.mxu1 %v939_v4  ;;  %v7115_v4 = vld [vmem:[#allocation5 + $0xc] ss:$16 sps:$4 sm:$0xff]  }
 0x1d8   :  { %v7395_v17 = vpop.eup %7394  ;;  %1895 = vmatprep.subr.bf16.mxu1 %v9661_v35  ;;  %v941_v18 = vpack.c.bf16 %v7393_v15, %v7389_v10  ;;  %v7121_v10 = vld [vmem:[#allocation5 + $0x28] ss:$16 sps:$4 sm:$0xff]   ;;  %v7208_v15 = vld [vmem:[#allocation5 + $0x200] ss:$16 sps:$4 sm:$0xff]  }
 0x1d9   :  { %v940_v20 = vpack.c.bf16 %v7395_v17, %v7391_v12  ;;  %v7125_v12 = vld [vmem:[#allocation5 + $0x4c] ss:$16 sps:$4 sm:$0xff]   ;;  %v7212_v17 = vld [vmem:[#allocation5 + $0x224] ss:$16 sps:$4 sm:$0xff]  }
 0x1da   :  { %1803 = vmatmul.mubr.bf16.gmra.mrb[20].mxu1 %v7085_v13  ;;  %v6391_v21 = vpop.f32.mrb[60].mxu0  ;;  %1659 = vmatmul.mubr.bf16.gmra.mrb[84].mxu0 %v7142_v14  ;;  %v7206_v13 = vld [vmem:[#allocation5 + $0x204] ss:$16 sps:$4 sm:$0xff]   ;;  %v7127_v14 = vld [vmem:[#allocation5 + $0x48] ss:$16 sps:$4 sm:$0xff]  }
 0x1db   :  { %1810 = vmatprep.mubr.bf16.mxu1 %v7086_v16  ;;  %1896 = vmatpush1.bf16.msra.mxu1 %v940_v20  ;;  %7404 = vtanh.f32 %v6391_v21  ;;  %v835_v22 = vpop.f32.mrb[61].mxu0  ;;  %v7131_v16 = vld [vmem:[#allocation5 + $0x6c] ss:$16 sps:$4 sm:$0xff]   ;;  %v7214_v20 = vld [vmem:[#allocation5 + $0x220] ss:$16 sps:$4 sm:$0xff]  }
 0x1dc   :  { %1897 = vmatprep.subr.bf16.mxu1 %v9661_v35  ;;  %7406 = vtanh.f32 %v835_v22  ;;  %v6392_v23 = vpop.f32.mrb[62].mxu0  ;;  %1666 = vmatprep.mubr.bf16.mxu0 %v7146_v19  ;;  %v7133_v19 = vld [vmem:[#allocation5 + $0x68] ss:$16 sps:$4 sm:$0xff]   ;;  %v7137_v21 = vld [vmem:[#allocation5 + $0x8c] ss:$16 sps:$4 sm:$0xff]  }
 0x1dd   :  { %v7397_v24 = vpop.eup %7396  ;;  %7408 = vtanh.f32 %v6392_v23  ;;  %v838_v25 = vpop.f32.mrb[63].mxu0  ;;  %v7139_v22 = vld [vmem:[#allocation5 + $0x88] ss:$16 sps:$4 sm:$0xff]   ;;  %v7143_v23 = vld [vmem:[#allocation5 + $0xac] ss:$16 sps:$4 sm:$0xff]  }
 0x1de   :  { %v7399_v26 = vpop.eup %7398  ;;  %7410 = vtanh.f32 %v838_v25  ;;  %v7145_v25 = vld [vmem:[#allocation5 + $0xa8] ss:$16 sps:$4 sm:$0xff]  }
 0x1df   :  { %v7401_v29 = vpop.eup %7400  ;;  %1898 = vmatpush1.bf16.msra.mxu1 %v941_v18  ;;  %v7221_v18 = vld [vmem:[#allocation8] sm:$0xff]  }
 0x1e0   :  { %v7403_v31 = vpop.eup %7402  ;;  %1899 = vmatprep.subr.bf16.mxu1 %v9661_v35  ;;  %v943_v32 = vpack.c.bf16 %v7401_v29, %v7397_v24  ;;  %6393 = vmatprep.subr.bf16.mxu0 %v7221_v18  ;;  %v7228_v24 = vld [vmem:[#allocation8 + $0x8] sm:$0xff]   ;;  %v7235_v29 = vld [vmem:[#allocation8 + $0x10] sm:$0xff]  }
 0x1e1   :  { %v942_v34 = vpack.c.bf16 %v7403_v31, %v7399_v26  ;;  %6394 = vmatpush3.bf16.msra.mxu0 %v7221_v18  ;;  %v7149_v26 = vld [vmem:[#allocation5 + $0xcc] ss:$16 sps:$4 sm:$0xff]  }
 0x1e2   :  { %1811 = vmatmul.mubr.bf16.gmra.mrb[24].mxu1 %v7088_v27  ;;  %1667 = vmatmul.mubr.bf16.gmra.mrb[88].mxu0 %v7148_v28  ;;  %v7151_v27 = vld [vmem:[#allocation5 + $0xc8] ss:$16 sps:$4 sm:$0xff]   ;;  %v7155_v28 = vld [vmem:[#allocation5 + $0xec] ss:$16 sps:$4 sm:$0xff]  }
 0x1e3   :  { %1818 = vmatprep.mubr.bf16.mxu1 %v7089_v30  ;;  %1900 = vmatpush1.bf16.msra.mxu1 %v942_v34  ;;  %v7157_v30 = vld [vmem:[#allocation5 + $0xe8] ss:$16 sps:$4 sm:$0xff]   ;;  %v7161_v31 = vld [vmem:[#allocation5 + $0x10c] ss:$16 sps:$4 sm:$0xff]  }
 0x1e4   :  { %1901 = vmatprep.subr.bf16.mxu1 %v9661_v35  ;;  %1674 = vmatprep.mubr.bf16.mxu0 %v7152_v33  ;;  %v7167_v33 = vld [vmem:[#allocation5 + $0x12c] ss:$16 sps:$4 sm:$0xff]   ;;  %v7169_v34 = vld [vmem:[#allocation5 + $0x128] ss:$16 sps:$4 sm:$0xff]  }
 0x1e5   :  { %v7405_v36 = vpop.eup %7404  ;;  %6395 = vmatprep.subr.bf16.mxu0 %v7228_v24 }
 0x1e6   :  { %v7407_v37 = vpop.eup %7406  ;;  %6396 = vmatpush3.bf16.msra.mxu0 %v7228_v24 }
 0x1e7   :  { %v7409_v40 = vpop.eup %7408  ;;  %1902 = vmatpush1.bf16.msra.mxu1 %v943_v32  ;;  %6397 = vmatprep.subr.bf16.mxu0 %v7235_v29  ;;  %v7163_v32 = vld [vmem:[#allocation5 + $0x108] ss:$16 sps:$4 sm:$0xff]  }
 0x1e8   :  { %v7411_v42 = vpop.eup %7410  ;;  %1903 = vmatprep.subr.bf16.mxu1 %v9661_v35  ;;  %v945_v43 = vpack.c.bf16 %v7409_v40, %v7405_v36  ;;  %v7173_v36 = vld [vmem:[#allocation5 + $0x14c] ss:$16 sps:$4 sm:$0xff]   ;;  %v7249_v40 = vld [vmem:[#allocation8 + $0x20] sm:$0xff]  }
 0x1e9   :  { %v944_v45 = vpack.c.bf16 %v7411_v42, %v7407_v37  ;;  %v7245_v37 = vld [vmem:[#allocation8 + $0x18] sm:$0xff]   ;;  %v7250_v42 = vld [vmem:[#allocation8 + $0x28] sm:$0xff]  }
 0x1ea   :  { %1819 = vmatmul.mubr.bf16.gmra.mrb[28].mxu1 %v7091_v38  ;;  %1675 = vmatmul.mubr.bf16.gmra.mrb[92].mxu0 %v7154_v39  ;;  %v7175_v38 = vld [vmem:[#allocation5 + $0x148] ss:$16 sps:$4 sm:$0xff]   ;;  %v7179_v39 = vld [vmem:[#allocation5 + $0x16c] ss:$16 sps:$4 sm:$0xff]  }
 0x1eb   :  { %1826 = vmatprep.mubr.bf16.mxu1 %v7092_v41  ;;  %1904 = vmatpush1.bf16.msra.mxu1 %v944_v45  ;;  %v7181_v41 = vld [vmem:[#allocation5 + $0x168] ss:$16 sps:$4 sm:$0xff]  }
 0x1ec   :  { %1905 = vmatprep.subr.bf16.mxu1 %v9661_v35  ;;  %1682 = vmatprep.mubr.bf16.mxu0 %v7158_v44  ;;  %v7254_v44 = vld [vmem:[#allocation8 + $0x30] sm:$0xff]   ;;  %v7187_v45 = vld [vmem:[#allocation5 + $0x188] ss:$16 sps:$4 sm:$0xff]  }
 0x1ed   :  { %6398 = vmatpush3.bf16.msra.mxu0 %v7235_v29  ;;  %v7229_v29 = vld [vmem:[#allocation5 + $0x2ac] ss:$16 sps:$4 sm:$0xff]  }
 0x1ee   :  { %6399 = vmatprep.subr.bf16.mxu0 %v7245_v37 }
 0x1ef   :  { %1906 = vmatpush1.bf16.msra.mxu1 %v945_v43  ;;  %v7185_v43 = vld [vmem:[#allocation5 + $0x18c] ss:$16 sps:$4 sm:$0xff]  }
 0x1f1   :  { %6400 = vmatpush3.bf16.msra.mxu0 %v7245_v37 }
 0x1f2   :  { %1827 = vmatmul.mubr.bf16.gmra.mrb[32].mxu1 %v7094_v46  ;;  %1683 = vmatmul.mubr.bf16.gmra.mrb[96].mxu0 %v7160_v47  ;;  %v7255_v46 = vld [vmem:[#allocation8 + $0x38] sm:$0xff]  }
 0x1f3   :  { %1834 = vmatprep.mubr.bf16.mxu1 %v7095_v48  ;;  %1690 = vmatprep.mubr.bf16.mxu0 %v7164_v49  ;;  %v7191_v47 = vld [vmem:[#allocation5 + $0x1ac] ss:$16 sps:$4 sm:$0xff]   ;;  %v7193_v49 = vld [vmem:[#allocation5 + $0x1a8] ss:$16 sps:$4 sm:$0xff]  }
 0x1f4   :  { %6401 = vmatprep.subr.bf16.mxu0 %v7249_v40 }
 0x1f5   :  { %6402 = vmatpush3.bf16.msra.mxu0 %v7249_v40  ;;  %v7234_v40 = vld [vmem:[#allocation5 + $0x2c8] ss:$16 sps:$4 sm:$0xff]  }
 0x1f6   :  { %6403 = vmatprep.subr.bf16.mxu0 %v7250_v42 }
 0x1f9   :  { %6404 = vmatpush3.bf16.msra.mxu0 %v7250_v42  ;;  %v7236_v42 = vld [vmem:[#allocation5 + $0x2ec] ss:$16 sps:$4 sm:$0xff]  }
 0x1fa   :  { %1835 = vmatmul.mubr.bf16.gmra.mrb[36].mxu1 %v7097_v50  ;;  %1691 = vmatmul.mubr.bf16.gmra.mrb[100].mxu0 %v7166_v51  ;;  %v7197_v51 = vld [vmem:[#allocation5 + $0x1cc] ss:$16 sps:$4 sm:$0xff]  }
 0x1fb   :  { %1842 = vmatprep.mubr.bf16.mxu1 %v7098_v52  ;;  %1698 = vmatprep.mubr.bf16.mxu0 %v7170_v53 }
 0x1fc   :  { %6405 = vmatprep.subr.bf16.mxu0 %v7254_v44 }
 0x1fd   :  { %6406 = vmatpush3.bf16.msra.mxu0 %v7254_v44 }
 0x1fe   :  { %6407 = vmatprep.subr.bf16.mxu0 %v7255_v46 }
 0x201   :  { %6408 = vmatpush3.bf16.msra.mxu0 %v7255_v46  ;;  %v7238_v46 = vld [vmem:[#allocation5 + $0x2e8] ss:$16 sps:$4 sm:$0xff]  }
 0x202   :  { %1843 = vmatmul.mubr.bf16.gmra.mrb[40].mxu1 %v7100_v54  ;;  %1699 = vmatmul.mubr.bf16.gmra.mrb[104].mxu0 %v7172_v55  ;;  %v7199_v55 = vld [vmem:[#allocation5 + $0x1c8] ss:$16 sps:$4 sm:$0xff]  }
 0x203   :  { %1850 = vmatprep.mubr.bf16.mxu1 %v7101_v56  ;;  %1706 = vmatprep.mubr.bf16.mxu0 %v7176_v57  ;;  %v7203_v57 = vld [vmem:[#allocation5 + $0x1ec] ss:$16 sps:$4 sm:$0xff]  }
 0x204   :  { %2645 = vmatprep.subr.bf16.mxu0 %v9661_v35 }
 0x20a   :  { %1851 = vmatmul.mubr.bf16.gmra.mrb[44].mxu1 %v7103_v58  ;;  %1707 = vmatmul.mubr.bf16.gmra.mrb[108].mxu0 %v7178_v59 }
 0x20b   :  { %1858 = vmatprep.mubr.bf16.mxu1 %v7104_v60  ;;  %1714 = vmatprep.mubr.bf16.mxu0 %v7182_v61  ;;  %v7205_v61 = vld [vmem:[#allocation5 + $0x1e8] ss:$16 sps:$4 sm:$0xff]  }
 0x212   :  { %1859 = vmatmul.mubr.bf16.gmra.mrb[48].mxu1 %v7106_v62  ;;  %1715 = vmatmul.mubr.bf16.gmra.mrb[112].mxu0 %v7184_v63  ;;  %v7209_v63 = vld [vmem:[#allocation5 + $0x20c] ss:$16 sps:$4 sm:$0xff]  }
 0x213   :  { %1866 = vmatprep.mubr.bf16.mxu1 %v7107_v0  ;;  %1722 = vmatprep.mubr.bf16.mxu0 %v7188_v1 }
 0x21a   :  { %1867 = vmatmul.mubr.bf16.gmra.mrb[52].mxu1 %v7109_v2  ;;  %1723 = vmatmul.mubr.bf16.gmra.mrb[116].mxu0 %v7190_v3  ;;  %v7211_v3 = vld [vmem:[#allocation5 + $0x208] ss:$16 sps:$4 sm:$0xff]  }
 0x21b   :  { %1907 = vmatprep.mubr.bf16.mxu1 %v7115_v4  ;;  %1730 = vmatprep.mubr.bf16.mxu0 %v7194_v5  ;;  %v7215_v5 = vld [vmem:[#allocation5 + $0x22c] ss:$16 sps:$4 sm:$0xff]  }
 0x222   :  { %1908 = vmatmul.mubr.bf16.vlgmr.msra.gmra.mrb[56].mxu1 %v7113_v6  ;;  %1731 = vmatmul.mubr.bf16.gmra.mrb[120].mxu0 %v7196_v7 }
 0x223   :  { %1915 = vmatprep.mubr.bf16.mxu1 %v7119_v8  ;;  %1738 = vmatprep.mubr.bf16.mxu0 %v7200_v9  ;;  %v7217_v9 = vld [vmem:[#allocation5 + $0x228] ss:$16 sps:$4 sm:$0xff]  }
 0x22a   :  { %1916 = vmatmul.mubr.bf16.gmra.mrb[60].mxu1 %v7121_v10  ;;  %1739 = vmatmul.mubr.bf16.gmra.mrb[124].mxu0 %v7202_v11  ;;  %v7218_v11 = vld [vmem:[#allocation5 + $0x24c] ss:$16 sps:$4 sm:$0xff]  }
 0x22b   :  { %1923 = vmatprep.mubr.bf16.mxu1 %v7125_v12  ;;  %1746 = vmatprep.mubr.bf16.mxu0 %v7206_v13 }
 0x232   :  { %1924 = vmatmul.mubr.bf16.gmra.mrb[64].mxu1 %v7127_v14  ;;  %1747 = vmatmul.mubr.bf16.gmra.mrb[128].mxu0 %v7208_v15  ;;  %v7220_v15 = vld [vmem:[#allocation5 + $0x248] ss:$16 sps:$4 sm:$0xff]  }
 0x233   :  { %1931 = vmatprep.mubr.bf16.mxu1 %v7131_v16  ;;  %1754 = vmatprep.mubr.bf16.mxu0 %v7212_v17  ;;  %v7222_v17 = vld [vmem:[#allocation5 + $0x26c] ss:$16 sps:$4 sm:$0xff]  }
 0x23a   :  { %1932 = vmatmul.mubr.bf16.gmra.mrb[68].mxu1 %v7133_v19  ;;  %1755 = vmatmul.mubr.bf16.gmra.mrb[132].mxu0 %v7214_v20 }
 0x23b   :  { %1939 = vmatprep.mubr.bf16.mxu1 %v7137_v21  ;;  %v7224_v21 = vld [vmem:[#allocation5 + $0x268] ss:$16 sps:$4 sm:$0xff]  }
 0x242   :  { %1940 = vmatmul.mubr.bf16.gmra.mrb[72].mxu1 %v7139_v22 }
 0x243   :  { %1947 = vmatprep.mubr.bf16.mxu1 %v7143_v23  ;;  %v7225_v23 = vld [vmem:[#allocation5 + $0x28c] ss:$16 sps:$4 sm:$0xff]  }
 0x24a   :  { %1948 = vmatmul.mubr.bf16.gmra.mrb[76].mxu1 %v7145_v25 }
 0x24b   :  { %1955 = vmatprep.mubr.bf16.mxu1 %v7149_v26 }
 0x252   :  { %1956 = vmatmul.mubr.bf16.gmra.mrb[80].mxu1 %v7151_v27  ;;  %v7227_v27 = vld [vmem:[#allocation5 + $0x288] ss:$16 sps:$4 sm:$0xff]  }
 0x253   :  { %1963 = vmatprep.mubr.bf16.mxu1 %v7155_v28 }
 0x25a   :  { %1964 = vmatmul.mubr.bf16.gmra.mrb[84].mxu1 %v7157_v30 }
 0x25b   :  { %1971 = vmatprep.mubr.bf16.mxu1 %v7161_v31 }
 0x262   :  { %1972 = vmatmul.mubr.bf16.gmra.mrb[88].mxu1 %v7163_v32 }
 0x263   :  { %1979 = vmatprep.mubr.bf16.mxu1 %v7167_v33  ;;  %v7231_v33 = vld [vmem:[#allocation5 + $0x2a8] ss:$16 sps:$4 sm:$0xff]  }
 0x26a   :  { %1980 = vmatmul.mubr.bf16.gmra.mrb[92].mxu1 %v7169_v34 }
 0x26b   :  { %1987 = vmatprep.mubr.bf16.mxu1 %v7173_v36  ;;  %v7232_v36 = vld [vmem:[#allocation5 + $0x2cc] ss:$16 sps:$4 sm:$0xff]  }
 0x272   :  { %1988 = vmatmul.mubr.bf16.gmra.mrb[96].mxu1 %v7175_v38 }
 0x273   :  { %1995 = vmatprep.mubr.bf16.mxu1 %v7179_v39 }
 0x27a   :  { %1996 = vmatmul.mubr.bf16.gmra.mrb[100].mxu1 %v7181_v41 }
 0x27b   :  { %2003 = vmatprep.mubr.bf16.mxu1 %v7185_v43 }
 0x282   :  { %2004 = vmatmul.mubr.bf16.gmra.mrb[104].mxu1 %v7187_v45 }
 0x283   :  { %2011 = vmatprep.mubr.bf16.mxu1 %v7191_v47 }
 0x285   :  { %v8334_v48 = vpop.f32.mrb[64].mxu0 }
 0x286   :  { %v1622_v50 = vpop.f32.mrb[65].mxu0 }
 0x287   :  { %v8336_v52 = vpop.f32.mrb[66].mxu0 }
 0x288   :  { %v1625_v53 = vpop.f32.mrb[67].mxu0 }
 0x28a   :  { %2012 = vmatmul.mubr.bf16.gmra.mrb[108].mxu1 %v7193_v49  ;;  %v7239_v49 = vld [vmem:[#allocation5 + $0x30c] ss:$16 sps:$4 sm:$0xff]  }
 0x28b   :  { %2019 = vmatprep.mubr.bf16.mxu1 %v7197_v51 }
 0x28d   :  { %v8338_v54 = vpop.f32.mrb[68].mxu0 }
 0x28e   :  { %v1630_v56 = vpop.f32.mrb[69].mxu0 }
 0x28f   :  { %v8340_v58 = vpop.f32.mrb[70].mxu0 }
 0x290   :  { %v1633_v59 = vpop.f32.mrb[71].mxu0 }
 0x292   :  { %2020 = vmatmul.mubr.bf16.gmra.mrb[112].mxu1 %v7199_v55  ;;  %v7241_v55 = vld [vmem:[#allocation5 + $0x308] ss:$16 sps:$4 sm:$0xff]  }
 0x293   :  { %2027 = vmatprep.mubr.bf16.mxu1 %v7203_v57  ;;  %v7242_v57 = vld [vmem:[#allocation5 + $0x32c] ss:$16 sps:$4 sm:$0xff]  }
 0x295   :  { %v8342_v60 = vpop.f32.mrb[72].mxu0 }
 0x296   :  { %v1638_v62 = vpop.f32.mrb[73].mxu0 }
 0x297   :  { %v8344_v0 = vpop.f32.mrb[74].mxu0 }
 0x298   :  { %v1641_v1 = vpop.f32.mrb[75].mxu0 }
 0x29a   :  { %2028 = vmatmul.mubr.bf16.gmra.mrb[116].mxu1 %v7205_v61 }
 0x29b   :  { %2035 = vmatprep.mubr.bf16.mxu1 %v7209_v63  ;;  %v7244_v63 = vld [vmem:[#allocation5 + $0x328] ss:$16 sps:$4 sm:$0xff]  }
 0x29d   :  { %v8346_v2 = vpop.f32.mrb[76].mxu0 }
 0x29e   :  { %v1646_v4 = vpop.f32.mrb[77].mxu0 }
 0x29f   :  { %v8348_v6 = vpop.f32.mrb[78].mxu0 }
 0x2a0   :  { %v1649_v7 = vpop.f32.mrb[79].mxu0 }
 0x2a2   :  { %2036 = vmatmul.mubr.bf16.gmra.mrb[120].mxu1 %v7211_v3  ;;  %v7246_v3 = vld [vmem:[#allocation5 + $0x34c] ss:$16 sps:$4 sm:$0xff]  }
 0x2a3   :  { %2043 = vmatprep.mubr.bf16.mxu1 %v7215_v5 }
 0x2a5   :  { %v8350_v8 = vpop.f32.mrb[80].mxu0 }
 0x2a6   :  { %v1654_v10 = vpop.f32.mrb[81].mxu0 }
 0x2a7   :  { %v8352_v12 = vpop.f32.mrb[82].mxu0 }
 0x2a8   :  { %v1657_v13 = vpop.f32.mrb[83].mxu0 }
 0x2aa   :  { %2044 = vmatmul.mubr.bf16.gmra.mrb[124].mxu1 %v7217_v9  ;;  %v7248_v9 = vld [vmem:[#allocation5 + $0x348] ss:$16 sps:$4 sm:$0xff]  }
 0x2ab   :  { %2051 = vmatprep.mubr.bf16.mxu1 %v7218_v11  ;;  %v7251_v11 = vld [vmem:[#allocation5 + $0x36c] ss:$16 sps:$4 sm:$0xff]  }
 0x2ad   :  { %v8354_v14 = vpop.f32.mrb[84].mxu0 }
 0x2ae   :  { %v1662_v16 = vpop.f32.mrb[85].mxu0 }
 0x2af   :  { %v8356_v18 = vpop.f32.mrb[86].mxu0 }
 0x2b0   :  { %v1665_v19 = vpop.f32.mrb[87].mxu0 }
 0x2b2   :  { %2052 = vmatmul.mubr.bf16.gmra.mrb[0].mxu1 %v7220_v15 }
 0x2b3   :  { %2059 = vmatprep.mubr.bf16.mxu1 %v7222_v17 }
 0x2b5   :  { %v8358_v20 = vpop.f32.mrb[88].mxu0 }
 0x2b6   :  { %v1670_v22 = vpop.f32.mrb[89].mxu0 }
 0x2b7   :  { %v8360_v24 = vpop.f32.mrb[90].mxu0  ;;  %v7253_v22 = vld [vmem:[#allocation5 + $0x368] ss:$16 sps:$4 sm:$0xff]  }
 0x2b8   :  { %v1673_v25 = vpop.f32.mrb[91].mxu0 }
 0x2ba   :  { %2060 = vmatmul.mubr.bf16.gmra.mrb[4].mxu1 %v7224_v21 }
 0x2bb   :  { %2067 = vmatprep.mubr.bf16.mxu1 %v7225_v23 }
 0x2bd   :  { %v8362_v26 = vpop.f32.mrb[92].mxu0 }
 0x2be   :  { %v1678_v28 = vpop.f32.mrb[93].mxu0 }
 0x2bf   :  { %v8364_v30 = vpop.f32.mrb[94].mxu0 }
 0x2c0   :  { %v1681_v31 = vpop.f32.mrb[95].mxu0 }
 0x2c2   :  { %2068 = vmatmul.mubr.bf16.gmra.mrb[8].mxu1 %v7227_v27  ;;  %v7256_v27 = vld [vmem:[#allocation5 + $0x38c] ss:$16 sps:$4 sm:$0xff]  }
 0x2c3   :  { %2075 = vmatprep.mubr.bf16.mxu1 %v7229_v29 }
 0x2c5   :  { %v8366_v32 = vpop.f32.mrb[96].mxu0 }
 0x2c6   :  { %v1686_v34 = vpop.f32.mrb[97].mxu0 }
 0x2c7   :  { %v8368_v37 = vpop.f32.mrb[98].mxu0 }
 0x2c8   :  { %v1689_v38 = vpop.f32.mrb[99].mxu0 }
 0x2ca   :  { %2076 = vmatmul.mubr.bf16.gmra.mrb[12].mxu1 %v7231_v33 }
 0x2cb   :  { %2083 = vmatprep.mubr.bf16.mxu1 %v7232_v36 }
 0x2cd   :  { %v8370_v39 = vpop.f32.mrb[100].mxu0 }
 0x2ce   :  { %v1694_v41 = vpop.f32.mrb[101].mxu0 }
 0x2cf   :  { %v8372_v43 = vpop.f32.mrb[102].mxu0  ;;  %v7258_v41 = vld [vmem:[#allocation5 + $0x388] ss:$16 sps:$4 sm:$0xff]  }
 0x2d0   :  { %v1697_v44 = vpop.f32.mrb[103].mxu0 }
 0x2d2   :  { %2084 = vmatmul.mubr.bf16.gmra.mrb[16].mxu1 %v7234_v40 }
 0x2d3   :  { %2091 = vmatprep.mubr.bf16.mxu1 %v7236_v42 }
 0x2d5   :  { %v8374_v45 = vpop.f32.mrb[104].mxu0 }
 0x2d6   :  { %v1702_v47 = vpop.f32.mrb[105].mxu0 }
 0x2d7   :  { %v8376_v50 = vpop.f32.mrb[106].mxu0 }
 0x2d8   :  { %v1705_v51 = vpop.f32.mrb[107].mxu0 }
 0x2da   :  { %2092 = vmatmul.mubr.bf16.gmra.mrb[20].mxu1 %v7238_v46  ;;  %v7259_v46 = vld [vmem:[#allocation5 + $0x3ac] ss:$16 sps:$4 sm:$0xff]  }
 0x2db   :  { %2099 = vmatprep.mubr.bf16.mxu1 %v7239_v49 }
 0x2dd   :  { %v8378_v53 = vpop.f32.mrb[108].mxu0 }
 0x2de   :  { %v1710_v56 = vpop.f32.mrb[109].mxu0 }
 0x2df   :  { %v8380_v59 = vpop.f32.mrb[110].mxu0 }
 0x2e0   :  { %v1713_v61 = vpop.f32.mrb[111].mxu0 }
 0x2e2   :  { %2100 = vmatmul.mubr.bf16.gmra.mrb[24].mxu1 %v7241_v55 }
 0x2e3   :  { %2107 = vmatprep.mubr.bf16.mxu1 %v7242_v57 }
 0x2e5   :  { %v8382_v62 = vpop.f32.mrb[112].mxu0 }
 0x2e6   :  { %v1718_v1 = vpop.f32.mrb[113].mxu0 }
 0x2e7   :  { %v8384_v4 = vpop.f32.mrb[114].mxu0 }
 0x2e8   :  { %v1721_v5 = vpop.f32.mrb[115].mxu0 }
 0x2e9   :  { %v7262_v5 = vld [vmem:[#allocation5 + $0x3cc] ss:$16 sps:$4 sm:$0xff]  }
 0x2ea   :  { %2108 = vmatmul.mubr.bf16.gmra.mrb[28].mxu1 %v7244_v63  ;;  %v7261_v63 = vld [vmem:[#allocation5 + $0x3a8] ss:$16 sps:$4 sm:$0xff]  }
 0x2eb   :  { %2115 = vmatprep.mubr.bf16.mxu1 %v7246_v3 }
 0x2ed   :  { %v8386_v7 = vpop.f32.mrb[116].mxu0 }
 0x2ee   :  { %v1726_v10 = vpop.f32.mrb[117].mxu0 }
 0x2ef   :  { %v8388_v13 = vpop.f32.mrb[118].mxu0 }
 0x2f0   :  { %v1729_v15 = vpop.f32.mrb[119].mxu0 }
 0x2f2   :  { %2116 = vmatmul.mubr.bf16.gmra.mrb[32].mxu1 %v7248_v9 }
 0x2f3   :  { %2123 = vmatprep.mubr.bf16.mxu1 %v7251_v11 }
 0x2f5   :  { %v1909_v16 = vpop.f32.mrb[56].mxu1  ;;  %v8390_v17 = vpop.f32.mrb[120].mxu0 }
 0x2f6   :  { %v1910_v19 = vadd.f32 %v1909_v16, %v8334_v48  ;;  %v1911_v21 = vpop.f32.mrb[57].mxu1  ;;  %v1734_v23 = vpop.f32.mrb[121].mxu0 }
 0x2f7   :  { %v1912_v25 = vpop.f32.mrb[58].mxu1  ;;  %v8393_v28 = vpop.f32.mrb[122].mxu0 }
 0x2f8   :  { %v1913_v29 = vadd.f32 %v1912_v25, %v8336_v52  ;;  %v1914_v31 = vpop.f32.mrb[59].mxu1  ;;  %v1737_v33 = vpop.f32.mrb[123].mxu0 }
 0x2fa   :  { %2124 = vmatmul.mubr.bf16.gmra.mrb[36].mxu1 %v7253_v22  ;;  %v2164_v34 = vpack.c.bf16 %v1913_v29, %v1910_v19  ;;  %v7264_v22 = vld [vmem:[#allocation5 + $0x3c8] ss:$16 sps:$4 sm:$0xff]  }
 0x2fb   :  { %2131 = vmatprep.mubr.bf16.mxu1 %v7256_v27  ;;  %v7265_v27 = vld [vmem:[#allocation5 + $0x3ec] ss:$16 sps:$4 sm:$0xff]  }
 0x2fc   :  { %6409 = vmatprep.mubr.bf16.mxu0 %v2164_v34 }
 0x2fd   :  { %v1917_v36 = vpop.f32.mrb[60].mxu1  ;;  %v8396_v38 = vpop.f32.mrb[124].mxu0 }
 0x2fe   :  { %v1918_v48 = vadd.f32 %v1917_v36, %v8338_v54  ;;  %v1919_v40 = vpop.f32.mrb[61].mxu1  ;;  %v1742_v42 = vpop.f32.mrb[125].mxu0 }
 0x2ff   :  { %v1920_v44 = vpop.f32.mrb[62].mxu1  ;;  %v8399_v47 = vpop.f32.mrb[126].mxu0 }
 0x300   :  { %v1921_v52 = vadd.f32 %v1920_v44, %v8340_v58  ;;  %v1922_v49 = vpop.f32.mrb[63].mxu1  ;;  %v1745_v51 = vpop.f32.mrb[127].mxu0 }
 0x302   :  { %v2165_v55 = vpack.c.bf16 %v1921_v52, %v1918_v48  ;;  %2132 = vmatmul.mubr.bf16.gmra.mrb[40].mxu1 %v7258_v41 }
 0x303   :  { %2139 = vmatprep.mubr.bf16.mxu1 %v7259_v46 }
 0x304   :  { %6410 = vmatmul.mubr.bf16.vlgmr.msra.gmra.mrb[136].mxu0 %v2165_v55 }
 0x305   :  { %v1925_v56 = vpop.f32.mrb[64].mxu1  ;;  %v8402_v57 = vpop.f32.mrb[128].mxu0 }
 0x306   :  { %v1926_v54 = vadd.f32 %v1925_v56, %v8342_v60  ;;  %v1927_v61 = vpop.f32.mrb[65].mxu1  ;;  %v1750_v1 = vpop.f32.mrb[129].mxu0 }
 0x307   :  { %v1928_v3 = vpop.f32.mrb[66].mxu1  ;;  %v8405_v9 = vpop.f32.mrb[130].mxu0 }
 0x308   :  { %v1929_v58 = vadd.f32 %v1928_v3, %v8344_v0  ;;  %v1930_v10 = vpop.f32.mrb[67].mxu1  ;;  %v1753_v11 = vpop.f32.mrb[131].mxu0 }
 0x30a   :  { %2140 = vmatmul.mubr.bf16.gmra.mrb[44].mxu1 %v7261_v63  ;;  %v2166_v15 = vpack.c.bf16 %v1929_v58, %v1926_v54 }
 0x30b   :  { %2147 = vmatprep.mubr.bf16.mxu1 %v7262_v5 }
 0x30c   :  { %6413 = vmatprep.mubr.bf16.mxu0 %v2166_v15 }
 0x30d   :  { %v1933_v16 = vpop.f32.mrb[68].mxu1  ;;  %v8408_v19 = vpop.f32.mrb[132].mxu0 }
 0x30e   :  { %v1934_v60 = vadd.f32 %v1933_v16, %v8346_v2  ;;  %v1935_v21 = vpop.f32.mrb[69].mxu1  ;;  %v1758_v23 = vpop.f32.mrb[133].mxu0  ;;  %v7267_v2 = vld [vmem:[#allocation5 + $0x3e8] ss:$16 sps:$4 sm:$0xff]  }
 0x30f   :  { %v1936_v25 = vpop.f32.mrb[70].mxu1  ;;  %v8411_v29 = vpop.f32.mrb[134].mxu0 }
 0x310   :  { %v1937_v0 = vadd.f32 %v1936_v25, %v8348_v6  ;;  %v1938_v31 = vpop.f32.mrb[71].mxu1  ;;  %v1761_v33 = vpop.f32.mrb[135].mxu0 }
 0x312   :  { %2148 = vmatmul.mubr.bf16.gmra.mrb[48].mxu1 %v7264_v22  ;;  %v2167_v34 = vpack.c.bf16 %v1937_v0, %v1934_v60 }
 0x313   :  { %2155 = vmatprep.mubr.bf16.mxu1 %v7265_v27 }
 0x314   :  { %6414 = vmatmul.mubr.bf16.gmra.mrb[140].mxu0 %v2167_v34 }
 0x315   :  { %v1941_v36 = vpop.f32.mrb[72].mxu1 }
 0x316   :  { %v1942_v48 = vadd.f32 %v1941_v36, %v8350_v8  ;;  %v1943_v40 = vpop.f32.mrb[73].mxu1 }
 0x317   :  { %v1944_v41 = vpop.f32.mrb[74].mxu1 }
 0x318   :  { %v1945_v42 = vadd.f32 %v1944_v41, %v8352_v12  ;;  %v1946_v44 = vpop.f32.mrb[75].mxu1 }
 0x31a   :  { %2156 = vmatmul.mubr.bf16.gmra.mrb[52].mxu1 %v7267_v2  ;;  %v2168_v46 = vpack.c.bf16 %v1945_v42, %v1942_v48 }
 0x31c   :  { %6417 = vmatprep.mubr.bf16.mxu0 %v2168_v46 }
 0x31d   :  { %v1949_v52 = vpop.f32.mrb[76].mxu1 }
 0x31e   :  { %v1950_v6 = vadd.f32 %v1949_v52, %v8354_v14  ;;  %v1951_v49 = vpop.f32.mrb[77].mxu1 }
 0x31f   :  { %v1952_v51 = vpop.f32.mrb[78].mxu1 }
 0x320   :  { %v1953_v55 = vadd.f32 %v1952_v51, %v8356_v18  ;;  %v1954_v56 = vpop.f32.mrb[79].mxu1 }
 0x322   :  { %v2169_v54 = vpack.c.bf16 %v1953_v55, %v1950_v6 }
 0x324   :  { %6418 = vmatmul.mubr.bf16.gmra.mrb[144].mxu0 %v2169_v54 }
 0x325   :  { %v1957_v8 = vpop.f32.mrb[80].mxu1 }
 0x326   :  { %v1958_v61 = vadd.f32 %v1957_v8, %v8358_v20  ;;  %v1959_v63 = vpop.f32.mrb[81].mxu1 }
 0x327   :  { %v1960_v1 = vpop.f32.mrb[82].mxu1 }
 0x328   :  { %v1961_v12 = vadd.f32 %v1960_v1, %v8360_v24  ;;  %v1962_v3 = vpop.f32.mrb[83].mxu1 }
 0x32a   :  { %v2170_v5 = vpack.c.bf16 %v1961_v12, %v1958_v61 }
 0x32c   :  { %6421 = vmatprep.mubr.bf16.mxu0 %v2170_v5 }
 0x32d   :  { %v1965_v58 = vpop.f32.mrb[84].mxu1 }
 0x32e   :  { %v1966_v14 = vadd.f32 %v1965_v58, %v8362_v26  ;;  %v1967_v10 = vpop.f32.mrb[85].mxu1 }
 0x32f   :  { %v1968_v11 = vpop.f32.mrb[86].mxu1 }
 0x330   :  { %v1969_v18 = vadd.f32 %v1968_v11, %v8364_v30  ;;  %v1970_v15 = vpop.f32.mrb[87].mxu1 }
 0x332   :  { %v2171_v16 = vpack.c.bf16 %v1969_v18, %v1966_v14 }
 0x334   :  { %6422 = vmatmul.mubr.bf16.gmra.mrb[148].mxu0 %v2171_v16 }
 0x335   :  { %v1973_v60 = vpop.f32.mrb[88].mxu1 }
 0x336   :  { %v1974_v20 = vadd.f32 %v1973_v60, %v8366_v32  ;;  %v1975_v21 = vpop.f32.mrb[89].mxu1 }
 0x337   :  { %v1976_v22 = vpop.f32.mrb[90].mxu1 }
 0x338   :  { %v1977_v24 = vadd.f32 %v1976_v22, %v8368_v37  ;;  %v1978_v23 = vpop.f32.mrb[91].mxu1 }
 0x33a   :  { %v2172_v25 = vpack.c.bf16 %v1977_v24, %v1974_v20 }
 0x33c   :  { %6425 = vmatprep.mubr.bf16.mxu0 %v2172_v25 }
 0x33d   :  { %v1981_v27 = vpop.f32.mrb[92].mxu1 }
 0x33e   :  { %v1982_v26 = vadd.f32 %v1981_v27, %v8370_v39  ;;  %v1983_v0 = vpop.f32.mrb[93].mxu1 }
 0x33f   :  { %v1984_v31 = vpop.f32.mrb[94].mxu1 }
 0x340   :  { %v1985_v30 = vadd.f32 %v1984_v31, %v8372_v43  ;;  %v1986_v33 = vpop.f32.mrb[95].mxu1 }
 0x342   :  { %v2173_v34 = vpack.c.bf16 %v1985_v30, %v1982_v26 }
 0x344   :  { %6426 = vmatmul.mubr.bf16.gmra.mrb[152].mxu0 %v2173_v34 }
 0x345   :  { %v1989_v36 = vpop.f32.mrb[96].mxu1 }
 0x346   :  { %v1990_v32 = vadd.f32 %v1989_v36, %v8374_v45  ;;  %v1991_v48 = vpop.f32.mrb[97].mxu1 }
 0x347   :  { %v1992_v40 = vpop.f32.mrb[98].mxu1 }
 0x348   :  { %v1993_v37 = vadd.f32 %v1992_v40, %v8376_v50  ;;  %v1994_v2 = vpop.f32.mrb[99].mxu1 }
 0x34a   :  { %v2174_v41 = vpack.c.bf16 %v1993_v37, %v1990_v32 }
 0x34c   :  { %6429 = vmatprep.mubr.bf16.mxu0 %v2174_v41 }
 0x34d   :  { %v1997_v42 = vpop.f32.mrb[100].mxu1 }
 0x34e   :  { %v1998_v39 = vadd.f32 %v1997_v42, %v8378_v53  ;;  %v1999_v44 = vpop.f32.mrb[101].mxu1 }
 0x34f   :  { %v2000_v46 = vpop.f32.mrb[102].mxu1 }
 0x350   :  { %v2001_v43 = vadd.f32 %v2000_v46, %v8380_v59  ;;  %v2002_v52 = vpop.f32.mrb[103].mxu1 }
 0x352   :  { %v2175_v6 = vpack.c.bf16 %v2001_v43, %v1998_v39 }
 0x354   :  { %6430 = vmatmul.mubr.bf16.gmra.mrb[156].mxu0 %v2175_v6 }
 0x355   :  { %v2005_v49 = vpop.f32.mrb[104].mxu1 }
 0x356   :  { %v2006_v45 = vadd.f32 %v2005_v49, %v8382_v62  ;;  %v2007_v51 = vpop.f32.mrb[105].mxu1 }
 0x357   :  { %v2008_v55 = vpop.f32.mrb[106].mxu1 }
 0x358   :  { %v2009_v50 = vadd.f32 %v2008_v55, %v8384_v4  ;;  %v2010_v56 = vpop.f32.mrb[107].mxu1 }
 0x35a   :  { %v2176_v54 = vpack.c.bf16 %v2009_v50, %v2006_v45 }
 0x35c   :  { %6433 = vmatprep.mubr.bf16.mxu0 %v2176_v54 }
 0x35d   :  { %v2013_v8 = vpop.f32.mrb[108].mxu1 }
 0x35e   :  { %v2014_v53 = vadd.f32 %v2013_v8, %v8386_v7  ;;  %v2015_v61 = vpop.f32.mrb[109].mxu1 }
 0x35f   :  { %v2016_v63 = vpop.f32.mrb[110].mxu1 }
 0x360   :  { %v2017_v59 = vadd.f32 %v2016_v63, %v8388_v13  ;;  %v2018_v1 = vpop.f32.mrb[111].mxu1 }
 0x362   :  { %v2177_v12 = vpack.c.bf16 %v2017_v59, %v2014_v53 }
 0x364   :  { %6434 = vmatmul.mubr.bf16.gmra.mrb[160].mxu0 %v2177_v12 }
 0x365   :  { %v2021_v3 = vpop.f32.mrb[112].mxu1 }
 0x366   :  { %v2022_v62 = vadd.f32 %v2021_v3, %v8390_v17  ;;  %v2023_v5 = vpop.f32.mrb[113].mxu1 }
 0x367   :  { %v2024_v58 = vpop.f32.mrb[114].mxu1 }
 0x368   :  { %v2025_v4 = vadd.f32 %v2024_v58, %v8393_v28  ;;  %v2026_v14 = vpop.f32.mrb[115].mxu1 }
 0x36a   :  { %v2178_v10 = vpack.c.bf16 %v2025_v4, %v2022_v62 }
 0x36c   :  { %6437 = vmatprep.mubr.bf16.mxu0 %v2178_v10 }
 0x36d   :  { %v2029_v11 = vpop.f32.mrb[116].mxu1 }
 0x36e   :  { %v2030_v7 = vadd.f32 %v2029_v11, %v8396_v38  ;;  %v2031_v18 = vpop.f32.mrb[117].mxu1 }
 0x36f   :  { %v2032_v15 = vpop.f32.mrb[118].mxu1 }
 0x370   :  { %v2033_v13 = vadd.f32 %v2032_v15, %v8399_v47  ;;  %v2034_v16 = vpop.f32.mrb[119].mxu1 }
 0x372   :  { %v2179_v60 = vpack.c.bf16 %v2033_v13, %v2030_v7 }
 0x374   :  { %6438 = vmatmul.mubr.bf16.gmra.mrb[164].mxu0 %v2179_v60 }
 0x375   :  { %v2037_v20 = vpop.f32.mrb[120].mxu1 }
 0x376   :  { %v2038_v17 = vadd.f32 %v2037_v20, %v8402_v57  ;;  %v2039_v21 = vpop.f32.mrb[121].mxu1 }
 0x377   :  { %v2040_v22 = vpop.f32.mrb[122].mxu1 }
 0x378   :  { %v2041_v28 = vadd.f32 %v2040_v22, %v8405_v9  ;;  %v2042_v24 = vpop.f32.mrb[123].mxu1 }
 0x37a   :  { %v2180_v23 = vpack.c.bf16 %v2041_v28, %v2038_v17 }
 0x37c   :  { %6441 = vmatprep.mubr.bf16.mxu0 %v2180_v23 }
 0x37d   :  { %v2045_v25 = vpop.f32.mrb[124].mxu1 }
 0x37e   :  { %v2046_v38 = vadd.f32 %v2045_v25, %v8408_v19  ;;  %v2047_v27 = vpop.f32.mrb[125].mxu1 }
 0x37f   :  { %v2048_v26 = vpop.f32.mrb[126].mxu1 }
 0x380   :  { %v2049_v47 = vadd.f32 %v2048_v26, %v8411_v29  ;;  %v2050_v0 = vpop.f32.mrb[127].mxu1 }
 0x382   :  { %v2181_v31 = vpack.c.bf16 %v2049_v47, %v2046_v38 }
 0x384   :  { %6442 = vmatmul.mubr.bf16.gmra.mrb[168].mxu0 %v2181_v31 }
 0x385   :  { %v2053_v30 = vpop.f32.mrb[0].mxu1 }
 0x386   :  { %v2055_v33 = vpop.f32.mrb[1].mxu1 }
 0x387   :  { %v2056_v57 = vpop.f32.mrb[2].mxu1 }
 0x388   :  { %v2182_v34 = vpack.c.bf16 %v2056_v57, %v2053_v30  ;;  %v2058_v36 = vpop.f32.mrb[3].mxu1 }
 0x38a   :  { %6445 = vmatprep.mubr.bf16.mxu0 %v2182_v34 }
 0x38d   :  { %v2061_v9 = vpop.f32.mrb[4].mxu1 }
 0x38e   :  { %v2063_v32 = vpop.f32.mrb[5].mxu1 }
 0x38f   :  { %v2064_v48 = vpop.f32.mrb[6].mxu1 }
 0x390   :  { %v2183_v40 = vpack.c.bf16 %v2064_v48, %v2061_v9  ;;  %v2066_v37 = vpop.f32.mrb[7].mxu1 }
 0x392   :  { %6446 = vmatmul.mubr.bf16.gmra.mrb[172].mxu0 %v2183_v40 }
 0x395   :  { %v2069_v19 = vpop.f32.mrb[8].mxu1 }
 0x396   :  { %v2071_v2 = vpop.f32.mrb[9].mxu1 }
 0x397   :  { %v2072_v41 = vpop.f32.mrb[10].mxu1 }
 0x398   :  { %v2184_v42 = vpack.c.bf16 %v2072_v41, %v2069_v19  ;;  %v2074_v29 = vpop.f32.mrb[11].mxu1 }
 0x39a   :  { %6449 = vmatprep.mubr.bf16.mxu0 %v2184_v42 }
 0x39d   :  { %v2077_v39 = vpop.f32.mrb[12].mxu1 }
 0x39e   :  { %v2079_v44 = vpop.f32.mrb[13].mxu1 }
 0x39f   :  { %v2080_v46 = vpop.f32.mrb[14].mxu1 }
 0x3a0   :  { %v2185_v43 = vpack.c.bf16 %v2080_v46, %v2077_v39  ;;  %v2082_v52 = vpop.f32.mrb[15].mxu1 }
 0x3a2   :  { %6450 = vmatmul.mubr.bf16.gmra.mrb[176].mxu0 %v2185_v43 }
 0x3a5   :  { %v2085_v6 = vpop.f32.mrb[16].mxu1 }
 0x3a6   :  { %v2087_v49 = vpop.f32.mrb[17].mxu1 }
 0x3a7   :  { %v2088_v45 = vpop.f32.mrb[18].mxu1 }
 0x3a8   :  { %v2186_v51 = vpack.c.bf16 %v2088_v45, %v2085_v6  ;;  %v2090_v55 = vpop.f32.mrb[19].mxu1 }
 0x3aa   :  { %6453 = vmatprep.mubr.bf16.mxu0 %v2186_v51  ;;  %v7796_v51 = vld [vmem:[#allocation5 + $0x4] ss:$16 sps:$4 sm:$0xff]  }
 0x3ad   :  { %v2093_v50 = vpop.f32.mrb[20].mxu1 }
 0x3ae   :  { %v2095_v56 = vpop.f32.mrb[21].mxu1 }
 0x3af   :  { %v2096_v54 = vpop.f32.mrb[22].mxu1 }
 0x3b0   :  { %v2187_v8 = vpack.c.bf16 %v2096_v54, %v2093_v50  ;;  %v2098_v53 = vpop.f32.mrb[23].mxu1 }
 0x3b2   :  { %6454 = vmatmul.mubr.bf16.gmra.mrb[180].mxu0 %v2187_v8 }
 0x3b5   :  { %v2101_v61 = vpop.f32.mrb[24].mxu1 }
 0x3b6   :  { %v2103_v63 = vpop.f32.mrb[25].mxu1 }
 0x3b7   :  { %v2104_v59 = vpop.f32.mrb[26].mxu1 }
 0x3b8   :  { %v2188_v1 = vpack.c.bf16 %v2104_v59, %v2101_v61  ;;  %v2106_v12 = vpop.f32.mrb[27].mxu1 }
 0x3ba   :  { %6457 = vmatprep.mubr.bf16.mxu0 %v2188_v1 }
 0x3bd   :  { %v2109_v3 = vpop.f32.mrb[28].mxu1 }
 0x3be   :  { %v2111_v62 = vpop.f32.mrb[29].mxu1 }
 0x3bf   :  { %v2112_v5 = vpop.f32.mrb[30].mxu1 }
 0x3c0   :  { %v2189_v58 = vpack.c.bf16 %v2112_v5, %v2109_v3  ;;  %v2114_v4 = vpop.f32.mrb[31].mxu1 }
 0x3c2   :  { %6458 = vmatmul.mubr.bf16.gmra.mrb[184].mxu0 %v2189_v58 }
 0x3c5   :  { %v2117_v14 = vpop.f32.mrb[32].mxu1 }
 0x3c6   :  { %v2119_v10 = vpop.f32.mrb[33].mxu1 }
 0x3c7   :  { %v2120_v11 = vpop.f32.mrb[34].mxu1 }
 0x3c8   :  { %v2190_v7 = vpack.c.bf16 %v2120_v11, %v2117_v14  ;;  %v2122_v18 = vpop.f32.mrb[35].mxu1 }
 0x3ca   :  { %6461 = vmatprep.mubr.bf16.mxu0 %v2190_v7 }
 0x3cd   :  { %v2125_v15 = vpop.f32.mrb[36].mxu1 }
 0x3ce   :  { %v2127_v13 = vpop.f32.mrb[37].mxu1 }
 0x3cf   :  { %v2128_v16 = vpop.f32.mrb[38].mxu1 }
 0x3d0   :  { %v2191_v60 = vpack.c.bf16 %v2128_v16, %v2125_v15  ;;  %v2130_v20 = vpop.f32.mrb[39].mxu1 }
 0x3d2   :  { %6462 = vmatmul.mubr.bf16.gmra.mrb[188].mxu0 %v2191_v60 }
 0x3d5   :  { %v2133_v17 = vpop.f32.mrb[40].mxu1 }
 0x3d6   :  { %v2135_v21 = vpop.f32.mrb[41].mxu1 }
 0x3d7   :  { %v2136_v22 = vpop.f32.mrb[42].mxu1  ;;  %v6411_v28 = vpop.f32.mrb[136].mxu0 }
 0x3d8   :  { %v2192_v24 = vpack.c.bf16 %v2136_v22, %v2133_v17  ;;  %7412 = vtanh.f32 %v6411_v28  ;;  %v2138_v23 = vpop.f32.mrb[43].mxu1  ;;  %v2294_v25 = vpop.f32.mrb[137].mxu0 }
 0x3d9   :  { %7414 = vtanh.f32 %v2294_v25  ;;  %v6412_v38 = vpop.f32.mrb[138].mxu0 }
 0x3da   :  { %7416 = vtanh.f32 %v6412_v38  ;;  %v2297_v27 = vpop.f32.mrb[139].mxu0  ;;  %6465 = vmatprep.mubr.bf16.mxu0 %v2192_v24 }
 0x3db   :  { %7418 = vtanh.f32 %v2297_v27 }
 0x3dd   :  { %v2141_v26 = vpop.f32.mrb[44].mxu1 }
 0x3de   :  { %v2143_v47 = vpop.f32.mrb[45].mxu1 }
 0x3df   :  { %v2144_v0 = vpop.f32.mrb[46].mxu1 }
 0x3e0   :  { %v2193_v31 = vpack.c.bf16 %v2144_v0, %v2141_v26  ;;  %v2146_v30 = vpop.f32.mrb[47].mxu1 }
 0x3e2   :  { %v7413_v33 = vpop.eup %7412  ;;  %6466 = vmatmul.mubr.bf16.gmra.mrb[192].mxu0 %v2193_v31 }
 0x3e3   :  { %v7415_v57 = vpop.eup %7414 }
 0x3e4   :  { %v7417_v34 = vpop.eup %7416 }
 0x3e5   :  { %v7419_v36 = vpop.eup %7418  ;;  %v2149_v9 = vpop.f32.mrb[48].mxu1  ;;  %v2614_v32 = vpack.c.bf16 %v7417_v34, %v7413_v33 }
 0x3e6   :  { %v2151_v48 = vpop.f32.mrb[49].mxu1  ;;  %v2613_v40 = vpack.c.bf16 %v7419_v36, %v7415_v57 }
 0x3e7   :  { %v2152_v37 = vpop.f32.mrb[50].mxu1  ;;  %v6415_v19 = vpop.f32.mrb[140].mxu0 }
 0x3e8   :  { %v2194_v2 = vpack.c.bf16 %v2152_v37, %v2149_v9  ;;  %7420 = vtanh.f32 %v6415_v19  ;;  %v2154_v41 = vpop.f32.mrb[51].mxu1  ;;  %v2310_v42 = vpop.f32.mrb[141].mxu0  ;;  %2646 = vmatpush1.bf16.msra.mxu0 %v2613_v40 }
 0x3e9   :  { %7422 = vtanh.f32 %v2310_v42  ;;  %v6416_v29 = vpop.f32.mrb[142].mxu0  ;;  %2647 = vmatprep.subr.bf16.mxu0 %v9661_v35 }
 0x3ea   :  { %7424 = vtanh.f32 %v6416_v29  ;;  %v2313_v39 = vpop.f32.mrb[143].mxu0  ;;  %6469 = vmatprep.mubr.bf16.mxu0 %v2194_v2 }
 0x3eb   :  { %7426 = vtanh.f32 %v2313_v39 }
 0x3ec   :  { %2648 = vmatpush1.bf16.msra.mxu0 %v2614_v32 }
 0x3ed   :  { %v2157_v44 = vpop.f32.mrb[52].mxu1  ;;  %2649 = vmatprep.subr.bf16.mxu0 %v9661_v35 }
 0x3ee   :  { %v2159_v46 = vpop.f32.mrb[53].mxu1 }
 0x3ef   :  { %v2160_v43 = vpop.f32.mrb[54].mxu1 }
 0x3f0   :  { %v2195_v52 = vpack.c.bf16 %v2160_v43, %v2157_v44  ;;  %v2162_v6 = vpop.f32.mrb[55].mxu1 }
 0x3f2   :  { %v7421_v49 = vpop.eup %7420  ;;  %6470 = vmatmul.mubr.bf16.gmra.mrb[196].mxu0 %v2195_v52 }
 0x3f3   :  { %v7423_v45 = vpop.eup %7422  ;;  %2677 = vmatprep.mubr.bf16.mxu0 %v7796_v51 }
 0x3f4   :  { %v7425_v55 = vpop.eup %7424 }
 0x3f5   :  { %v7427_v50 = vpop.eup %7426  ;;  %v2616_v56 = vpack.c.bf16 %v7425_v55, %v7421_v49 }
 0x3f6   :  { %v2615_v54 = vpack.c.bf16 %v7427_v50, %v7423_v45 }
 0x3f7   :  { %v6419_v8 = vpop.f32.mrb[144].mxu0 }
 0x3f8   :  { %7428 = vtanh.f32 %v6419_v8  ;;  %v2326_v53 = vpop.f32.mrb[145].mxu0  ;;  %2650 = vmatpush1.bf16.msra.mxu0 %v2615_v54 }
 0x3f9   :  { %7430 = vtanh.f32 %v2326_v53  ;;  %v6420_v61 = vpop.f32.mrb[146].mxu0  ;;  %2651 = vmatprep.subr.bf16.mxu0 %v9661_v35  ;;  %v7797_v53 = vld [vmem:[#allocation5] ss:$16 sps:$4 sm:$0xff]  }
 0x3fa   :  { %7432 = vtanh.f32 %v6420_v61  ;;  %v2329_v63 = vpop.f32.mrb[147].mxu0  ;;  %v7798_v61 = vld [vmem:[#allocation5 + $0x24] ss:$16 sps:$4 sm:$0xff]  }
 0x3fb   :  { %7434 = vtanh.f32 %v2329_v63 }
 0x3fc   :  { %2652 = vmatpush1.bf16.msra.mxu0 %v2616_v56 }
 0x3fd   :  { %2653 = vmatprep.subr.bf16.mxu0 %v9661_v35 }
 0x402   :  { %v7429_v59 = vpop.eup %7428 }
 0x403   :  { %v7431_v1 = vpop.eup %7430 }
 0x404   :  { %v7433_v12 = vpop.eup %7432 }
 0x405   :  { %v7435_v3 = vpop.eup %7434  ;;  %v2618_v62 = vpack.c.bf16 %v7433_v12, %v7429_v59 }
 0x406   :  { %v2617_v5 = vpack.c.bf16 %v7435_v3, %v7431_v1 }
 0x407   :  { %v6423_v58 = vpop.f32.mrb[148].mxu0 }
 0x408   :  { %7436 = vtanh.f32 %v6423_v58  ;;  %v2342_v4 = vpop.f32.mrb[149].mxu0  ;;  %2654 = vmatpush1.bf16.msra.mxu0 %v2617_v5 }
 0x409   :  { %7438 = vtanh.f32 %v2342_v4  ;;  %v6424_v14 = vpop.f32.mrb[150].mxu0  ;;  %2655 = vmatprep.subr.bf16.mxu0 %v9661_v35 }
 0x40a   :  { %7440 = vtanh.f32 %v6424_v14  ;;  %v2345_v10 = vpop.f32.mrb[151].mxu0  ;;  %v7799_v14 = vld [vmem:[#allocation5 + $0x20] ss:$16 sps:$4 sm:$0xff]  }
 0x40b   :  { %7442 = vtanh.f32 %v2345_v10 }
 0x40c   :  { %2656 = vmatpush1.bf16.msra.mxu0 %v2618_v62 }
 0x40d   :  { %2657 = vmatprep.subr.bf16.mxu0 %v9661_v35 }
 0x412   :  { %v7437_v11 = vpop.eup %7436 }
 0x413   :  { %v7439_v7 = vpop.eup %7438 }
 0x414   :  { %v7441_v18 = vpop.eup %7440 }
 0x415   :  { %v7443_v15 = vpop.eup %7442  ;;  %v2620_v13 = vpack.c.bf16 %v7441_v18, %v7437_v11  ;;  %v7800_v11 = vld [vmem:[#allocation5 + $0x44] ss:$16 sps:$4 sm:$0xff]  }
 0x416   :  { %v2619_v16 = vpack.c.bf16 %v7443_v15, %v7439_v7  ;;  %v7801_v7 = vld [vmem:[#allocation5 + $0x40] ss:$16 sps:$4 sm:$0xff]   ;;  %v7802_v15 = vld [vmem:[#allocation5 + $0x64] ss:$16 sps:$4 sm:$0xff]  }
 0x417   :  { %v6427_v60 = vpop.f32.mrb[152].mxu0 }
 0x418   :  { %7444 = vtanh.f32 %v6427_v60  ;;  %v2358_v20 = vpop.f32.mrb[153].mxu0  ;;  %2658 = vmatpush1.bf16.msra.mxu0 %v2619_v16 }
 0x419   :  { %7446 = vtanh.f32 %v2358_v20  ;;  %v6428_v17 = vpop.f32.mrb[154].mxu0  ;;  %2659 = vmatprep.subr.bf16.mxu0 %v9661_v35 }
 0x41a   :  { %7448 = vtanh.f32 %v6428_v17  ;;  %v2361_v21 = vpop.f32.mrb[155].mxu0 }
 0x41b   :  { %7450 = vtanh.f32 %v2361_v21 }
 0x41c   :  { %2660 = vmatpush1.bf16.msra.mxu0 %v2620_v13 }
 0x41d   :  { %2661 = vmatprep.subr.bf16.mxu0 %v9661_v35 }
 0x422   :  { %v7445_v22 = vpop.eup %7444 }
 0x423   :  { %v7447_v28 = vpop.eup %7446 }
 0x424   :  { %v7449_v24 = vpop.eup %7448 }
 0x425   :  { %v7451_v23 = vpop.eup %7450  ;;  %v2622_v25 = vpack.c.bf16 %v7449_v24, %v7445_v22  ;;  %v7803_v24 = vld [vmem:[#allocation5 + $0x60] ss:$16 sps:$4 sm:$0xff]  }
 0x426   :  { %v2621_v38 = vpack.c.bf16 %v7451_v23, %v7447_v28 }
 0x427   :  { %v6431_v27 = vpop.f32.mrb[156].mxu0 }
 0x428   :  { %7452 = vtanh.f32 %v6431_v27  ;;  %v2374_v26 = vpop.f32.mrb[157].mxu0  ;;  %2662 = vmatpush1.bf16.msra.mxu0 %v2621_v38  ;;  %v7805_v38 = vld [vmem:[#allocation5 + $0x80] ss:$16 sps:$4 sm:$0xff]  }
 0x429   :  { %7454 = vtanh.f32 %v2374_v26  ;;  %v6432_v47 = vpop.f32.mrb[158].mxu0  ;;  %2663 = vmatprep.subr.bf16.mxu0 %v9661_v35  ;;  %v7806_v26 = vld [vmem:[#allocation5 + $0xa4] ss:$16 sps:$4 sm:$0xff]  }
 0x42a   :  { %7456 = vtanh.f32 %v6432_v47  ;;  %v2377_v0 = vpop.f32.mrb[159].mxu0 }
 0x42b   :  { %7458 = vtanh.f32 %v2377_v0 }
 0x42c   :  { %2664 = vmatpush1.bf16.msra.mxu0 %v2622_v25  ;;  %v7804_v25 = vld [vmem:[#allocation5 + $0x84] ss:$16 sps:$4 sm:$0xff]  }
 0x42d   :  { %2665 = vmatprep.subr.bf16.mxu0 %v9661_v35 }
 0x432   :  { %v7453_v31 = vpop.eup %7452 }
 0x433   :  { %v7455_v30 = vpop.eup %7454 }
 0x434   :  { %v7457_v33 = vpop.eup %7456 }
 0x435   :  { %v7459_v57 = vpop.eup %7458  ;;  %v2624_v34 = vpack.c.bf16 %v7457_v33, %v7453_v31 }
 0x436   :  { %v2623_v36 = vpack.c.bf16 %v7459_v57, %v7455_v30 }
 0x437   :  { %v6435_v9 = vpop.f32.mrb[160].mxu0 }
 0x438   :  { %7460 = vtanh.f32 %v6435_v9  ;;  %v2390_v32 = vpop.f32.mrb[161].mxu0  ;;  %2666 = vmatpush1.bf16.msra.mxu0 %v2623_v36  ;;  %v7807_v9 = vld [vmem:[#allocation5 + $0xa0] ss:$16 sps:$4 sm:$0xff]  }
 0x439   :  { %7462 = vtanh.f32 %v2390_v32  ;;  %v6436_v48 = vpop.f32.mrb[162].mxu0  ;;  %2667 = vmatprep.subr.bf16.mxu0 %v9661_v35 }
 0x43a   :  { %7464 = vtanh.f32 %v6436_v48  ;;  %v2393_v40 = vpop.f32.mrb[163].mxu0  ;;  %v7808_v48 = vld [vmem:[#allocation5 + $0xc4] ss:$16 sps:$4 sm:$0xff]  }
 0x43b   :  { %7466 = vtanh.f32 %v2393_v40  ;;  %v7809_v40 = vld [vmem:[#allocation5 + $0xc0] ss:$16 sps:$4 sm:$0xff]  }
 0x43c   :  { %2668 = vmatpush1.bf16.msra.mxu0 %v2624_v34 }
 0x43d   :  { %2669 = vmatprep.subr.bf16.mxu0 %v9661_v35 }
 0x442   :  { %v7461_v37 = vpop.eup %7460 }
 0x443   :  { %v7463_v19 = vpop.eup %7462 }
 0x444   :  { %v7465_v2 = vpop.eup %7464 }
 0x445   :  { %v7467_v41 = vpop.eup %7466  ;;  %v2626_v42 = vpack.c.bf16 %v7465_v2, %v7461_v37 }
 0x446   :  { %v2625_v29 = vpack.c.bf16 %v7467_v41, %v7463_v19  ;;  %v7810_v19 = vld [vmem:[#allocation5 + $0xe4] ss:$16 sps:$4 sm:$0xff]  }
 0x447   :  { %v6439_v39 = vpop.f32.mrb[164].mxu0 }
 0x448   :  { %7468 = vtanh.f32 %v6439_v39  ;;  %v2406_v44 = vpop.f32.mrb[165].mxu0  ;;  %2670 = vmatpush1.bf16.msra.mxu0 %v2625_v29 }
 0x449   :  { %7470 = vtanh.f32 %v2406_v44  ;;  %v6440_v46 = vpop.f32.mrb[166].mxu0  ;;  %2671 = vmatprep.subr.bf16.mxu0 %v9661_v35 }
 0x44a   :  { %7472 = vtanh.f32 %v6440_v46  ;;  %v2409_v43 = vpop.f32.mrb[167].mxu0 }
 0x44b   :  { %7474 = vtanh.f32 %v2409_v43 }
 0x44c   :  { %2672 = vmatpush1.bf16.msra.mxu0 %v2626_v42 }
 0x44d   :  { %2673 = vmatprep.subr.bf16.mxu0 %v9661_v35 }
 0x452   :  { %v7469_v52 = vpop.eup %7468 }
 0x453   :  { %v7471_v6 = vpop.eup %7470 }
 0x454   :  { %v7473_v49 = vpop.eup %7472 }
 0x455   :  { %v7475_v45 = vpop.eup %7474  ;;  %v2628_v51 = vpack.c.bf16 %v7473_v49, %v7469_v52  ;;  %v7811_v52 = vld [vmem:[#allocation5 + $0xe0] ss:$16 sps:$4 sm:$0xff]   ;;  %v7812_v49 = vld [vmem:[#allocation5 + $0x104] ss:$16 sps:$4 sm:$0xff]  }
 0x456   :  { %v2627_v55 = vpack.c.bf16 %v7475_v45, %v7471_v6  ;;  %v7813_v45 = vld [vmem:[#allocation5 + $0x100] ss:$16 sps:$4 sm:$0xff]  }
 0x457   :  { %v6443_v50 = vpop.f32.mrb[168].mxu0 }
 0x458   :  { %7476 = vtanh.f32 %v6443_v50  ;;  %v2422_v56 = vpop.f32.mrb[169].mxu0  ;;  %2674 = vmatpush1.bf16.msra.mxu0 %v2627_v55  ;;  %v7814_v55 = vld [vmem:[#allocation5 + $0x124] ss:$16 sps:$4 sm:$0xff]  }
 0x459   :  { %7478 = vtanh.f32 %v2422_v56  ;;  %v6444_v54 = vpop.f32.mrb[170].mxu0  ;;  %2675 = vmatprep.subr.bf16.mxu0 %v9661_v35 }
 0x45a   :  { %7480 = vtanh.f32 %v6444_v54  ;;  %v2425_v8 = vpop.f32.mrb[171].mxu0 }
 0x45b   :  { %7482 = vtanh.f32 %v2425_v8 }
 0x45c   :  { %2676 = vmatpush1.bf16.msra.mxu0 %v2628_v51 }
 0x45d   :  { %2934 = vmatprep.subr.bf16.mxu0 %v9661_v35 }
 0x45f   :  { %2678 = vmatmul.mubr.bf16.vlgmr.msra.gmra.mrb[200].mxu0 %v7797_v53 }
 0x460   :  { %2685 = vmatprep.mubr.bf16.mxu0 %v7798_v61 }
 0x462   :  { %v7477_v63 = vpop.eup %7476 }
 0x463   :  { %v7479_v59 = vpop.eup %7478 }
 0x464   :  { %v7481_v1 = vpop.eup %7480 }
 0x465   :  { %v7483_v12 = vpop.eup %7482  ;;  %v6447_v3 = vpop.f32.mrb[172].mxu0  ;;  %v2630_v62 = vpack.c.bf16 %v7481_v1, %v7477_v63  ;;  %v7815_v1 = vld [vmem:[#allocation5 + $0x120] ss:$16 sps:$4 sm:$0xff]  }
 0x466   :  { %7484 = vtanh.f32 %v6447_v3  ;;  %v2438_v5 = vpop.f32.mrb[173].mxu0  ;;  %v2629_v58 = vpack.c.bf16 %v7483_v12, %v7479_v59  ;;  %v7816_v3 = vld [vmem:[#allocation5 + $0x144] ss:$16 sps:$4 sm:$0xff]  }
 0x467   :  { %7486 = vtanh.f32 %v2438_v5  ;;  %v6448_v4 = vpop.f32.mrb[174].mxu0  ;;  %2686 = vmatmul.mubr.bf16.gmra.mrb[204].mxu0 %v7799_v14 }
 0x468   :  { %7488 = vtanh.f32 %v6448_v4  ;;  %v2441_v10 = vpop.f32.mrb[175].mxu0  ;;  %2935 = vmatpush1.bf16.msra.mxu0 %v2629_v58  ;;  %2693 = vmatprep.mubr.bf16.mxu0 %v7800_v11  ;;  %v7818_v58 = vld [vmem:[#allocation5 + $0x164] ss:$16 sps:$4 sm:$0xff]  }
 0x469   :  { %7490 = vtanh.f32 %v2441_v10  ;;  %2936 = vmatprep.subr.bf16.mxu0 %v9661_v35 }
 0x46c   :  { %2937 = vmatpush1.bf16.msra.mxu0 %v2630_v62  ;;  %v7817_v62 = vld [vmem:[#allocation5 + $0x140] ss:$16 sps:$4 sm:$0xff]  }
 0x46d   :  { %2938 = vmatprep.subr.bf16.mxu0 %v9661_v35 }
 0x46f   :  { %2694 = vmatmul.mubr.bf16.gmra.mrb[208].mxu0 %v7801_v7 }
 0x470   :  { %v7485_v18 = vpop.eup %7484  ;;  %2701 = vmatprep.mubr.bf16.mxu0 %v7802_v15 }
 0x471   :  { %v7487_v13 = vpop.eup %7486 }
 0x472   :  { %v7489_v16 = vpop.eup %7488 }
 0x473   :  { %v7491_v60 = vpop.eup %7490  ;;  %v2632_v20 = vpack.c.bf16 %v7489_v16, %v7485_v18  ;;  %v7819_v16 = vld [vmem:[#allocation5 + $0x160] ss:$16 sps:$4 sm:$0xff]  }
 0x474   :  { %v2631_v17 = vpack.c.bf16 %v7491_v60, %v7487_v13 }
 0x475   :  { %v6451_v21 = vpop.f32.mrb[176].mxu0 }
 0x476   :  { %7492 = vtanh.f32 %v6451_v21  ;;  %v2454_v22 = vpop.f32.mrb[177].mxu0  ;;  %2939 = vmatpush1.bf16.msra.mxu0 %v2631_v17  ;;  %v7821_v17 = vld [vmem:[#allocation5 + $0x180] ss:$16 sps:$4 sm:$0xff]  }
 0x477   :  { %7494 = vtanh.f32 %v2454_v22  ;;  %v6452_v28 = vpop.f32.mrb[178].mxu0  ;;  %2702 = vmatmul.mubr.bf16.gmra.mrb[212].mxu0 %v7803_v24  ;;  %2940 = vmatprep.subr.bf16.mxu0 %v9661_v35  ;;  %v8470_v22 = vld [vmem:[#allocation5 + $0x1a4] ss:$16 sps:$4 sm:$0xff]  }
 0x478   :  { %7496 = vtanh.f32 %v6452_v28  ;;  %v2457_v23 = vpop.f32.mrb[179].mxu0  ;;  %2709 = vmatprep.mubr.bf16.mxu0 %v7804_v25 }
 0x479   :  { %7498 = vtanh.f32 %v2457_v23 }
 0x47a   :  { %2941 = vmatpush1.bf16.msra.mxu0 %v2632_v20  ;;  %v7820_v20 = vld [vmem:[#allocation5 + $0x184] ss:$16 sps:$4 sm:$0xff]  }
 0x47b   :  { %2942 = vmatprep.subr.bf16.mxu0 %v9661_v35 }
 0x47f   :  { %2710 = vmatmul.mubr.bf16.gmra.mrb[216].mxu0 %v7805_v38 }
 0x480   :  { %v7493_v27 = vpop.eup %7492  ;;  %2717 = vmatprep.mubr.bf16.mxu0 %v7806_v26 }
 0x481   :  { %v7495_v47 = vpop.eup %7494 }
 0x482   :  { %v7497_v0 = vpop.eup %7496 }
 0x483   :  { %v7499_v31 = vpop.eup %7498  ;;  %v2634_v30 = vpack.c.bf16 %v7497_v0, %v7493_v27  ;;  %v8473_v0 = vld [vmem:[#allocation5 + $0x1a0] ss:$16 sps:$4 sm:$0xff]  }
 0x484   :  { %v2633_v33 = vpack.c.bf16 %v7499_v31, %v7495_v47 }
 0x485   :  { %v6455_v57 = vpop.f32.mrb[180].mxu0 }
 0x486   :  { %7500 = vtanh.f32 %v6455_v57  ;;  %v2470_v34 = vpop.f32.mrb[181].mxu0  ;;  %2943 = vmatpush1.bf16.msra.mxu0 %v2633_v33  ;;  %v8481_v33 = vld [vmem:[#allocation5 + $0x1c0] ss:$16 sps:$4 sm:$0xff]  }
 0x487   :  { %7502 = vtanh.f32 %v2470_v34  ;;  %v6456_v36 = vpop.f32.mrb[182].mxu0  ;;  %2718 = vmatmul.mubr.bf16.gmra.mrb[220].mxu0 %v7807_v9  ;;  %2944 = vmatprep.subr.bf16.mxu0 %v9661_v35  ;;  %v8484_v34 = vld [vmem:[#allocation5 + $0x1e4] ss:$16 sps:$4 sm:$0xff]  }
 0x488   :  { %7504 = vtanh.f32 %v6456_v36  ;;  %v2473_v32 = vpop.f32.mrb[183].mxu0  ;;  %2725 = vmatprep.mubr.bf16.mxu0 %v7808_v48 }
 0x489   :  { %7506 = vtanh.f32 %v2473_v32 }
 0x48a   :  { %2945 = vmatpush1.bf16.msra.mxu0 %v2634_v30  ;;  %v8477_v30 = vld [vmem:[#allocation5 + $0x1c4] ss:$16 sps:$4 sm:$0xff]  }
 0x48b   :  { %2946 = vmatprep.subr.bf16.mxu0 %v9661_v35 }
 0x48f   :  { %2726 = vmatmul.mubr.bf16.gmra.mrb[224].mxu0 %v7809_v40 }
 0x490   :  { %v7501_v37 = vpop.eup %7500  ;;  %2733 = vmatprep.mubr.bf16.mxu0 %v7810_v19  ;;  %v8491_v19 = vld [vmem:[#allocation5 + $0x204] ss:$16 sps:$4 sm:$0xff]  }
 0x491   :  { %v7503_v2 = vpop.eup %7502 }
 0x492   :  { %v7505_v41 = vpop.eup %7504 }
 0x493   :  { %v7507_v42 = vpop.eup %7506  ;;  %v2636_v29 = vpack.c.bf16 %v7505_v41, %v7501_v37  ;;  %v8487_v37 = vld [vmem:[#allocation5 + $0x1e0] ss:$16 sps:$4 sm:$0xff]   ;;  %v8497_v41 = vld [vmem:[#allocation5 + $0x224] ss:$16 sps:$4 sm:$0xff]  }
 0x494   :  { %v2635_v39 = vpack.c.bf16 %v7507_v42, %v7503_v2  ;;  %v8494_v2 = vld [vmem:[#allocation5 + $0x200] ss:$16 sps:$4 sm:$0xff]  }
 0x495   :  { %v6459_v44 = vpop.f32.mrb[184].mxu0  ;;  %v8500_v42 = vld [vmem:[#allocation5 + $0x220] ss:$16 sps:$4 sm:$0xff]  }
 0x496   :  { %7508 = vtanh.f32 %v6459_v44  ;;  %v2486_v46 = vpop.f32.mrb[185].mxu0  ;;  %2947 = vmatpush1.bf16.msra.mxu0 %v2635_v39  ;;  %v8506_v39 = vld [vmem:[#allocation5 + $0x240] ss:$16 sps:$4 sm:$0xff]   ;;  %v8509_v44 = vld [vmem:[#allocation5 + $0x264] ss:$16 sps:$4 sm:$0xff]  }
 0x497   :  { %7510 = vtanh.f32 %v2486_v46  ;;  %v6460_v43 = vpop.f32.mrb[186].mxu0  ;;  %2734 = vmatmul.mubr.bf16.gmra.mrb[228].mxu0 %v7811_v52  ;;  %2948 = vmatprep.subr.bf16.mxu0 %v9661_v35  ;;  %v8512_v46 = vld [vmem:[#allocation5 + $0x260] ss:$16 sps:$4 sm:$0xff]  }
 0x498   :  { %7512 = vtanh.f32 %v6460_v43  ;;  %v2489_v6 = vpop.f32.mrb[187].mxu0  ;;  %2741 = vmatprep.mubr.bf16.mxu0 %v7812_v49  ;;  %v8515_v43 = vld [vmem:[#allocation5 + $0x284] ss:$16 sps:$4 sm:$0xff]   ;;  %v8518_v52 = vld [vmem:[#allocation5 + $0x280] ss:$16 sps:$4 sm:$0xff]  }
 0x499   :  { %7514 = vtanh.f32 %v2489_v6  ;;  %v7268_v6 = vld [vmem:[#allocation10] sm:$0xff]  }
 0x49a   :  { %2949 = vmatpush1.bf16.msra.mxu0 %v2636_v29  ;;  %v8503_v29 = vld [vmem:[#allocation5 + $0x244] ss:$16 sps:$4 sm:$0xff]   ;;  %6473 = vmatprep.subr.bf16.mxu1 %v7268_v6 }
 0x49b   :  { %2950 = vmatprep.subr.bf16.mxu0 %v9661_v35  ;;  %v8521_v49 = vld [vmem:[#allocation5 + $0x2a4] ss:$16 sps:$4 sm:$0xff]   ;;  %6474 = vmatpush3.bf16.msra.mxu1 %v7268_v6  ;;  %v8644_v6 = vld [vmem:[#allocation5 + $0x128] ss:$16 sps:$4 sm:$0xff]  }
 0x49c   :  { %9750 = vst [vmem:[#allocation36_spill] sm:$0xff] %v8644_v6 }
 0x49f   :  { %2742 = vmatmul.mubr.bf16.gmra.mrb[232].mxu0 %v7813_v45  ;;  %v8524_v45 = vld [vmem:[#allocation5 + $0x2a0] ss:$16 sps:$4 sm:$0xff]  }
 0x4a0   :  { %v7509_v51 = vpop.eup %7508  ;;  %2749 = vmatprep.mubr.bf16.mxu0 %v7814_v55  ;;  %v8530_v55 = vld [vmem:[#allocation5 + $0x2c0] ss:$16 sps:$4 sm:$0xff]  }
 0x4a1   :  { %v7511_v50 = vpop.eup %7510 }
 0x4a2   :  { %v7513_v56 = vpop.eup %7512 }
 0x4a3   :  { %v7515_v54 = vpop.eup %7514  ;;  %v2638_v8 = vpack.c.bf16 %v7513_v56, %v7509_v51  ;;  %v8527_v51 = vld [vmem:[#allocation5 + $0x2c4] ss:$16 sps:$4 sm:$0xff]   ;;  %v8536_v56 = vld [vmem:[#allocation5 + $0x2e0] ss:$16 sps:$4 sm:$0xff]  }
 0x4a4   :  { %v2637_v53 = vpack.c.bf16 %v7515_v54, %v7511_v50  ;;  %v8533_v50 = vld [vmem:[#allocation5 + $0x2e4] ss:$16 sps:$4 sm:$0xff]  }
 0x4a5   :  { %v6463_v61 = vpop.f32.mrb[188].mxu0  ;;  %v8539_v54 = vld [vmem:[#allocation5 + $0x304] ss:$16 sps:$4 sm:$0xff]  }
 0x4a6   :  { %7516 = vtanh.f32 %v6463_v61  ;;  %v2502_v63 = vpop.f32.mrb[189].mxu0  ;;  %2951 = vmatpush1.bf16.msra.mxu0 %v2637_v53  ;;  %v7269_v53 = vld [vmem:[#allocation10 + $0x8] sm:$0xff]   ;;  %v8545_v61 = vld [vmem:[#allocation5 + $0x324] ss:$16 sps:$4 sm:$0xff]  }
 0x4a7   :  { %7518 = vtanh.f32 %v2502_v63  ;;  %v6464_v59 = vpop.f32.mrb[190].mxu0  ;;  %2750 = vmatmul.mubr.bf16.gmra.mrb[236].mxu0 %v7815_v1  ;;  %2952 = vmatprep.subr.bf16.mxu0 %v9661_v35  ;;  %v8548_v63 = vld [vmem:[#allocation5 + $0x320] ss:$16 sps:$4 sm:$0xff]  }
 0x4a8   :  { %7520 = vtanh.f32 %v6464_v59  ;;  %v2505_v12 = vpop.f32.mrb[191].mxu0  ;;  %2757 = vmatprep.mubr.bf16.mxu0 %v7816_v3  ;;  %6475 = vmatprep.subr.bf16.mxu1 %v7269_v53  ;;  %v8551_v59 = vld [vmem:[#allocation5 + $0x344] ss:$16 sps:$4 sm:$0xff]   ;;  %v8554_v1 = vld [vmem:[#allocation5 + $0x340] ss:$16 sps:$4 sm:$0xff]  }
 0x4a9   :  { %7522 = vtanh.f32 %v2505_v12  ;;  %6476 = vmatpush3.bf16.msra.mxu1 %v7269_v53  ;;  %v8557_v12 = vld [vmem:[#allocation5 + $0x364] ss:$16 sps:$4 sm:$0xff]   ;;  %v8560_v3 = vld [vmem:[#allocation5 + $0x360] ss:$16 sps:$4 sm:$0xff]   ;;  %v8647_v53 = vld [vmem:[#allocation5 + $0x14c] ss:$16 sps:$4 sm:$0xff]  }
 0x4aa   :  { %2953 = vmatpush1.bf16.msra.mxu0 %v2638_v8  ;;  %v8542_v8 = vld [vmem:[#allocation5 + $0x300] ss:$16 sps:$4 sm:$0xff]   ;;  %9751 = vst [vmem:[#allocation37_spill] sm:$0xff] %v8647_v53 }
 0x4ab   :  { %2954 = vmatprep.subr.bf16.mxu0 %v9661_v35 }
 0x4af   :  { %2758 = vmatmul.mubr.bf16.gmra.mrb[240].mxu0 %v7817_v62  ;;  %v8563_v62 = vld [vmem:[#allocation5 + $0x384] ss:$16 sps:$4 sm:$0xff]  }
 0x4b0   :  { %v7517_v5 = vpop.eup %7516  ;;  %2765 = vmatprep.mubr.bf16.mxu0 %v7818_v58  ;;  %v7270_v58 = vld [vmem:[#allocation10 + $0x10] sm:$0xff]  }
 0x4b1   :  { %v7519_v4 = vpop.eup %7518  ;;  %6477 = vmatprep.subr.bf16.mxu1 %v7270_v58 }
 0x4b2   :  { %v7521_v14 = vpop.eup %7520  ;;  %6478 = vmatpush3.bf16.msra.mxu1 %v7270_v58  ;;  %v8650_v58 = vld [vmem:[#allocation5 + $0x148] ss:$16 sps:$4 sm:$0xff]  }
 0x4b3   :  { %v7523_v10 = vpop.eup %7522  ;;  %v2640_v11 = vpack.c.bf16 %v7521_v14, %v7517_v5  ;;  %v8566_v5 = vld [vmem:[#allocation5 + $0x380] ss:$16 sps:$4 sm:$0xff]   ;;  %9752 = vst [vmem:[#allocation38_spill] sm:$0xff] %v8650_v58 }
 0x4b4   :  { %v2639_v7 = vpack.c.bf16 %v7523_v10, %v7519_v4  ;;  %v8569_v4 = vld [vmem:[#allocation5 + $0x3a4] ss:$16 sps:$4 sm:$0xff]   ;;  %v8572_v14 = vld [vmem:[#allocation5 + $0x3a0] ss:$16 sps:$4 sm:$0xff]  }
 0x4b5   :  { %v6467_v18 = vpop.f32.mrb[192].mxu0  ;;  %v8575_v10 = vld [vmem:[#allocation5 + $0x3c4] ss:$16 sps:$4 sm:$0xff]  }
 0x4b6   :  { %7524 = vtanh.f32 %v6467_v18  ;;  %v2518_v15 = vpop.f32.mrb[193].mxu0  ;;  %2955 = vmatpush1.bf16.msra.mxu0 %v2639_v7  ;;  %v8581_v7 = vld [vmem:[#allocation5 + $0x3e4] ss:$16 sps:$4 sm:$0xff]   ;;  %v8584_v18 = vld [vmem:[#allocation5 + $0x3e0] ss:$16 sps:$4 sm:$0xff]  }
 0x4b7   :  { %7526 = vtanh.f32 %v2518_v15  ;;  %v6468_v13 = vpop.f32.mrb[194].mxu0  ;;  %2766 = vmatmul.mubr.bf16.gmra.mrb[244].mxu0 %v7819_v16  ;;  %2956 = vmatprep.subr.bf16.mxu0 %v9661_v35  ;;  %v8587_v15 = vld [vmem:[#allocation5 + $0xc] ss:$16 sps:$4 sm:$0xff]  }
 0x4b8   :  { %7528 = vtanh.f32 %v6468_v13  ;;  %v2521_v60 = vpop.f32.mrb[195].mxu0  ;;  %2773 = vmatprep.mubr.bf16.mxu0 %v7820_v20  ;;  %v8590_v13 = vld [vmem:[#allocation5 + $0x8] ss:$16 sps:$4 sm:$0xff]  }
 0x4b9   :  { %7530 = vtanh.f32 %v2521_v60  ;;  %v7271_v16 = vld [vmem:[#allocation10 + $0x18] sm:$0xff]  }
 0x4ba   :  { %2957 = vmatpush1.bf16.msra.mxu0 %v2640_v11  ;;  %v8578_v11 = vld [vmem:[#allocation5 + $0x3c0] ss:$16 sps:$4 sm:$0xff]   ;;  %v8593_v60 = vld [vmem:[#allocation5 + $0x2c] ss:$16 sps:$4 sm:$0xff]   ;;  %6479 = vmatprep.subr.bf16.mxu1 %v7271_v16  ;;  %v8596_v20 = vld [vmem:[#allocation5 + $0x28] ss:$16 sps:$4 sm:$0xff]  }
 0x4bb   :  { %2958 = vmatprep.subr.bf16.mxu0 %v9661_v35  ;;  %6480 = vmatpush3.bf16.msra.mxu1 %v7271_v16  ;;  %v8653_v16 = vld [vmem:[#allocation5 + $0x16c] ss:$16 sps:$4 sm:$0xff]  }
 0x4bc   :  { %9753 = vst [vmem:[#allocation39_spill] sm:$0xff] %v8653_v16 }
 0x4bf   :  { %2774 = vmatmul.mubr.bf16.gmra.mrb[248].mxu0 %v7821_v17  ;;  %v8599_v17 = vld [vmem:[#allocation5 + $0x4c] ss:$16 sps:$4 sm:$0xff]  }
 0x4c0   :  { %v7525_v21 = vpop.eup %7524  ;;  %2781 = vmatprep.mubr.bf16.mxu0 %v8470_v22 }
 0x4c1   :  { %v7527_v28 = vpop.eup %7526 }
 0x4c2   :  { %v7529_v24 = vpop.eup %7528 }
 0x4c3   :  { %v7531_v23 = vpop.eup %7530  ;;  %v2642_v25 = vpack.c.bf16 %v7529_v24, %v7525_v21  ;;  %v8602_v21 = vld [vmem:[#allocation5 + $0x48] ss:$16 sps:$4 sm:$0xff]  }
 0x4c4   :  { %v2641_v38 = vpack.c.bf16 %v7531_v23, %v7527_v28  ;;  %9736 = vst [vmem:[#allocation22_spill] sm:$0xff] %v8602_v21  ;;  %v8605_v28 = vld [vmem:[#allocation5 + $0x6c] ss:$16 sps:$4 sm:$0xff]   ;;  %v8608_v24 = vld [vmem:[#allocation5 + $0x68] ss:$16 sps:$4 sm:$0xff]  }
 0x4c5   :  { %v6471_v27 = vpop.f32.mrb[196].mxu0  ;;  %9737 = vst [vmem:[#allocation23_spill] sm:$0xff] %v8605_v28  ;;  %9738 = vst [vmem:[#allocation24_spill] sm:$0xff] %v8608_v24  ;;  %v8611_v23 = vld [vmem:[#allocation5 + $0x8c] ss:$16 sps:$4 sm:$0xff]  }
 0x4c6   :  { %7532 = vtanh.f32 %v6471_v27  ;;  %v2534_v26 = vpop.f32.mrb[197].mxu0  ;;  %2959 = vmatpush1.bf16.msra.mxu0 %v2641_v38  ;;  %9739 = vst [vmem:[#allocation25_spill] sm:$0xff] %v8611_v23  ;;  %v7272_v38 = vld [vmem:[#allocation10 + $0x20] sm:$0xff]   ;;  %v8617_v27 = vld [vmem:[#allocation5 + $0xac] ss:$16 sps:$4 sm:$0xff]  }
 0x4c7   :  { %7534 = vtanh.f32 %v2534_v26  ;;  %v6472_v47 = vpop.f32.mrb[198].mxu0  ;;  %2782 = vmatmul.mubr.bf16.gmra.mrb[252].mxu0 %v8473_v0  ;;  %2960 = vmatprep.subr.bf16.mxu0 %v9661_v35  ;;  %9741 = vst [vmem:[#allocation27_spill] sm:$0xff] %v8617_v27  ;;  %v8620_v26 = vld [vmem:[#allocation5 + $0xa8] ss:$16 sps:$4 sm:$0xff]  }
 0x4c8   :  { %7536 = vtanh.f32 %v6472_v47  ;;  %v2537_v31 = vpop.f32.mrb[199].mxu0  ;;  %2789 = vmatprep.mubr.bf16.mxu0 %v8477_v30  ;;  %6481 = vmatprep.subr.bf16.mxu1 %v7272_v38  ;;  %9742 = vst [vmem:[#allocation28_spill] sm:$0xff] %v8620_v26  ;;  %v8623_v47 = vld [vmem:[#allocation5 + $0xcc] ss:$16 sps:$4 sm:$0xff]  }
 0x4c9   :  { %7538 = vtanh.f32 %v2537_v31  ;;  %6482 = vmatpush3.bf16.msra.mxu1 %v7272_v38  ;;  %9743 = vst [vmem:[#allocation29_spill] sm:$0xff] %v8623_v47  ;;  %v8626_v31 = vld [vmem:[#allocation5 + $0xc8] ss:$16 sps:$4 sm:$0xff]   ;;  %v7274_v38 = vld [vmem:[#allocation10 + $0x30] sm:$0xff]  }
 0x4ca   :  { %2961 = vmatpush1.bf16.msra.mxu0 %v2642_v25  ;;  %v8614_v25 = vld [vmem:[#allocation5 + $0x88] ss:$16 sps:$4 sm:$0xff]   ;;  %9744 = vst [vmem:[#allocation30_spill] sm:$0xff] %v8626_v31 }
 0x4cb   :  { %2962 = vmatprep.subr.bf16.mxu0 %v9661_v35  ;;  %9740 = vst [vmem:[#allocation26_spill] sm:$0xff] %v8614_v25 }
 0x4cf   :  { %2790 = vmatmul.mubr.bf16.gmra.mrb[0].mxu0 %v8481_v33 }
 0x4d0   :  { %v7533_v57 = vpop.eup %7532  ;;  %2797 = vmatprep.mubr.bf16.mxu0 %v8484_v34 }
 0x4d1   :  { %v7535_v36 = vpop.eup %7534 }
 0x4d2   :  { %v7537_v9 = vpop.eup %7536 }
 0x4d3   :  { %v7539_v32 = vpop.eup %7538  ;;  %v2644_v48 = vpack.c.bf16 %v7537_v9, %v7533_v57  ;;  %v8629_v57 = vld [vmem:[#allocation5 + $0xec] ss:$16 sps:$4 sm:$0xff]  }
 0x4d4   :  { %v2643_v40 = vpack.c.bf16 %v7539_v32, %v7535_v36  ;;  %9745 = vst [vmem:[#allocation31_spill] sm:$0xff] %v8629_v57  ;;  %v8632_v36 = vld [vmem:[#allocation5 + $0xe8] ss:$16 sps:$4 sm:$0xff]   ;;  %v8635_v9 = vld [vmem:[#allocation5 + $0x10c] ss:$16 sps:$4 sm:$0xff]  }
 0x4d5   :  { %9746 = vst [vmem:[#allocation32_spill] sm:$0xff] %v8632_v36  ;;  %9747 = vst [vmem:[#allocation33_spill] sm:$0xff] %v8635_v9  ;;  %v8638_v32 = vld [vmem:[#allocation5 + $0x108] ss:$16 sps:$4 sm:$0xff]  }
 0x4d6   :  { %2963 = vmatpush1.bf16.msra.mxu0 %v2643_v40  ;;  %9748 = vst [vmem:[#allocation34_spill] sm:$0xff] %v8638_v32  ;;  %v8641_v40 = vld [vmem:[#allocation5 + $0x12c] ss:$16 sps:$4 sm:$0xff]  }
 0x4d7   :  { %2798 = vmatmul.mubr.bf16.gmra.mrb[4].mxu0 %v8487_v37  ;;  %2964 = vmatprep.subr.bf16.mxu0 %v9661_v35  ;;  %9749 = vst [vmem:[#allocation35_spill] sm:$0xff] %v8641_v40  ;;  %v8656_v35 = vld [vmem:[#allocation5 + $0x168] ss:$16 sps:$4 sm:$0xff]  }
 0x4d8   :  { %2805 = vmatprep.mubr.bf16.mxu0 %v8491_v19  ;;  %9754 = vst [vmem:[#allocation40_spill] sm:$0xff] %v8656_v35 }
 0x4da   :  { %2965 = vmatpush1.bf16.msra.mxu0 %v2644_v48  ;;  %v7273_v48 = vld [vmem:[#allocation10 + $0x28] sm:$0xff]  }
 0x4db   :  { %6483 = vmatprep.subr.bf16.mxu1 %v7273_v48 }
 0x4dc   :  { %6484 = vmatpush3.bf16.msra.mxu1 %v7273_v48  ;;  %v8659_v48 = vld [vmem:[#allocation5 + $0x18c] ss:$16 sps:$4 sm:$0xff]  }
 0x4dd   :  { %6485 = vmatprep.subr.bf16.mxu1 %v7274_v38  ;;  %9755 = vst [vmem:[#allocation41_spill] sm:$0xff] %v8659_v48 }
 0x4df   :  { %2806 = vmatmul.mubr.bf16.gmra.mrb[8].mxu0 %v8494_v2 }
 0x4e0   :  { %2813 = vmatprep.mubr.bf16.mxu0 %v8497_v41  ;;  %6486 = vmatpush3.bf16.msra.mxu1 %v7274_v38  ;;  %v8675_v38 = vld [vmem:[#allocation5 + $0x1c8] ss:$16 sps:$4 sm:$0xff]  }
 0x4e1   :  { %9761 = vst [vmem:[#allocation46_spill] sm:$0xff] %v8675_v38 }
 0x4e7   :  { %2814 = vmatmul.mubr.bf16.gmra.mrb[12].mxu0 %v8500_v42 }
 0x4e8   :  { %2821 = vmatprep.mubr.bf16.mxu0 %v8503_v29 }
 0x4ef   :  { %2822 = vmatmul.mubr.bf16.gmra.mrb[16].mxu0 %v8506_v39 }
 0x4f0   :  { %2829 = vmatprep.mubr.bf16.mxu0 %v8509_v44 }
 0x4f7   :  { %2830 = vmatmul.mubr.bf16.gmra.mrb[20].mxu0 %v8512_v46 }
 0x4f8   :  { %2837 = vmatprep.mubr.bf16.mxu0 %v8515_v43 }
 0x4ff   :  { %2838 = vmatmul.mubr.bf16.gmra.mrb[24].mxu0 %v8518_v52 }
 0x500   :  { %2845 = vmatprep.mubr.bf16.mxu0 %v8521_v49 }
 0x507   :  { %2846 = vmatmul.mubr.bf16.gmra.mrb[28].mxu0 %v8524_v45 }
 0x508   :  { %2853 = vmatprep.mubr.bf16.mxu0 %v8527_v51 }
 0x50f   :  { %2854 = vmatmul.mubr.bf16.gmra.mrb[32].mxu0 %v8530_v55 }
 0x510   :  { %2861 = vmatprep.mubr.bf16.mxu0 %v8533_v50 }
 0x517   :  { %2862 = vmatmul.mubr.bf16.gmra.mrb[36].mxu0 %v8536_v56 }
 0x518   :  { %2869 = vmatprep.mubr.bf16.mxu0 %v8539_v54 }
 0x51f   :  { %2870 = vmatmul.mubr.bf16.gmra.mrb[40].mxu0 %v8542_v8 }
 0x520   :  { %2877 = vmatprep.mubr.bf16.mxu0 %v8545_v61 }
 0x527   :  { %2878 = vmatmul.mubr.bf16.gmra.mrb[44].mxu0 %v8548_v63 }
 0x528   :  { %2885 = vmatprep.mubr.bf16.mxu0 %v8551_v59 }
 0x52f   :  { %2886 = vmatmul.mubr.bf16.gmra.mrb[48].mxu0 %v8554_v1 }
 0x530   :  { %2893 = vmatprep.mubr.bf16.mxu0 %v8557_v12 }
 0x537   :  { %2894 = vmatmul.mubr.bf16.gmra.mrb[52].mxu0 %v8560_v3 }
 0x538   :  { %2901 = vmatprep.mubr.bf16.mxu0 %v8563_v62 }
 0x53f   :  { %2902 = vmatmul.mubr.bf16.gmra.mrb[56].mxu0 %v8566_v5 }
 0x540   :  { %2909 = vmatprep.mubr.bf16.mxu0 %v8569_v4 }
 0x547   :  { %2910 = vmatmul.mubr.bf16.gmra.mrb[60].mxu0 %v8572_v14 }
 0x548   :  { %2917 = vmatprep.mubr.bf16.mxu0 %v8575_v10 }
 0x54f   :  { %2918 = vmatmul.mubr.bf16.gmra.mrb[64].mxu0 %v8578_v11 }
 0x550   :  { %2925 = vmatprep.mubr.bf16.mxu0 %v8581_v7 }
 0x557   :  { %2926 = vmatmul.mubr.bf16.gmra.mrb[68].mxu0 %v8584_v18 }
 0x558   :  { %2966 = vmatprep.mubr.bf16.mxu0 %v8587_v15 }
 0x55f   :  { %2967 = vmatmul.mubr.bf16.vlgmr.msra.gmra.mrb[200].mxu0 %v8590_v13 }
 0x560   :  { %2974 = vmatprep.mubr.bf16.mxu0 %v8593_v60 }
 0x567   :  { %2975 = vmatmul.mubr.bf16.gmra.mrb[204].mxu0 %v8596_v20 }
 0x568   :  { %2982 = vmatprep.mubr.bf16.mxu0 %v8599_v17 }
 0x56f   :  { %2983 = vmatmul.mubr.bf16.gmra.mrb[208].mxu0 %v8602_v21 }
 0x570   :  { %2990 = vmatprep.mubr.bf16.mxu0 %v8605_v28 }
 0x577   :  { %2991 = vmatmul.mubr.bf16.gmra.mrb[212].mxu0 %v8608_v24 }
 0x578   :  { %2998 = vmatprep.mubr.bf16.mxu0 %v8611_v23 }
 0x57f   :  { %2999 = vmatmul.mubr.bf16.gmra.mrb[216].mxu0 %v8614_v25 }
 0x580   :  { %3006 = vmatprep.mubr.bf16.mxu0 %v8617_v27 }
 0x587   :  { %3007 = vmatmul.mubr.bf16.gmra.mrb[220].mxu0 %v8620_v26 }
 0x588   :  { %3014 = vmatprep.mubr.bf16.mxu0 %v8623_v47 }
 0x58f   :  { %3015 = vmatmul.mubr.bf16.gmra.mrb[224].mxu0 %v8626_v31 }
 0x590   :  { %3022 = vmatprep.mubr.bf16.mxu0 %v8629_v57 }
 0x597   :  { %3023 = vmatmul.mubr.bf16.gmra.mrb[228].mxu0 %v8632_v36  ;;  %v8753_v36 = vld [vmem:[#allocation5 + $0x368] ss:$16 sps:$4 sm:$0xff]  }
 0x598   :  { %3030 = vmatprep.mubr.bf16.mxu0 %v8635_v9  ;;  %9787 = vst [vmem:[#allocation72_spill] sm:$0xff] %v8753_v36 }
 0x59f   :  { %3031 = vmatmul.mubr.bf16.gmra.mrb[232].mxu0 %v8638_v32 }
 0x5a0   :  { %3038 = vmatprep.mubr.bf16.mxu0 %v8641_v40  ;;  %v8672_v40 = vld [vmem:[#allocation5 + $0x1cc] ss:$16 sps:$4 sm:$0xff]  }
 0x5a1   :  { %9760 = vst [vmem:[#allocation45_spill] sm:$0xff] %v8672_v40 }
 0x5a7   :  { %3039 = vmatmul.mubr.bf16.gmra.mrb[236].mxu0 %v8644_v6  ;;  %v9756_v6 = vmov 0  }
 0x5a8   :  { %3046 = vmatprep.mubr.bf16.mxu0 %v8647_v53  ;;  %v7275_v53 = vld [vmem:[#allocation10 + $0x38] sm:$0xff]  }
 0x5a9   :  { %6487 = vmatprep.subr.bf16.mxu1 %v7275_v53 }
 0x5aa   :  { %6488 = vmatpush3.bf16.msra.mxu1 %v7275_v53  ;;  %v8678_v53 = vld [vmem:[#allocation5 + $0x1ec] ss:$16 sps:$4 sm:$0xff]  }
 0x5ab   :  { %3640 = vmatprep.subr.bf16.mxu1 %v9756_v6  ;;  %9762 = vst [vmem:[#allocation47_spill] sm:$0xff] %v8678_v53 }
 0x5af   :  { %3047 = vmatmul.mubr.bf16.gmra.mrb[240].mxu0 %v8650_v58  ;;  %v8663_v58 = vld [vmem:[#allocation5 + $0x188] ss:$16 sps:$4 sm:$0xff]  }
 0x5b0   :  { %3054 = vmatprep.mubr.bf16.mxu0 %v8653_v16  ;;  %9757 = vst [vmem:[#allocation42_spill] sm:$0xff] %v8663_v58  ;;  %v8666_v16 = vld [vmem:[#allocation5 + $0x1ac] ss:$16 sps:$4 sm:$0xff]  }
 0x5b1   :  { %9758 = vst [vmem:[#allocation43_spill] sm:$0xff] %v8666_v16 }
 0x5b7   :  { %3055 = vmatmul.mubr.bf16.gmra.mrb[244].mxu0 %v8656_v35  ;;  %v8669_v35 = vld [vmem:[#allocation5 + $0x1a8] ss:$16 sps:$4 sm:$0xff]  }
 0x5b8   :  { %3062 = vmatprep.mubr.bf16.mxu0 %v8659_v48  ;;  %9759 = vst [vmem:[#allocation44_spill] sm:$0xff] %v8669_v35 }
 0x5bf   :  { %3063 = vmatmul.mubr.bf16.gmra.mrb[248].mxu0 %v8663_v58  ;;  %v8681_v58 = vld [vmem:[#allocation5 + $0x1e8] ss:$16 sps:$4 sm:$0xff]  }
 0x5c0   :  { %3070 = vmatprep.mubr.bf16.mxu0 %v8666_v16  ;;  %9763 = vst [vmem:[#allocation48_spill] sm:$0xff] %v8681_v58  ;;  %v8684_v16 = vld [vmem:[#allocation5 + $0x20c] ss:$16 sps:$4 sm:$0xff]  }
 0x5c1   :  { %9764 = vst [vmem:[#allocation49_spill] sm:$0xff] %v8684_v16 }
 0x5c7   :  { %3071 = vmatmul.mubr.bf16.gmra.mrb[252].mxu0 %v8669_v35  ;;  %v8687_v35 = vld [vmem:[#allocation5 + $0x208] ss:$16 sps:$4 sm:$0xff]  }
 0x5c8   :  { %3078 = vmatprep.mubr.bf16.mxu0 %v8672_v40  ;;  %9765 = vst [vmem:[#allocation50_spill] sm:$0xff] %v8687_v35  ;;  %v8690_v40 = vld [vmem:[#allocation5 + $0x22c] ss:$16 sps:$4 sm:$0xff]  }
 0x5c9   :  { %9766 = vst [vmem:[#allocation51_spill] sm:$0xff] %v8690_v40 }
 0x5cf   :  { %3079 = vmatmul.mubr.bf16.gmra.mrb[0].mxu0 %v8675_v38  ;;  %v8693_v38 = vld [vmem:[#allocation5 + $0x228] ss:$16 sps:$4 sm:$0xff]  }
 0x5d0   :  { %3086 = vmatprep.mubr.bf16.mxu0 %v8678_v53  ;;  %9767 = vst [vmem:[#allocation52_spill] sm:$0xff] %v8693_v38  ;;  %v8696_v53 = vld [vmem:[#allocation5 + $0x24c] ss:$16 sps:$4 sm:$0xff]  }
 0x5d1   :  { %9768 = vst [vmem:[#allocation53_spill] sm:$0xff] %v8696_v53 }
 0x5d7   :  { %3087 = vmatmul.mubr.bf16.gmra.mrb[4].mxu0 %v8681_v58  ;;  %v8699_v58 = vld [vmem:[#allocation5 + $0x248] ss:$16 sps:$4 sm:$0xff]  }
 0x5d8   :  { %3094 = vmatprep.mubr.bf16.mxu0 %v8684_v16  ;;  %9769 = vst [vmem:[#allocation54_spill] sm:$0xff] %v8699_v58  ;;  %v8702_v16 = vld [vmem:[#allocation5 + $0x26c] ss:$16 sps:$4 sm:$0xff]  }
 0x5d9   :  { %9770 = vst [vmem:[#allocation55_spill] sm:$0xff] %v8702_v16 }
 0x5df   :  { %3095 = vmatmul.mubr.bf16.gmra.mrb[8].mxu0 %v8687_v35  ;;  %v8705_v35 = vld [vmem:[#allocation5 + $0x268] ss:$16 sps:$4 sm:$0xff]  }
 0x5e0   :  { %3102 = vmatprep.mubr.bf16.mxu0 %v8690_v40  ;;  %9771 = vst [vmem:[#allocation56_spill] sm:$0xff] %v8705_v35  ;;  %v8708_v40 = vld [vmem:[#allocation5 + $0x28c] ss:$16 sps:$4 sm:$0xff]  }
 0x5e1   :  { %9772 = vst [vmem:[#allocation57_spill] sm:$0xff] %v8708_v40 }
 0x5e7   :  { %3103 = vmatmul.mubr.bf16.gmra.mrb[12].mxu0 %v8693_v38  ;;  %v8711_v38 = vld [vmem:[#allocation5 + $0x288] ss:$16 sps:$4 sm:$0xff]  }
 0x5e8   :  { %3110 = vmatprep.mubr.bf16.mxu0 %v8696_v53  ;;  %9773 = vst [vmem:[#allocation58_spill] sm:$0xff] %v8711_v38  ;;  %v8714_v53 = vld [vmem:[#allocation5 + $0x2ac] ss:$16 sps:$4 sm:$0xff]  }
 0x5e9   :  { %9774 = vst [vmem:[#allocation59_spill] sm:$0xff] %v8714_v53 }
 0x5ef   :  { %3111 = vmatmul.mubr.bf16.gmra.mrb[16].mxu0 %v8699_v58  ;;  %v8717_v58 = vld [vmem:[#allocation5 + $0x2a8] ss:$16 sps:$4 sm:$0xff]  }
 0x5f0   :  { %3118 = vmatprep.mubr.bf16.mxu0 %v8702_v16  ;;  %9775 = vst [vmem:[#allocation60_spill] sm:$0xff] %v8717_v58  ;;  %v8720_v16 = vld [vmem:[#allocation5 + $0x2cc] ss:$16 sps:$4 sm:$0xff]  }
 0x5f1   :  { %9776 = vst [vmem:[#allocation61_spill] sm:$0xff] %v8720_v16 }
 0x5f7   :  { %3119 = vmatmul.mubr.bf16.gmra.mrb[20].mxu0 %v8705_v35  ;;  %v8723_v35 = vld [vmem:[#allocation5 + $0x2c8] ss:$16 sps:$4 sm:$0xff]  }
 0x5f8   :  { %3126 = vmatprep.mubr.bf16.mxu0 %v8708_v40  ;;  %9777 = vst [vmem:[#allocation62_spill] sm:$0xff] %v8723_v35  ;;  %v8726_v40 = vld [vmem:[#allocation5 + $0x2ec] ss:$16 sps:$4 sm:$0xff]  }
 0x5f9   :  { %9778 = vst [vmem:[#allocation63_spill] sm:$0xff] %v8726_v40 }
 0x5ff   :  { %3127 = vmatmul.mubr.bf16.gmra.mrb[24].mxu0 %v8711_v38  ;;  %v8729_v38 = vld [vmem:[#allocation5 + $0x2e8] ss:$16 sps:$4 sm:$0xff]  }
 0x600   :  { %3134 = vmatprep.mubr.bf16.mxu0 %v8714_v53  ;;  %9779 = vst [vmem:[#allocation64_spill] sm:$0xff] %v8729_v38  ;;  %v8732_v53 = vld [vmem:[#allocation5 + $0x30c] ss:$16 sps:$4 sm:$0xff]  }
 0x601   :  { %9780 = vst [vmem:[#allocation65_spill] sm:$0xff] %v8732_v53 }
 0x607   :  { %3135 = vmatmul.mubr.bf16.gmra.mrb[28].mxu0 %v8717_v58  ;;  %v8735_v58 = vld [vmem:[#allocation5 + $0x308] ss:$16 sps:$4 sm:$0xff]  }
 0x608   :  { %3142 = vmatprep.mubr.bf16.mxu0 %v8720_v16  ;;  %9781 = vst [vmem:[#allocation66_spill] sm:$0xff] %v8735_v58  ;;  %v8738_v16 = vld [vmem:[#allocation5 + $0x32c] ss:$16 sps:$4 sm:$0xff]  }
 0x609   :  { %9782 = vst [vmem:[#allocation67_spill] sm:$0xff] %v8738_v16 }
 0x60f   :  { %3143 = vmatmul.mubr.bf16.gmra.mrb[32].mxu0 %v8723_v35  ;;  %v8741_v35 = vld [vmem:[#allocation5 + $0x328] ss:$16 sps:$4 sm:$0xff]  }
 0x610   :  { %3150 = vmatprep.mubr.bf16.mxu0 %v8726_v40  ;;  %9783 = vst [vmem:[#allocation68_spill] sm:$0xff] %v8741_v35  ;;  %v8744_v40 = vld [vmem:[#allocation5 + $0x34c] ss:$16 sps:$4 sm:$0xff]  }
 0x611   :  { %9784 = vst [vmem:[#allocation69_spill] sm:$0xff] %v8744_v40 }
 0x617   :  { %3151 = vmatmul.mubr.bf16.gmra.mrb[36].mxu0 %v8729_v38  ;;  %v8747_v38 = vld [vmem:[#allocation5 + $0x348] ss:$16 sps:$4 sm:$0xff]  }
 0x618   :  { %3158 = vmatprep.mubr.bf16.mxu0 %v8732_v53  ;;  %9785 = vst [vmem:[#allocation70_spill] sm:$0xff] %v8747_v38  ;;  %v8750_v53 = vld [vmem:[#allocation5 + $0x36c] ss:$16 sps:$4 sm:$0xff]  }
 0x619   :  { %9786 = vst [vmem:[#allocation71_spill] sm:$0xff] %v8750_v53 }
 0x61f   :  { %3159 = vmatmul.mubr.bf16.gmra.mrb[40].mxu0 %v8735_v58 }
 0x620   :  { %3166 = vmatprep.mubr.bf16.mxu0 %v8738_v16 }
 0x627   :  { %3167 = vmatmul.mubr.bf16.gmra.mrb[44].mxu0 %v8741_v35  ;;  %v8756_v35 = vld [vmem:[#allocation5 + $0x38c] ss:$16 sps:$4 sm:$0xff]  }
 0x628   :  { %3174 = vmatprep.mubr.bf16.mxu0 %v8744_v40  ;;  %9788 = vst [vmem:[#allocation73_spill] sm:$0xff] %v8756_v35 }
 0x62f   :  { %3175 = vmatmul.mubr.bf16.gmra.mrb[48].mxu0 %v8747_v38 }
 0x630   :  { %3182 = vmatprep.mubr.bf16.mxu0 %v8750_v53  ;;  %v8759_v53 = vld [vmem:[#allocation5 + $0x388] ss:$16 sps:$4 sm:$0xff]  }
 0x631   :  { %9789 = vst [vmem:[#allocation74_spill] sm:$0xff] %v8759_v53 }
 0x632   :  { %v2968_v58 = vpop.f32.mrb[200].mxu0 }
 0x633   :  { %v2970_v48 = vpop.f32.mrb[201].mxu0 }
 0x634   :  { %v2971_v32 = vpop.f32.mrb[202].mxu0 }
 0x635   :  { %v3223_v16 = vpack.c.bf16 %v2971_v32, %v2968_v58  ;;  %v2973_v9 = vpop.f32.mrb[203].mxu0 }
 0x636   :  { %v8762_v9 = vld [vmem:[#allocation5 + $0x3ac] ss:$16 sps:$4 sm:$0xff]  }
 0x637   :  { %3183 = vmatmul.mubr.bf16.gmra.mrb[52].mxu0 %v8753_v36  ;;  %6489 = vmatprep.mubr.bf16.mxu1 %v3223_v16  ;;  %9790 = vst [vmem:[#allocation75_spill] sm:$0xff] %v8762_v9 }
 0x638   :  { %3190 = vmatprep.mubr.bf16.mxu0 %v8756_v35  ;;  %v8765_v35 = vld [vmem:[#allocation5 + $0x3a8] ss:$16 sps:$4 sm:$0xff]  }
 0x639   :  { %9791 = vst [vmem:[#allocation76_spill] sm:$0xff] %v8765_v35 }
 0x63a   :  { %v2976_v40 = vpop.f32.mrb[204].mxu0 }
 0x63b   :  { %v2978_v38 = vpop.f32.mrb[205].mxu0 }
 0x63c   :  { %v2979_v57 = vpop.f32.mrb[206].mxu0 }
 0x63d   :  { %v3224_v31 = vpack.c.bf16 %v2979_v57, %v2976_v40  ;;  %v2981_v47 = vpop.f32.mrb[207].mxu0 }
 0x63e   :  { %v8768_v47 = vld [vmem:[#allocation5 + $0x3cc] ss:$16 sps:$4 sm:$0xff]  }
 0x63f   :  { %3191 = vmatmul.mubr.bf16.gmra.mrb[56].mxu0 %v8759_v53  ;;  %6490 = vmatmul.mubr.bf16.vlgmr.msra.gmra.mrb[128].mxu1 %v3224_v31  ;;  %9792 = vst [vmem:[#allocation77_spill] sm:$0xff] %v8768_v47 }
 0x640   :  { %3198 = vmatprep.mubr.bf16.mxu0 %v8762_v9  ;;  %v8771_v9 = vld [vmem:[#allocation5 + $0x3c8] ss:$16 sps:$4 sm:$0xff]  }
 0x641   :  { %9793 = vst [vmem:[#allocation78_spill] sm:$0xff] %v8771_v9 }
 0x642   :  { %v2984_v32 = vpop.f32.mrb[208].mxu0 }
 0x643   :  { %v2986_v58 = vpop.f32.mrb[209].mxu0 }
 0x644   :  { %v2987_v16 = vpop.f32.mrb[210].mxu0 }
 0x645   :  { %v3225_v48 = vpack.c.bf16 %v2987_v16, %v2984_v32  ;;  %v2989_v36 = vpop.f32.mrb[211].mxu0 }
 0x646   :  { %v8774_v36 = vld [vmem:[#allocation5 + $0x3ec] ss:$16 sps:$4 sm:$0xff]  }
 0x647   :  { %3199 = vmatmul.mubr.bf16.gmra.mrb[60].mxu0 %v8765_v35  ;;  %6493 = vmatprep.mubr.bf16.mxu1 %v3225_v48  ;;  %9794 = vst [vmem:[#allocation79_spill] sm:$0xff] %v8774_v36 }
 0x648   :  { %3206 = vmatprep.mubr.bf16.mxu0 %v8768_v47  ;;  %v8777_v47 = vld [vmem:[#allocation5 + $0x3e8] ss:$16 sps:$4 sm:$0xff]  }
 0x649   :  { %9795 = vst [vmem:[#allocation80_spill] sm:$0xff] %v8777_v47 }
 0x64a   :  { %v2992_v57 = vpop.f32.mrb[212].mxu0 }
 0x64b   :  { %v2994_v31 = vpop.f32.mrb[213].mxu0 }
 0x64c   :  { %v2995_v40 = vpop.f32.mrb[214].mxu0 }
 0x64d   :  { %v3226_v38 = vpack.c.bf16 %v2995_v40, %v2992_v57  ;;  %v2997_v53 = vpop.f32.mrb[215].mxu0 }
 0x64f   :  { %3207 = vmatmul.mubr.bf16.gmra.mrb[64].mxu0 %v8771_v9  ;;  %6494 = vmatmul.mubr.bf16.gmra.mrb[132].mxu1 %v3226_v38 }
 0x650   :  { %3214 = vmatprep.mubr.bf16.mxu0 %v8774_v36 }
 0x652   :  { %v3000_v32 = vpop.f32.mrb[216].mxu0 }
 0x653   :  { %v3002_v58 = vpop.f32.mrb[217].mxu0 }
 0x654   :  { %v3003_v16 = vpop.f32.mrb[218].mxu0 }
 0x655   :  { %v3227_v48 = vpack.c.bf16 %v3003_v16, %v3000_v32  ;;  %v3005_v35 = vpop.f32.mrb[219].mxu0 }
 0x657   :  { %3215 = vmatmul.mubr.bf16.gmra.mrb[68].mxu0 %v8777_v47  ;;  %6497 = vmatprep.mubr.bf16.mxu1 %v3227_v48 }
 0x65a   :  { %v3008_v53 = vpop.f32.mrb[220].mxu0 }
 0x65b   :  { %v3010_v57 = vpop.f32.mrb[221].mxu0 }
 0x65c   :  { %v3011_v31 = vpop.f32.mrb[222].mxu0 }
 0x65d   :  { %v3228_v40 = vpack.c.bf16 %v3011_v31, %v3008_v53  ;;  %v3013_v9 = vpop.f32.mrb[223].mxu0 }
 0x65f   :  { %6498 = vmatmul.mubr.bf16.gmra.mrb[136].mxu1 %v3228_v40 }
 0x662   :  { %v3016_v38 = vpop.f32.mrb[224].mxu0 }
 0x663   :  { %v3018_v26 = vpop.f32.mrb[225].mxu0 }
 0x664   :  { %v3019_v27 = vpop.f32.mrb[226].mxu0 }
 0x665   :  { %v3229_v36 = vpack.c.bf16 %v3019_v27, %v3016_v38  ;;  %v3021_v25 = vpop.f32.mrb[227].mxu0 }
 0x667   :  { %6501 = vmatprep.mubr.bf16.mxu1 %v3229_v36 }
 0x66a   :  { %v3024_v58 = vpop.f32.mrb[228].mxu0 }
 0x66b   :  { %v3026_v32 = vpop.f32.mrb[229].mxu0 }
 0x66c   :  { %v3027_v35 = vpop.f32.mrb[230].mxu0 }
 0x66d   :  { %v3230_v16 = vpack.c.bf16 %v3027_v35, %v3024_v58  ;;  %v3029_v23 = vpop.f32.mrb[231].mxu0 }
 0x66f   :  { %6502 = vmatmul.mubr.bf16.gmra.mrb[140].mxu1 %v3230_v16 }
 0x672   :  { %v3032_v47 = vpop.f32.mrb[232].mxu0 }
 0x673   :  { %v3034_v48 = vpop.f32.mrb[233].mxu0 }
 0x674   :  { %v3035_v24 = vpop.f32.mrb[234].mxu0 }
 0x675   :  { %v3231_v57 = vpack.c.bf16 %v3035_v24, %v3032_v47  ;;  %v3037_v28 = vpop.f32.mrb[235].mxu0 }
 0x677   :  { %6505 = vmatprep.mubr.bf16.mxu1 %v3231_v57 }
 0x67a   :  { %v3040_v9 = vpop.f32.mrb[236].mxu0 }
 0x67b   :  { %v3042_v53 = vpop.f32.mrb[237].mxu0 }
 0x67c   :  { %v3043_v31 = vpop.f32.mrb[238].mxu0 }
 0x67d   :  { %v3232_v26 = vpack.c.bf16 %v3043_v31, %v3040_v9  ;;  %v3045_v40 = vpop.f32.mrb[239].mxu0 }
 0x67f   :  { %6506 = vmatmul.mubr.bf16.gmra.mrb[144].mxu1 %v3232_v26 }
 0x682   :  { %v3048_v25 = vpop.f32.mrb[240].mxu0 }
 0x683   :  { %v3050_v27 = vpop.f32.mrb[241].mxu0 }
 0x684   :  { %v3051_v36 = vpop.f32.mrb[242].mxu0 }
 0x685   :  { %v3233_v38 = vpack.c.bf16 %v3051_v36, %v3048_v25  ;;  %v3053_v32 = vpop.f32.mrb[243].mxu0 }
 0x687   :  { %6509 = vmatprep.mubr.bf16.mxu1 %v3233_v38 }
 0x68a   :  { %v3056_v23 = vpop.f32.mrb[244].mxu0 }
 0x68b   :  { %v3058_v58 = vpop.f32.mrb[245].mxu0 }
 0x68c   :  { %v3059_v35 = vpop.f32.mrb[246].mxu0 }
 0x68d   :  { %v3234_v16 = vpack.c.bf16 %v3059_v35, %v3056_v23  ;;  %v3061_v48 = vpop.f32.mrb[247].mxu0 }
 0x68f   :  { %6510 = vmatmul.mubr.bf16.gmra.mrb[148].mxu1 %v3234_v16 }
 0x692   :  { %v3064_v28 = vpop.f32.mrb[248].mxu0 }
 0x693   :  { %v3066_v24 = vpop.f32.mrb[249].mxu0 }
 0x694   :  { %v3067_v47 = vpop.f32.mrb[250].mxu0 }
 0x695   :  { %v3235_v57 = vpack.c.bf16 %v3067_v47, %v3064_v28  ;;  %v3069_v53 = vpop.f32.mrb[251].mxu0 }
 0x697   :  { %6513 = vmatprep.mubr.bf16.mxu1 %v3235_v57 }
 0x69a   :  { %v3072_v9 = vpop.f32.mrb[252].mxu0 }
 0x69b   :  { %v3074_v31 = vpop.f32.mrb[253].mxu0 }
 0x69c   :  { %v3075_v26 = vpop.f32.mrb[254].mxu0 }
 0x69d   :  { %v3236_v40 = vpack.c.bf16 %v3075_v26, %v3072_v9  ;;  %v3077_v27 = vpop.f32.mrb[255].mxu0 }
 0x69f   :  { %6514 = vmatmul.mubr.bf16.gmra.mrb[152].mxu1 %v3236_v40 }
 0x6a2   :  { %v3080_v25 = vpop.f32.mrb[0].mxu0 }
 0x6a3   :  { %v3082_v36 = vpop.f32.mrb[1].mxu0 }
 0x6a4   :  { %v3083_v38 = vpop.f32.mrb[2].mxu0 }
 0x6a5   :  { %v3237_v32 = vpack.c.bf16 %v3083_v38, %v3080_v25  ;;  %v3085_v58 = vpop.f32.mrb[3].mxu0 }
 0x6a7   :  { %6517 = vmatprep.mubr.bf16.mxu1 %v3237_v32 }
 0x6aa   :  { %v3088_v23 = vpop.f32.mrb[4].mxu0 }
 0x6ab   :  { %v3090_v35 = vpop.f32.mrb[5].mxu0 }
 0x6ac   :  { %v3091_v16 = vpop.f32.mrb[6].mxu0 }
 0x6ad   :  { %v3238_v48 = vpack.c.bf16 %v3091_v16, %v3088_v23  ;;  %v3093_v24 = vpop.f32.mrb[7].mxu0 }
 0x6af   :  { %6518 = vmatmul.mubr.bf16.gmra.mrb[156].mxu1 %v3238_v48 }
 0x6b2   :  { %v3096_v28 = vpop.f32.mrb[8].mxu0 }
 0x6b3   :  { %v3098_v47 = vpop.f32.mrb[9].mxu0 }
 0x6b4   :  { %v3099_v57 = vpop.f32.mrb[10].mxu0 }
 0x6b5   :  { %v3239_v53 = vpack.c.bf16 %v3099_v57, %v3096_v28  ;;  %v3101_v31 = vpop.f32.mrb[11].mxu0 }
 0x6b7   :  { %6521 = vmatprep.mubr.bf16.mxu1 %v3239_v53 }
 0x6ba   :  { %v3104_v9 = vpop.f32.mrb[12].mxu0 }
 0x6bb   :  { %v3106_v26 = vpop.f32.mrb[13].mxu0 }
 0x6bc   :  { %v3107_v40 = vpop.f32.mrb[14].mxu0 }
 0x6bd   :  { %v3240_v27 = vpack.c.bf16 %v3107_v40, %v3104_v9  ;;  %v3109_v36 = vpop.f32.mrb[15].mxu0 }
 0x6bf   :  { %6522 = vmatmul.mubr.bf16.gmra.mrb[160].mxu1 %v3240_v27 }
 0x6c2   :  { %v3112_v25 = vpop.f32.mrb[16].mxu0 }
 0x6c3   :  { %v3114_v38 = vpop.f32.mrb[17].mxu0 }
 0x6c4   :  { %v3115_v32 = vpop.f32.mrb[18].mxu0 }
 0x6c5   :  { %v3241_v58 = vpack.c.bf16 %v3115_v32, %v3112_v25  ;;  %v3117_v35 = vpop.f32.mrb[19].mxu0 }
 0x6c7   :  { %6525 = vmatprep.mubr.bf16.mxu1 %v3241_v58 }
 0x6ca   :  { %v3120_v23 = vpop.f32.mrb[20].mxu0 }
 0x6cb   :  { %v3122_v16 = vpop.f32.mrb[21].mxu0 }
 0x6cc   :  { %v3123_v48 = vpop.f32.mrb[22].mxu0 }
 0x6cd   :  { %v3242_v24 = vpack.c.bf16 %v3123_v48, %v3120_v23  ;;  %v3125_v47 = vpop.f32.mrb[23].mxu0 }
 0x6cf   :  { %6526 = vmatmul.mubr.bf16.gmra.mrb[164].mxu1 %v3242_v24 }
 0x6d2   :  { %v3128_v28 = vpop.f32.mrb[24].mxu0 }
 0x6d3   :  { %v3130_v57 = vpop.f32.mrb[25].mxu0 }
 0x6d4   :  { %v3131_v53 = vpop.f32.mrb[26].mxu0 }
 0x6d5   :  { %v3243_v31 = vpack.c.bf16 %v3131_v53, %v3128_v28  ;;  %v3133_v26 = vpop.f32.mrb[27].mxu0 }
 0x6d7   :  { %6529 = vmatprep.mubr.bf16.mxu1 %v3243_v31 }
 0x6da   :  { %v3136_v9 = vpop.f32.mrb[28].mxu0 }
 0x6db   :  { %v3138_v40 = vpop.f32.mrb[29].mxu0 }
 0x6dc   :  { %v3139_v27 = vpop.f32.mrb[30].mxu0 }
 0x6dd   :  { %v3244_v36 = vpack.c.bf16 %v3139_v27, %v3136_v9  ;;  %v3141_v38 = vpop.f32.mrb[31].mxu0 }
 0x6df   :  { %6530 = vmatmul.mubr.bf16.gmra.mrb[168].mxu1 %v3244_v36 }
 0x6e2   :  { %v3144_v25 = vpop.f32.mrb[32].mxu0 }
 0x6e3   :  { %v3146_v32 = vpop.f32.mrb[33].mxu0 }
 0x6e4   :  { %v3147_v58 = vpop.f32.mrb[34].mxu0 }
 0x6e5   :  { %v3245_v35 = vpack.c.bf16 %v3147_v58, %v3144_v25  ;;  %v3149_v16 = vpop.f32.mrb[35].mxu0 }
 0x6e7   :  { %6533 = vmatprep.mubr.bf16.mxu1 %v3245_v35 }
 0x6ea   :  { %v3152_v23 = vpop.f32.mrb[36].mxu0 }
 0x6eb   :  { %v3154_v48 = vpop.f32.mrb[37].mxu0 }
 0x6ec   :  { %v3155_v24 = vpop.f32.mrb[38].mxu0 }
 0x6ed   :  { %v3246_v47 = vpack.c.bf16 %v3155_v24, %v3152_v23  ;;  %v3157_v57 = vpop.f32.mrb[39].mxu0 }
 0x6ef   :  { %6534 = vmatmul.mubr.bf16.gmra.mrb[172].mxu1 %v3246_v47 }
 0x6f2   :  { %v3160_v28 = vpop.f32.mrb[40].mxu0 }
 0x6f3   :  { %v3162_v53 = vpop.f32.mrb[41].mxu0 }
 0x6f4   :  { %v3163_v31 = vpop.f32.mrb[42].mxu0 }
 0x6f5   :  { %v3247_v26 = vpack.c.bf16 %v3163_v31, %v3160_v28  ;;  %v3165_v40 = vpop.f32.mrb[43].mxu0 }
 0x6f7   :  { %6537 = vmatprep.mubr.bf16.mxu1 %v3247_v26 }
 0x6fa   :  { %v3168_v9 = vpop.f32.mrb[44].mxu0 }
 0x6fb   :  { %v3170_v27 = vpop.f32.mrb[45].mxu0 }
 0x6fc   :  { %v3171_v36 = vpop.f32.mrb[46].mxu0 }
 0x6fd   :  { %v3248_v38 = vpack.c.bf16 %v3171_v36, %v3168_v9  ;;  %v3173_v32 = vpop.f32.mrb[47].mxu0 }
 0x6ff   :  { %6538 = vmatmul.mubr.bf16.gmra.mrb[176].mxu1 %v3248_v38 }
 0x702   :  { %v3176_v25 = vpop.f32.mrb[48].mxu0 }
 0x703   :  { %v3178_v58 = vpop.f32.mrb[49].mxu0 }
 0x704   :  { %v3179_v35 = vpop.f32.mrb[50].mxu0 }
 0x705   :  { %v3249_v16 = vpack.c.bf16 %v3179_v35, %v3176_v25  ;;  %v3181_v48 = vpop.f32.mrb[51].mxu0 }
 0x707   :  { %6541 = vmatprep.mubr.bf16.mxu1 %v3249_v16 }
 0x70a   :  { %v3184_v23 = vpop.f32.mrb[52].mxu0 }
 0x70b   :  { %v3186_v24 = vpop.f32.mrb[53].mxu0 }
 0x70c   :  { %v3187_v47 = vpop.f32.mrb[54].mxu0 }
 0x70d   :  { %v3250_v57 = vpack.c.bf16 %v3187_v47, %v3184_v23  ;;  %v3189_v53 = vpop.f32.mrb[55].mxu0 }
 0x70f   :  { %6542 = vmatmul.mubr.bf16.gmra.mrb[180].mxu1 %v3250_v57 }
 0x712   :  { %v3192_v28 = vpop.f32.mrb[56].mxu0  ;;  %v6491_v31 = vpop.f32.mrb[128].mxu1 }
 0x713   :  { %v3194_v26 = vpop.f32.mrb[57].mxu0  ;;  %v3353_v40 = vpop.f32.mrb[129].mxu1 }
 0x714   :  { %v3195_v27 = vpop.f32.mrb[58].mxu0  ;;  %v6492_v9 = vpop.f32.mrb[130].mxu1 }
 0x715   :  { %v3251_v36 = vpack.c.bf16 %v3195_v27, %v3192_v28  ;;  %v3609_v38 = vpack.c.bf16 %v6492_v9, %v6491_v31  ;;  %v3197_v32 = vpop.f32.mrb[59].mxu0  ;;  %v3356_v58 = vpop.f32.mrb[131].mxu1 }
 0x716   :  { %v3608_v21 = vpack.c.bf16 %v3356_v58, %v3353_v40 }
 0x717   :  { %6545 = vmatprep.mubr.bf16.mxu1 %v3251_v36 }
 0x718   :  { %3641 = vmatpush1.bf16.msra.mxu1 %v3608_v21 }
 0x719   :  { %3642 = vmatprep.subr.bf16.mxu1 %v9756_v6 }
 0x71a   :  { %v3200_v25 = vpop.f32.mrb[60].mxu0 }
 0x71b   :  { %v3202_v35 = vpop.f32.mrb[61].mxu0 }
 0x71c   :  { %v3203_v16 = vpop.f32.mrb[62].mxu0  ;;  %3643 = vmatpush1.bf16.msra.mxu1 %v3609_v38  ;;  %v7924_v35 = vld [vmem:[#allocation5 + $0x4] ss:$16 sps:$4 sm:$0xff]  }
 0x71d   :  { %v3252_v48 = vpack.c.bf16 %v3203_v16, %v3200_v25  ;;  %v3205_v23 = vpop.f32.mrb[63].mxu0  ;;  %3644 = vmatprep.subr.bf16.mxu1 %v9756_v6 }
 0x71f   :  { %6546 = vmatmul.mubr.bf16.gmra.mrb[184].mxu1 %v3252_v48 }
 0x722   :  { %v3208_v24 = vpop.f32.mrb[64].mxu0  ;;  %v6495_v47 = vpop.f32.mrb[132].mxu1 }
 0x723   :  { %v3210_v57 = vpop.f32.mrb[65].mxu0  ;;  %v3369_v53 = vpop.f32.mrb[133].mxu1 }
 0x724   :  { %v3211_v28 = vpop.f32.mrb[66].mxu0  ;;  %v6496_v31 = vpop.f32.mrb[134].mxu1 }
 0x725   :  { %v3253_v26 = vpack.c.bf16 %v3211_v28, %v3208_v24  ;;  %v3611_v40 = vpack.c.bf16 %v6496_v31, %v6495_v47  ;;  %v3213_v21 = vpop.f32.mrb[67].mxu0  ;;  %v3372_v27 = vpop.f32.mrb[135].mxu1 }
 0x726   :  { %v3610_v9 = vpack.c.bf16 %v3372_v27, %v3369_v53 }
 0x727   :  { %6549 = vmatprep.mubr.bf16.mxu1 %v3253_v26 }
 0x728   :  { %3645 = vmatpush1.bf16.msra.mxu1 %v3610_v9 }
 0x729   :  { %3646 = vmatprep.subr.bf16.mxu1 %v9756_v6 }
 0x72a   :  { %v3216_v36 = vpop.f32.mrb[68].mxu0 }
 0x72b   :  { %v3218_v38 = vpop.f32.mrb[69].mxu0 }
 0x72c   :  { %v3219_v32 = vpop.f32.mrb[70].mxu0  ;;  %3647 = vmatpush1.bf16.msra.mxu1 %v3611_v40 }
 0x72d   :  { %v3254_v58 = vpack.c.bf16 %v3219_v32, %v3216_v36  ;;  %v3221_v25 = vpop.f32.mrb[71].mxu0  ;;  %3648 = vmatprep.subr.bf16.mxu1 %v9756_v6 }
 0x72f   :  { %6550 = vmatmul.mubr.bf16.gmra.mrb[188].mxu1 %v3254_v58 }
 0x730   :  { %3672 = vmatprep.mubr.bf16.mxu1 %v7924_v35 }
 0x732   :  { %v6499_v16 = vpop.f32.mrb[136].mxu1 }
 0x733   :  { %v3385_v48 = vpop.f32.mrb[137].mxu1 }
 0x734   :  { %v6500_v23 = vpop.f32.mrb[138].mxu1 }
 0x735   :  { %v3613_v24 = vpack.c.bf16 %v6500_v23, %v6499_v16  ;;  %v3388_v47 = vpop.f32.mrb[139].mxu1 }
 0x736   :  { %v3612_v57 = vpack.c.bf16 %v3388_v47, %v3385_v48 }
 0x738   :  { %3649 = vmatpush1.bf16.msra.mxu1 %v3612_v57 }
 0x739   :  { %3650 = vmatprep.subr.bf16.mxu1 %v9756_v6 }
 0x73c   :  { %3651 = vmatpush1.bf16.msra.mxu1 %v3613_v24 }
 0x73d   :  { %3652 = vmatprep.subr.bf16.mxu1 %v9756_v6 }
 0x742   :  { %v6503_v53 = vpop.f32.mrb[140].mxu1 }
 0x743   :  { %v3401_v28 = vpop.f32.mrb[141].mxu1 }
 0x744   :  { %v6504_v31 = vpop.f32.mrb[142].mxu1 }
 0x745   :  { %v3615_v26 = vpack.c.bf16 %v6504_v31, %v6503_v53  ;;  %v3404_v40 = vpop.f32.mrb[143].mxu1 }
 0x746   :  { %v3614_v21 = vpack.c.bf16 %v3404_v40, %v3401_v28 }
 0x748   :  { %3653 = vmatpush1.bf16.msra.mxu1 %v3614_v21 }
 0x749   :  { %3654 = vmatprep.subr.bf16.mxu1 %v9756_v6 }
 0x74c   :  { %3655 = vmatpush1.bf16.msra.mxu1 %v3615_v26 }
 0x74d   :  { %3656 = vmatprep.subr.bf16.mxu1 %v9756_v6 }
 0x752   :  { %v6507_v27 = vpop.f32.mrb[144].mxu1 }
 0x753   :  { %v3417_v9 = vpop.f32.mrb[145].mxu1 }
 0x754   :  { %v6508_v36 = vpop.f32.mrb[146].mxu1 }
 0x755   :  { %v3617_v38 = vpack.c.bf16 %v6508_v36, %v6507_v27  ;;  %v3420_v32 = vpop.f32.mrb[147].mxu1 }
 0x756   :  { %v3616_v58 = vpack.c.bf16 %v3420_v32, %v3417_v9  ;;  %v7925_v32 = vld [vmem:[#allocation5] ss:$16 sps:$4 sm:$0xff]  }
 0x758   :  { %3657 = vmatpush1.bf16.msra.mxu1 %v3616_v58  ;;  %v7926_v58 = vld [vmem:[#allocation5 + $0x24] ss:$16 sps:$4 sm:$0xff]  }
 0x759   :  { %3658 = vmatprep.subr.bf16.mxu1 %v9756_v6 }
 0x75c   :  { %3659 = vmatpush1.bf16.msra.mxu1 %v3617_v38 }
 0x75d   :  { %3660 = vmatprep.subr.bf16.mxu1 %v9756_v6 }
 0x762   :  { %v6511_v25 = vpop.f32.mrb[148].mxu1 }
 0x763   :  { %v3433_v35 = vpop.f32.mrb[149].mxu1 }
 0x764   :  { %v6512_v16 = vpop.f32.mrb[150].mxu1 }
 0x765   :  { %v3619_v48 = vpack.c.bf16 %v6512_v16, %v6511_v25  ;;  %v3436_v23 = vpop.f32.mrb[151].mxu1 }
 0x766   :  { %v3618_v24 = vpack.c.bf16 %v3436_v23, %v3433_v35 }
 0x768   :  { %3661 = vmatpush1.bf16.msra.mxu1 %v3618_v24 }
 0x769   :  { %3662 = vmatprep.subr.bf16.mxu1 %v9756_v6 }
 0x76c   :  { %3663 = vmatpush1.bf16.msra.mxu1 %v3619_v48 }
 0x76d   :  { %3664 = vmatprep.subr.bf16.mxu1 %v9756_v6 }
 0x772   :  { %v6515_v47 = vpop.f32.mrb[152].mxu1 }
 0x773   :  { %v3449_v57 = vpop.f32.mrb[153].mxu1 }
 0x774   :  { %v6516_v53 = vpop.f32.mrb[154].mxu1 }
 0x775   :  { %v3621_v28 = vpack.c.bf16 %v6516_v53, %v6515_v47  ;;  %v3452_v31 = vpop.f32.mrb[155].mxu1  ;;  %v7927_v47 = vld [vmem:[#allocation5 + $0x20] ss:$16 sps:$4 sm:$0xff]  }
 0x776   :  { %v3620_v26 = vpack.c.bf16 %v3452_v31, %v3449_v57  ;;  %v7928_v57 = vld [vmem:[#allocation5 + $0x44] ss:$16 sps:$4 sm:$0xff]   ;;  %v7929_v53 = vld [vmem:[#allocation5 + $0x40] ss:$16 sps:$4 sm:$0xff]  }
 0x778   :  { %3665 = vmatpush1.bf16.msra.mxu1 %v3620_v26 }
 0x779   :  { %3666 = vmatprep.subr.bf16.mxu1 %v9756_v6 }
 0x77c   :  { %3667 = vmatpush1.bf16.msra.mxu1 %v3621_v28  ;;  %v7930_v28 = vld [vmem:[#allocation5 + $0x64] ss:$16 sps:$4 sm:$0xff]  }
 0x77d   :  { %3668 = vmatprep.subr.bf16.mxu1 %v9756_v6 }
 0x782   :  { %v6519_v40 = vpop.f32.mrb[156].mxu1 }
 0x783   :  { %v3465_v21 = vpop.f32.mrb[157].mxu1 }
 0x784   :  { %v6520_v27 = vpop.f32.mrb[158].mxu1 }
 0x785   :  { %v3623_v9 = vpack.c.bf16 %v6520_v27, %v6519_v40  ;;  %v3468_v36 = vpop.f32.mrb[159].mxu1 }
 0x786   :  { %v3622_v38 = vpack.c.bf16 %v3468_v36, %v3465_v21  ;;  %v7931_v36 = vld [vmem:[#allocation5 + $0x60] ss:$16 sps:$4 sm:$0xff]  }
 0x788   :  { %3669 = vmatpush1.bf16.msra.mxu1 %v3622_v38  ;;  %v7932_v38 = vld [vmem:[#allocation5 + $0x84] ss:$16 sps:$4 sm:$0xff]  }
 0x789   :  { %3670 = vmatprep.subr.bf16.mxu1 %v9756_v6 }
 0x78c   :  { %3671 = vmatpush1.bf16.msra.mxu1 %v3623_v9 }
 0x78d   :  { %3929 = vmatprep.subr.bf16.mxu1 %v9756_v6 }
 0x78f   :  { %3673 = vmatmul.mubr.bf16.vlgmr.msra.gmra.mrb[192].mxu1 %v7925_v32  ;;  %v7933_v32 = vld [vmem:[#allocation5 + $0x80] ss:$16 sps:$4 sm:$0xff]  }
 0x790   :  { %3680 = vmatprep.mubr.bf16.mxu1 %v7926_v58  ;;  %v7934_v58 = vld [vmem:[#allocation5 + $0xa4] ss:$16 sps:$4 sm:$0xff]  }
 0x792   :  { %v6523_v25 = vpop.f32.mrb[160].mxu1 }
 0x793   :  { %v3481_v35 = vpop.f32.mrb[161].mxu1 }
 0x794   :  { %v6524_v16 = vpop.f32.mrb[162].mxu1 }
 0x795   :  { %v3625_v48 = vpack.c.bf16 %v6524_v16, %v6523_v25  ;;  %v3484_v23 = vpop.f32.mrb[163].mxu1 }
 0x796   :  { %v3624_v24 = vpack.c.bf16 %v3484_v23, %v3481_v35 }
 0x797   :  { %3681 = vmatmul.mubr.bf16.gmra.mrb[196].mxu1 %v7927_v47  ;;  %v7935_v47 = vld [vmem:[#allocation5 + $0xa0] ss:$16 sps:$4 sm:$0xff]  }
 0x798   :  { %3930 = vmatpush1.bf16.msra.mxu1 %v3624_v24  ;;  %3688 = vmatprep.mubr.bf16.mxu1 %v7928_v57  ;;  %v7936_v57 = vld [vmem:[#allocation5 + $0xc4] ss:$16 sps:$4 sm:$0xff]  }
 0x799   :  { %3931 = vmatprep.subr.bf16.mxu1 %v9756_v6 }
 0x79c   :  { %3932 = vmatpush1.bf16.msra.mxu1 %v3625_v48 }
 0x79d   :  { %3933 = vmatprep.subr.bf16.mxu1 %v9756_v6 }
 0x79f   :  { %3689 = vmatmul.mubr.bf16.gmra.mrb[200].mxu1 %v7929_v53  ;;  %v7937_v53 = vld [vmem:[#allocation5 + $0xc0] ss:$16 sps:$4 sm:$0xff]  }
 0x7a0   :  { %3696 = vmatprep.mubr.bf16.mxu1 %v7930_v28  ;;  %v7938_v28 = vld [vmem:[#allocation5 + $0xe4] ss:$16 sps:$4 sm:$0xff]  }
 0x7a2   :  { %v6527_v31 = vpop.f32.mrb[164].mxu1 }
 0x7a3   :  { %v3497_v26 = vpop.f32.mrb[165].mxu1 }
 0x7a4   :  { %v6528_v40 = vpop.f32.mrb[166].mxu1 }
 0x7a5   :  { %v3627_v21 = vpack.c.bf16 %v6528_v40, %v6527_v31  ;;  %v3500_v27 = vpop.f32.mrb[167].mxu1 }
 0x7a6   :  { %v3626_v9 = vpack.c.bf16 %v3500_v27, %v3497_v26 }
 0x7a7   :  { %3697 = vmatmul.mubr.bf16.gmra.mrb[204].mxu1 %v7931_v36  ;;  %v7939_v36 = vld [vmem:[#allocation5 + $0xe0] ss:$16 sps:$4 sm:$0xff]  }
 0x7a8   :  { %3934 = vmatpush1.bf16.msra.mxu1 %v3626_v9  ;;  %3704 = vmatprep.mubr.bf16.mxu1 %v7932_v38  ;;  %v7940_v38 = vld [vmem:[#allocation5 + $0x104] ss:$16 sps:$4 sm:$0xff]  }
 0x7a9   :  { %3935 = vmatprep.subr.bf16.mxu1 %v9756_v6 }
 0x7ac   :  { %3936 = vmatpush1.bf16.msra.mxu1 %v3627_v21 }
 0x7ad   :  { %3937 = vmatprep.subr.bf16.mxu1 %v9756_v6 }
 0x7af   :  { %3705 = vmatmul.mubr.bf16.gmra.mrb[208].mxu1 %v7933_v32  ;;  %v7941_v32 = vld [vmem:[#allocation5 + $0x100] ss:$16 sps:$4 sm:$0xff]  }
 0x7b0   :  { %3712 = vmatprep.mubr.bf16.mxu1 %v7934_v58  ;;  %v7942_v58 = vld [vmem:[#allocation5 + $0x124] ss:$16 sps:$4 sm:$0xff]  }
 0x7b2   :  { %v6531_v25 = vpop.f32.mrb[168].mxu1 }
 0x7b3   :  { %v3513_v35 = vpop.f32.mrb[169].mxu1 }
 0x7b4   :  { %v6532_v16 = vpop.f32.mrb[170].mxu1 }
 0x7b5   :  { %v3629_v48 = vpack.c.bf16 %v6532_v16, %v6531_v25  ;;  %v3516_v23 = vpop.f32.mrb[171].mxu1 }
 0x7b6   :  { %v3628_v24 = vpack.c.bf16 %v3516_v23, %v3513_v35 }
 0x7b7   :  { %3713 = vmatmul.mubr.bf16.gmra.mrb[212].mxu1 %v7935_v47  ;;  %v7943_v47 = vld [vmem:[#allocation5 + $0x120] ss:$16 sps:$4 sm:$0xff]  }
 0x7b8   :  { %3938 = vmatpush1.bf16.msra.mxu1 %v3628_v24  ;;  %3720 = vmatprep.mubr.bf16.mxu1 %v7936_v57  ;;  %v7944_v57 = vld [vmem:[#allocation5 + $0x144] ss:$16 sps:$4 sm:$0xff]  }
 0x7b9   :  { %3939 = vmatprep.subr.bf16.mxu1 %v9756_v6 }
 0x7bc   :  { %3940 = vmatpush1.bf16.msra.mxu1 %v3629_v48 }
 0x7bd   :  { %3941 = vmatprep.subr.bf16.mxu1 %v9756_v6 }
 0x7bf   :  { %3721 = vmatmul.mubr.bf16.gmra.mrb[216].mxu1 %v7937_v53  ;;  %v7945_v53 = vld [vmem:[#allocation5 + $0x140] ss:$16 sps:$4 sm:$0xff]  }
 0x7c0   :  { %3728 = vmatprep.mubr.bf16.mxu1 %v7938_v28  ;;  %v7946_v28 = vld [vmem:[#allocation5 + $0x164] ss:$16 sps:$4 sm:$0xff]  }
 0x7c2   :  { %v6535_v31 = vpop.f32.mrb[172].mxu1 }
 0x7c3   :  { %v3529_v26 = vpop.f32.mrb[173].mxu1 }
 0x7c4   :  { %v6536_v40 = vpop.f32.mrb[174].mxu1 }
 0x7c5   :  { %v3631_v21 = vpack.c.bf16 %v6536_v40, %v6535_v31  ;;  %v3532_v27 = vpop.f32.mrb[175].mxu1 }
 0x7c6   :  { %v3630_v9 = vpack.c.bf16 %v3532_v27, %v3529_v26 }
 0x7c7   :  { %3729 = vmatmul.mubr.bf16.gmra.mrb[220].mxu1 %v7939_v36  ;;  %v7947_v36 = vld [vmem:[#allocation5 + $0x160] ss:$16 sps:$4 sm:$0xff]  }
 0x7c8   :  { %3942 = vmatpush1.bf16.msra.mxu1 %v3630_v9  ;;  %3736 = vmatprep.mubr.bf16.mxu1 %v7940_v38  ;;  %v7948_v38 = vld [vmem:[#allocation5 + $0x184] ss:$16 sps:$4 sm:$0xff]  }
 0x7c9   :  { %3943 = vmatprep.subr.bf16.mxu1 %v9756_v6 }
 0x7cc   :  { %3944 = vmatpush1.bf16.msra.mxu1 %v3631_v21 }
 0x7cd   :  { %3945 = vmatprep.subr.bf16.mxu1 %v9756_v6 }
 0x7cf   :  { %3737 = vmatmul.mubr.bf16.gmra.mrb[224].mxu1 %v7941_v32  ;;  %v7949_v32 = vld [vmem:[#allocation5 + $0x180] ss:$16 sps:$4 sm:$0xff]  }
 0x7d0   :  { %3744 = vmatprep.mubr.bf16.mxu1 %v7942_v58 }
 0x7d2   :  { %v6539_v25 = vpop.f32.mrb[176].mxu1 }
 0x7d3   :  { %v3545_v35 = vpop.f32.mrb[177].mxu1 }
 0x7d4   :  { %v6540_v16 = vpop.f32.mrb[178].mxu1 }
 0x7d5   :  { %v3633_v48 = vpack.c.bf16 %v6540_v16, %v6539_v25  ;;  %v3548_v23 = vpop.f32.mrb[179].mxu1 }
 0x7d6   :  { %v3632_v24 = vpack.c.bf16 %v3548_v23, %v3545_v35 }
 0x7d7   :  { %3745 = vmatmul.mubr.bf16.gmra.mrb[228].mxu1 %v7943_v47 }
 0x7d8   :  { %3946 = vmatpush1.bf16.msra.mxu1 %v3632_v24  ;;  %3752 = vmatprep.mubr.bf16.mxu1 %v7944_v57  ;;  %v7276_v24 = vld [vmem:[#allocation11] sm:$0xff]  }
 0x7d9   :  { %3947 = vmatprep.subr.bf16.mxu1 %v9756_v6  ;;  %6553 = vmatprep.subr.bf16.mxu0 %v7276_v24 }
 0x7da   :  { %6554 = vmatpush3.bf16.msra.mxu0 %v7276_v24 }
 0x7dc   :  { %3948 = vmatpush1.bf16.msra.mxu1 %v3633_v48 }
 0x7dd   :  { %3949 = vmatprep.subr.bf16.mxu1 %v9756_v6 }
 0x7df   :  { %3753 = vmatmul.mubr.bf16.gmra.mrb[232].mxu1 %v7945_v53 }
 0x7e0   :  { %3760 = vmatprep.mubr.bf16.mxu1 %v7946_v28 }
 0x7e2   :  { %v6543_v31 = vpop.f32.mrb[180].mxu1 }
 0x7e3   :  { %v3561_v26 = vpop.f32.mrb[181].mxu1 }
 0x7e4   :  { %v6544_v40 = vpop.f32.mrb[182].mxu1 }
 0x7e5   :  { %v3635_v21 = vpack.c.bf16 %v6544_v40, %v6543_v31  ;;  %v3564_v27 = vpop.f32.mrb[183].mxu1  ;;  %v9831_v31 = vld [vmem:[#allocation57_spill] sm:$0xff]  ;;  %v9833_v40 = vld [vmem:[#allocation59_spill] sm:$0xff] }
 0x7e6   :  { %v3634_v9 = vpack.c.bf16 %v3564_v27, %v3561_v26  ;;  %v9832_v26 = vld [vmem:[#allocation58_spill] sm:$0xff]  ;;  %v9835_v27 = vld [vmem:[#allocation61_spill] sm:$0xff] }
 0x7e7   :  { %3761 = vmatmul.mubr.bf16.gmra.mrb[236].mxu1 %v7947_v36  ;;  %v9837_v36 = vld [vmem:[#allocation63_spill] sm:$0xff] }
 0x7e8   :  { %3950 = vmatpush1.bf16.msra.mxu1 %v3634_v9  ;;  %3768 = vmatprep.mubr.bf16.mxu1 %v7948_v38  ;;  %v9836_v9 = vld [vmem:[#allocation62_spill] sm:$0xff]  ;;  %v9838_v38 = vld [vmem:[#allocation64_spill] sm:$0xff] }
 0x7e9   :  { %3951 = vmatprep.subr.bf16.mxu1 %v9756_v6 }
 0x7ec   :  { %3952 = vmatpush1.bf16.msra.mxu1 %v3635_v21  ;;  %v9834_v21 = vld [vmem:[#allocation60_spill] sm:$0xff] }
 0x7ed   :  { %3953 = vmatprep.subr.bf16.mxu1 %v9756_v6 }
 0x7ef   :  { %3769 = vmatmul.mubr.bf16.gmra.mrb[240].mxu1 %v7949_v32  ;;  %v9839_v32 = vld [vmem:[#allocation65_spill] sm:$0xff] }
 0x7f0   :  { %3776 = vmatprep.mubr.bf16.mxu1 %v8470_v22 }
 0x7f2   :  { %v6547_v58 = vpop.f32.mrb[184].mxu1 }
 0x7f3   :  { %v3577_v25 = vpop.f32.mrb[185].mxu1 }
 0x7f4   :  { %v6548_v35 = vpop.f32.mrb[186].mxu1 }
 0x7f5   :  { %v3637_v16 = vpack.c.bf16 %v6548_v35, %v6547_v58  ;;  %v3580_v48 = vpop.f32.mrb[187].mxu1  ;;  %v9840_v58 = vld [vmem:[#allocation66_spill] sm:$0xff]  ;;  %v9842_v35 = vld [vmem:[#allocation68_spill] sm:$0xff] }
 0x7f6   :  { %v3636_v23 = vpack.c.bf16 %v3580_v48, %v3577_v25  ;;  %v9841_v25 = vld [vmem:[#allocation67_spill] sm:$0xff]  ;;  %v9844_v48 = vld [vmem:[#allocation70_spill] sm:$0xff] }
 0x7f7   :  { %3777 = vmatmul.mubr.bf16.gmra.mrb[244].mxu1 %v8473_v0 }
 0x7f8   :  { %3954 = vmatpush1.bf16.msra.mxu1 %v3636_v23  ;;  %3784 = vmatprep.mubr.bf16.mxu1 %v8477_v30  ;;  %v7277_v30 = vld [vmem:[#allocation11 + $0x8] sm:$0xff]  }
 0x7f9   :  { %3955 = vmatprep.subr.bf16.mxu1 %v9756_v6  ;;  %6555 = vmatprep.subr.bf16.mxu0 %v7277_v30  ;;  %v9845_v23 = vld [vmem:[#allocation71_spill] sm:$0xff] }
 0x7fa   :  { %6556 = vmatpush3.bf16.msra.mxu0 %v7277_v30 }
 0x7fc   :  { %3956 = vmatpush1.bf16.msra.mxu1 %v3637_v16  ;;  %v9843_v16 = vld [vmem:[#allocation69_spill] sm:$0xff] }
 0x7fd   :  { %3957 = vmatprep.subr.bf16.mxu1 %v9756_v6 }
 0x7ff   :  { %3785 = vmatmul.mubr.bf16.gmra.mrb[248].mxu1 %v8481_v33  ;;  %v7278_v33 = vld [vmem:[#allocation11 + $0x10] sm:$0xff]  }
 0x800   :  { %3792 = vmatprep.mubr.bf16.mxu1 %v8484_v34  ;;  %6557 = vmatprep.subr.bf16.mxu0 %v7278_v33  ;;  %v7279_v34 = vld [vmem:[#allocation11 + $0x18] sm:$0xff]  }
 0x801   :  { %6558 = vmatpush3.bf16.msra.mxu0 %v7278_v33 }
 0x802   :  { %v6551_v22 = vpop.f32.mrb[188].mxu1  ;;  %6559 = vmatprep.subr.bf16.mxu0 %v7279_v34 }
 0x803   :  { %v3593_v47 = vpop.f32.mrb[189].mxu1 }
 0x804   :  { %v6552_v57 = vpop.f32.mrb[190].mxu1 }
 0x805   :  { %v3639_v53 = vpack.c.bf16 %v6552_v57, %v6551_v22  ;;  %v3596_v0 = vpop.f32.mrb[191].mxu1  ;;  %6560 = vmatpush3.bf16.msra.mxu0 %v7279_v34 }
 0x806   :  { %v3638_v28 = vpack.c.bf16 %v3596_v0, %v3593_v47  ;;  %v9846_v0 = vld [vmem:[#allocation72_spill] sm:$0xff] }
 0x807   :  { %3793 = vmatmul.mubr.bf16.gmra.mrb[252].mxu1 %v8487_v37  ;;  %v7280_v37 = vld [vmem:[#allocation11 + $0x20] sm:$0xff]  }
 0x808   :  { %3958 = vmatpush1.bf16.msra.mxu1 %v3638_v28  ;;  %3800 = vmatprep.mubr.bf16.mxu1 %v8491_v19  ;;  %v7281_v19 = vld [vmem:[#allocation11 + $0x28] sm:$0xff]   ;;  %v9847_v28 = vld [vmem:[#allocation73_spill] sm:$0xff] }
 0x809   :  { %3959 = vmatprep.subr.bf16.mxu1 %v9756_v6  ;;  %6561 = vmatprep.subr.bf16.mxu0 %v7280_v37  ;;  %v9830_v6 = vld [vmem:[#allocation56_spill] sm:$0xff] }
 0x80a   :  { %6562 = vmatpush3.bf16.msra.mxu0 %v7280_v37 }
 0x80b   :  { %6563 = vmatprep.subr.bf16.mxu0 %v7281_v19 }
 0x80c   :  { %3960 = vmatpush1.bf16.msra.mxu1 %v3639_v53 }
 0x80e   :  { %6564 = vmatpush3.bf16.msra.mxu0 %v7281_v19 }
 0x80f   :  { %3801 = vmatmul.mubr.bf16.gmra.mrb[56].mxu1 %v8494_v2  ;;  %v9796_v2 = vld [vmem:[#allocation22_spill] sm:$0xff] }
 0x810   :  { %3808 = vmatprep.mubr.bf16.mxu1 %v8497_v41  ;;  %v9797_v41 = vld [vmem:[#allocation23_spill] sm:$0xff] }
 0x817   :  { %3809 = vmatmul.mubr.bf16.gmra.mrb[60].mxu1 %v8500_v42  ;;  %v9798_v42 = vld [vmem:[#allocation24_spill] sm:$0xff] }
 0x818   :  { %3816 = vmatprep.mubr.bf16.mxu1 %v8503_v29  ;;  %v9799_v29 = vld [vmem:[#allocation25_spill] sm:$0xff] }
 0x81f   :  { %3817 = vmatmul.mubr.bf16.gmra.mrb[64].mxu1 %v8506_v39  ;;  %v9800_v39 = vld [vmem:[#allocation26_spill] sm:$0xff] }
 0x820   :  { %3824 = vmatprep.mubr.bf16.mxu1 %v8509_v44  ;;  %v9801_v44 = vld [vmem:[#allocation27_spill] sm:$0xff] }
 0x827   :  { %3825 = vmatmul.mubr.bf16.gmra.mrb[68].mxu1 %v8512_v46  ;;  %v9802_v46 = vld [vmem:[#allocation28_spill] sm:$0xff] }
 0x828   :  { %3832 = vmatprep.mubr.bf16.mxu1 %v8515_v43  ;;  %v7282_v43 = vld [vmem:[#allocation11 + $0x30] sm:$0xff]  }
 0x829   :  { %6565 = vmatprep.subr.bf16.mxu0 %v7282_v43 }
 0x82a   :  { %6566 = vmatpush3.bf16.msra.mxu0 %v7282_v43  ;;  %v9850_v43 = vld [vmem:[#allocation76_spill] sm:$0xff] }
 0x82f   :  { %3833 = vmatmul.mubr.bf16.gmra.mrb[72].mxu1 %v8518_v52  ;;  %v9803_v52 = vld [vmem:[#allocation29_spill] sm:$0xff] }
 0x830   :  { %3840 = vmatprep.mubr.bf16.mxu1 %v8521_v49  ;;  %v9804_v49 = vld [vmem:[#allocation30_spill] sm:$0xff] }
 0x837   :  { %3841 = vmatmul.mubr.bf16.gmra.mrb[76].mxu1 %v8524_v45  ;;  %v9805_v45 = vld [vmem:[#allocation31_spill] sm:$0xff] }
 0x838   :  { %3848 = vmatprep.mubr.bf16.mxu1 %v8527_v51  ;;  %v9806_v51 = vld [vmem:[#allocation32_spill] sm:$0xff] }
 0x83f   :  { %3849 = vmatmul.mubr.bf16.gmra.mrb[80].mxu1 %v8530_v55  ;;  %v9807_v55 = vld [vmem:[#allocation33_spill] sm:$0xff] }
 0x840   :  { %3856 = vmatprep.mubr.bf16.mxu1 %v8533_v50  ;;  %v9808_v50 = vld [vmem:[#allocation34_spill] sm:$0xff] }
 0x847   :  { %3857 = vmatmul.mubr.bf16.gmra.mrb[84].mxu1 %v8536_v56  ;;  %v9809_v56 = vld [vmem:[#allocation35_spill] sm:$0xff] }
 0x848   :  { %3864 = vmatprep.mubr.bf16.mxu1 %v8539_v54  ;;  %v9810_v54 = vld [vmem:[#allocation36_spill] sm:$0xff] }
 0x84f   :  { %3865 = vmatmul.mubr.bf16.gmra.mrb[88].mxu1 %v8542_v8  ;;  %v7283_v8 = vld [vmem:[#allocation11 + $0x38] sm:$0xff]  }
 0x850   :  { %3872 = vmatprep.mubr.bf16.mxu1 %v8545_v61  ;;  %v9811_v61 = vld [vmem:[#allocation37_spill] sm:$0xff]  ;;  %6567 = vmatprep.subr.bf16.mxu0 %v7283_v8 }
 0x851   :  { %6568 = vmatpush3.bf16.msra.mxu0 %v7283_v8 }
 0x857   :  { %3873 = vmatmul.mubr.bf16.gmra.mrb[92].mxu1 %v8548_v63  ;;  %v9812_v63 = vld [vmem:[#allocation38_spill] sm:$0xff] }
 0x858   :  { %3880 = vmatprep.mubr.bf16.mxu1 %v8551_v59  ;;  %v9813_v59 = vld [vmem:[#allocation39_spill] sm:$0xff] }
 0x85f   :  { %3881 = vmatmul.mubr.bf16.gmra.mrb[96].mxu1 %v8554_v1  ;;  %v9814_v1 = vld [vmem:[#allocation40_spill] sm:$0xff] }
 0x860   :  { %3888 = vmatprep.mubr.bf16.mxu1 %v8557_v12  ;;  %v9815_v12 = vld [vmem:[#allocation41_spill] sm:$0xff] }
 0x867   :  { %3889 = vmatmul.mubr.bf16.gmra.mrb[100].mxu1 %v8560_v3  ;;  %v9816_v3 = vld [vmem:[#allocation42_spill] sm:$0xff] }
 0x868   :  { %3896 = vmatprep.mubr.bf16.mxu1 %v8563_v62  ;;  %v9817_v62 = vld [vmem:[#allocation43_spill] sm:$0xff] }
 0x86f   :  { %3897 = vmatmul.mubr.bf16.gmra.mrb[104].mxu1 %v8566_v5  ;;  %v9818_v5 = vld [vmem:[#allocation44_spill] sm:$0xff] }
 0x870   :  { %3904 = vmatprep.mubr.bf16.mxu1 %v8569_v4  ;;  %v9819_v4 = vld [vmem:[#allocation45_spill] sm:$0xff] }
 0x877   :  { %3905 = vmatmul.mubr.bf16.gmra.mrb[108].mxu1 %v8572_v14  ;;  %v9820_v14 = vld [vmem:[#allocation46_spill] sm:$0xff] }
 0x878   :  { %3912 = vmatprep.mubr.bf16.mxu1 %v8575_v10  ;;  %v9821_v10 = vld [vmem:[#allocation47_spill] sm:$0xff] }
 0x87f   :  { %3913 = vmatmul.mubr.bf16.gmra.mrb[112].mxu1 %v8578_v11  ;;  %v9822_v11 = vld [vmem:[#allocation48_spill] sm:$0xff] }
 0x880   :  { %3920 = vmatprep.mubr.bf16.mxu1 %v8581_v7  ;;  %v9823_v7 = vld [vmem:[#allocation49_spill] sm:$0xff] }
 0x887   :  { %3921 = vmatmul.mubr.bf16.gmra.mrb[116].mxu1 %v8584_v18  ;;  %v9824_v18 = vld [vmem:[#allocation50_spill] sm:$0xff] }
 0x888   :  { %3961 = vmatprep.mubr.bf16.mxu1 %v8587_v15  ;;  %v9825_v15 = vld [vmem:[#allocation51_spill] sm:$0xff] }
 0x88f   :  { %3962 = vmatmul.mubr.bf16.vlgmr.msra.gmra.mrb[192].mxu1 %v8590_v13  ;;  %v9826_v13 = vld [vmem:[#allocation52_spill] sm:$0xff] }
 0x890   :  { %3969 = vmatprep.mubr.bf16.mxu1 %v8593_v60  ;;  %v9827_v60 = vld [vmem:[#allocation53_spill] sm:$0xff] }
 0x897   :  { %3970 = vmatmul.mubr.bf16.gmra.mrb[196].mxu1 %v8596_v20  ;;  %v9828_v20 = vld [vmem:[#allocation54_spill] sm:$0xff] }
 0x898   :  { %3977 = vmatprep.mubr.bf16.mxu1 %v8599_v17  ;;  %v9829_v17 = vld [vmem:[#allocation55_spill] sm:$0xff] }
 0x89f   :  { %3978 = vmatmul.mubr.bf16.gmra.mrb[200].mxu1 %v9796_v2  ;;  %v9848_v2 = vld [vmem:[#allocation74_spill] sm:$0xff] }
 0x8a0   :  { %3985 = vmatprep.mubr.bf16.mxu1 %v9797_v41  ;;  %v9849_v41 = vld [vmem:[#allocation75_spill] sm:$0xff] }
 0x8a7   :  { %3986 = vmatmul.mubr.bf16.gmra.mrb[204].mxu1 %v9798_v42 }
 0x8a8   :  { %3993 = vmatprep.mubr.bf16.mxu1 %v9799_v29 }
 0x8af   :  { %3994 = vmatmul.mubr.bf16.gmra.mrb[208].mxu1 %v9800_v39 }
 0x8b0   :  { %4001 = vmatprep.mubr.bf16.mxu1 %v9801_v44 }
 0x8b7   :  { %4002 = vmatmul.mubr.bf16.gmra.mrb[212].mxu1 %v9802_v46 }
 0x8b8   :  { %4009 = vmatprep.mubr.bf16.mxu1 %v9803_v52  ;;  %v9851_v52 = vld [vmem:[#allocation77_spill] sm:$0xff] }
 0x8bf   :  { %4010 = vmatmul.mubr.bf16.gmra.mrb[216].mxu1 %v9804_v49 }
 0x8c0   :  { %4017 = vmatprep.mubr.bf16.mxu1 %v9805_v45 }
 0x8c7   :  { %4018 = vmatmul.mubr.bf16.gmra.mrb[220].mxu1 %v9806_v51 }
 0x8c8   :  { %4025 = vmatprep.mubr.bf16.mxu1 %v9807_v55 }
 0x8cf   :  { %4026 = vmatmul.mubr.bf16.gmra.mrb[224].mxu1 %v9808_v50 }
 0x8d0   :  { %4033 = vmatprep.mubr.bf16.mxu1 %v9809_v56  ;;  %v9852_v56 = vld [vmem:[#allocation78_spill] sm:$0xff] }
 0x8d7   :  { %4034 = vmatmul.mubr.bf16.gmra.mrb[228].mxu1 %v9810_v54  ;;  %v9853_v54 = vld [vmem:[#allocation79_spill] sm:$0xff] }
 0x8d8   :  { %4041 = vmatprep.mubr.bf16.mxu1 %v9811_v61 }
 0x8df   :  { %4042 = vmatmul.mubr.bf16.gmra.mrb[232].mxu1 %v9812_v63 }
 0x8e0   :  { %4049 = vmatprep.mubr.bf16.mxu1 %v9813_v59 }
 0x8e7   :  { %4050 = vmatmul.mubr.bf16.gmra.mrb[236].mxu1 %v9814_v1 }
 0x8e8   :  { %4057 = vmatprep.mubr.bf16.mxu1 %v9815_v12  ;;  %v9854_v12 = vld [vmem:[#allocation80_spill] sm:$0xff] }
 0x8ef   :  { %4058 = vmatmul.mubr.bf16.gmra.mrb[240].mxu1 %v9816_v3 }
 0x8f0   :  { %4065 = vmatprep.mubr.bf16.mxu1 %v9817_v62 }
 0x8f7   :  { %4066 = vmatmul.mubr.bf16.gmra.mrb[244].mxu1 %v9818_v5 }
 0x8f8   :  { %4073 = vmatprep.mubr.bf16.mxu1 %v9819_v4 }
 0x8ff   :  { %4074 = vmatmul.mubr.bf16.gmra.mrb[248].mxu1 %v9820_v14 }
 0x900   :  { %4081 = vmatprep.mubr.bf16.mxu1 %v9821_v10 }
 0x907   :  { %4082 = vmatmul.mubr.bf16.gmra.mrb[252].mxu1 %v9822_v11 }
 0x908   :  { %4089 = vmatprep.mubr.bf16.mxu1 %v9823_v7 }
 0x90f   :  { %4090 = vmatmul.mubr.bf16.gmra.mrb[56].mxu1 %v9824_v18 }
 0x910   :  { %4097 = vmatprep.mubr.bf16.mxu1 %v9825_v15 }
 0x917   :  { %4098 = vmatmul.mubr.bf16.gmra.mrb[60].mxu1 %v9826_v13 }
 0x918   :  { %4105 = vmatprep.mubr.bf16.mxu1 %v9827_v60 }
 0x91f   :  { %4106 = vmatmul.mubr.bf16.gmra.mrb[64].mxu1 %v9828_v20 }
 0x920   :  { %4113 = vmatprep.mubr.bf16.mxu1 %v9829_v17 }
 0x927   :  { %4114 = vmatmul.mubr.bf16.gmra.mrb[68].mxu1 %v9830_v6 }
 0x928   :  { %4121 = vmatprep.mubr.bf16.mxu1 %v9831_v31 }
 0x92f   :  { %4122 = vmatmul.mubr.bf16.gmra.mrb[72].mxu1 %v9832_v26 }
 0x930   :  { %4129 = vmatprep.mubr.bf16.mxu1 %v9833_v40 }
 0x937   :  { %4130 = vmatmul.mubr.bf16.gmra.mrb[76].mxu1 %v9834_v21 }
 0x938   :  { %4137 = vmatprep.mubr.bf16.mxu1 %v9835_v27 }
 0x93f   :  { %4138 = vmatmul.mubr.bf16.gmra.mrb[80].mxu1 %v9836_v9 }
 0x940   :  { %4145 = vmatprep.mubr.bf16.mxu1 %v9837_v36 }
 0x947   :  { %4146 = vmatmul.mubr.bf16.gmra.mrb[84].mxu1 %v9838_v38 }
 0x948   :  { %4153 = vmatprep.mubr.bf16.mxu1 %v9839_v32 }
 0x94f   :  { %4154 = vmatmul.mubr.bf16.gmra.mrb[88].mxu1 %v9840_v58 }
 0x950   :  { %4161 = vmatprep.mubr.bf16.mxu1 %v9841_v25 }
 0x957   :  { %4162 = vmatmul.mubr.bf16.gmra.mrb[92].mxu1 %v9842_v35 }
 0x958   :  { %4169 = vmatprep.mubr.bf16.mxu1 %v9843_v16 }
 0x95f   :  { %4170 = vmatmul.mubr.bf16.gmra.mrb[96].mxu1 %v9844_v48 }
 0x960   :  { %4177 = vmatprep.mubr.bf16.mxu1 %v9845_v23 }
 0x962   :  { %v3963_v24 = vpop.f32.mrb[192].mxu1 }
 0x963   :  { %v3965_v22 = vpop.f32.mrb[193].mxu1 }
 0x964   :  { %v3966_v47 = vpop.f32.mrb[194].mxu1 }
 0x965   :  { %v4218_v57 = vpack.c.bf16 %v3966_v47, %v3963_v24  ;;  %v3968_v53 = vpop.f32.mrb[195].mxu1 }
 0x967   :  { %5966 = vst [vmem:[#allocation13] sm:$0xff] %v4218_v57   ;;  %4178 = vmatmul.mubr.bf16.gmra.mrb[100].mxu1 %v9846_v0  ;;  %6569 = vmatprep.mubr.bf16.mxu0 %v4218_v57 }
 0x968   :  { %4185 = vmatprep.mubr.bf16.mxu1 %v9847_v28 }
 0x96a   :  { %v3971_v30 = vpop.f32.mrb[196].mxu1 }
 0x96b   :  { %v3973_v33 = vpop.f32.mrb[197].mxu1 }
 0x96c   :  { %v3974_v34 = vpop.f32.mrb[198].mxu1 }
 0x96d   :  { %v4219_v37 = vpack.c.bf16 %v3974_v34, %v3971_v30  ;;  %v3976_v19 = vpop.f32.mrb[199].mxu1 }
 0x96f   :  { %6122 = vst [vmem:[#allocation13 + $0x8] sm:$0xff] %v4219_v37   ;;  %4186 = vmatmul.mubr.bf16.gmra.mrb[104].mxu1 %v9848_v2  ;;  %6570 = vmatmul.mubr.bf16.vlgmr.msra.gmra.mrb[72].mxu0 %v4219_v37 }
 0x970   :  { %4193 = vmatprep.mubr.bf16.mxu1 %v9849_v41 }
 0x972   :  { %v3979_v42 = vpop.f32.mrb[200].mxu1 }
 0x973   :  { %v3981_v29 = vpop.f32.mrb[201].mxu1 }
 0x974   :  { %v3982_v39 = vpop.f32.mrb[202].mxu1 }
 0x975   :  { %v4220_v44 = vpack.c.bf16 %v3982_v39, %v3979_v42  ;;  %v3984_v46 = vpop.f32.mrb[203].mxu1 }
 0x977   :  { %6123 = vst [vmem:[#allocation13 + $0x10] sm:$0xff] %v4220_v44   ;;  %4194 = vmatmul.mubr.bf16.gmra.mrb[108].mxu1 %v9850_v43  ;;  %6573 = vmatprep.mubr.bf16.mxu0 %v4220_v44 }
 0x978   :  { %4201 = vmatprep.mubr.bf16.mxu1 %v9851_v52 }
 0x97a   :  { %v3987_v49 = vpop.f32.mrb[204].mxu1 }
 0x97b   :  { %v3989_v45 = vpop.f32.mrb[205].mxu1 }
 0x97c   :  { %v3990_v51 = vpop.f32.mrb[206].mxu1 }
 0x97d   :  { %v4221_v55 = vpack.c.bf16 %v3990_v51, %v3987_v49  ;;  %v3992_v50 = vpop.f32.mrb[207].mxu1 }
 0x97f   :  { %6124 = vst [vmem:[#allocation13 + $0x18] sm:$0xff] %v4221_v55   ;;  %4202 = vmatmul.mubr.bf16.gmra.mrb[112].mxu1 %v9852_v56  ;;  %6574 = vmatmul.mubr.bf16.gmra.mrb[76].mxu0 %v4221_v55 }
 0x980   :  { %4209 = vmatprep.mubr.bf16.mxu1 %v9853_v54 }
 0x982   :  { %v3995_v8 = vpop.f32.mrb[208].mxu1 }
 0x983   :  { %v3997_v61 = vpop.f32.mrb[209].mxu1 }
 0x984   :  { %v3998_v63 = vpop.f32.mrb[210].mxu1 }
 0x985   :  { %v4222_v59 = vpack.c.bf16 %v3998_v63, %v3995_v8  ;;  %v4000_v1 = vpop.f32.mrb[211].mxu1 }
 0x987   :  { %6125 = vst [vmem:[#allocation13 + $0x20] sm:$0xff] %v4222_v59   ;;  %4210 = vmatmul.mubr.bf16.gmra.mrb[116].mxu1 %v9854_v12  ;;  %6577 = vmatprep.mubr.bf16.mxu0 %v4222_v59 }
 0x98a   :  { %v4003_v3 = vpop.f32.mrb[212].mxu1 }
 0x98b   :  { %v4005_v62 = vpop.f32.mrb[213].mxu1 }
 0x98c   :  { %v4006_v5 = vpop.f32.mrb[214].mxu1 }
 0x98d   :  { %v4223_v4 = vpack.c.bf16 %v4006_v5, %v4003_v3  ;;  %v4008_v14 = vpop.f32.mrb[215].mxu1 }
 0x98f   :  { %6126 = vst [vmem:[#allocation13 + $0x28] sm:$0xff] %v4223_v4   ;;  %6578 = vmatmul.mubr.bf16.gmra.mrb[80].mxu0 %v4223_v4 }
 0x992   :  { %v4011_v10 = vpop.f32.mrb[216].mxu1 }
 0x993   :  { %v4013_v11 = vpop.f32.mrb[217].mxu1 }
 0x994   :  { %v4014_v7 = vpop.f32.mrb[218].mxu1 }
 0x995   :  { %v4224_v18 = vpack.c.bf16 %v4014_v7, %v4011_v10  ;;  %v4016_v15 = vpop.f32.mrb[219].mxu1 }
 0x997   :  { %6127 = vst [vmem:[#allocation13 + $0x30] sm:$0xff] %v4224_v18   ;;  %6581 = vmatprep.mubr.bf16.mxu0 %v4224_v18 }
 0x99a   :  { %v4019_v13 = vpop.f32.mrb[220].mxu1 }
 0x99b   :  { %v4021_v60 = vpop.f32.mrb[221].mxu1 }
 0x99c   :  { %v4022_v20 = vpop.f32.mrb[222].mxu1 }
 0x99d   :  { %v4225_v17 = vpack.c.bf16 %v4022_v20, %v4019_v13  ;;  %v4024_v6 = vpop.f32.mrb[223].mxu1 }
 0x99f   :  { %6128 = vst [vmem:[#allocation13 + $0x38] sm:$0xff] %v4225_v17   ;;  %6582 = vmatmul.mubr.bf16.gmra.mrb[84].mxu0 %v4225_v17 }
 0x9a2   :  { %v4027_v31 = vpop.f32.mrb[224].mxu1 }
 0x9a3   :  { %v4029_v26 = vpop.f32.mrb[225].mxu1 }
 0x9a4   :  { %v4030_v40 = vpop.f32.mrb[226].mxu1 }
 0x9a5   :  { %v4226_v21 = vpack.c.bf16 %v4030_v40, %v4027_v31  ;;  %v4032_v27 = vpop.f32.mrb[227].mxu1 }
 0x9a7   :  { %6129 = vst [vmem:[#allocation13 + $0x40] sm:$0xff] %v4226_v21   ;;  %6585 = vmatprep.mubr.bf16.mxu0 %v4226_v21 }
 0x9aa   :  { %v4035_v9 = vpop.f32.mrb[228].mxu1 }
 0x9ab   :  { %v4037_v36 = vpop.f32.mrb[229].mxu1 }
 0x9ac   :  { %v4038_v38 = vpop.f32.mrb[230].mxu1 }
 0x9ad   :  { %v4227_v32 = vpack.c.bf16 %v4038_v38, %v4035_v9  ;;  %v4040_v58 = vpop.f32.mrb[231].mxu1 }
 0x9af   :  { %6130 = vst [vmem:[#allocation13 + $0x48] sm:$0xff] %v4227_v32   ;;  %6586 = vmatmul.mubr.bf16.gmra.mrb[88].mxu0 %v4227_v32 }
 0x9b2   :  { %v4043_v25 = vpop.f32.mrb[232].mxu1 }
 0x9b3   :  { %v4045_v35 = vpop.f32.mrb[233].mxu1 }
 0x9b4   :  { %v4046_v16 = vpop.f32.mrb[234].mxu1 }
 0x9b5   :  { %v4228_v48 = vpack.c.bf16 %v4046_v16, %v4043_v25  ;;  %v4048_v23 = vpop.f32.mrb[235].mxu1 }
 0x9b7   :  { %6131 = vst [vmem:[#allocation13 + $0x50] sm:$0xff] %v4228_v48   ;;  %6589 = vmatprep.mubr.bf16.mxu0 %v4228_v48 }
 0x9ba   :  { %v4051_v24 = vpop.f32.mrb[236].mxu1 }
 0x9bb   :  { %v4053_v22 = vpop.f32.mrb[237].mxu1 }
 0x9bc   :  { %v4054_v47 = vpop.f32.mrb[238].mxu1 }
 0x9bd   :  { %v4229_v57 = vpack.c.bf16 %v4054_v47, %v4051_v24  ;;  %v4056_v53 = vpop.f32.mrb[239].mxu1 }
 0x9bf   :  { %6132 = vst [vmem:[#allocation13 + $0x58] sm:$0xff] %v4229_v57   ;;  %6590 = vmatmul.mubr.bf16.gmra.mrb[92].mxu0 %v4229_v57 }
 0x9c2   :  { %v4059_v0 = vpop.f32.mrb[240].mxu1 }
 0x9c3   :  { %v4061_v28 = vpop.f32.mrb[241].mxu1 }
 0x9c4   :  { %v4062_v30 = vpop.f32.mrb[242].mxu1 }
 0x9c5   :  { %v4230_v33 = vpack.c.bf16 %v4062_v30, %v4059_v0  ;;  %v4064_v34 = vpop.f32.mrb[243].mxu1 }
 0x9c7   :  { %6133 = vst [vmem:[#allocation13 + $0x60] sm:$0xff] %v4230_v33   ;;  %6593 = vmatprep.mubr.bf16.mxu0 %v4230_v33 }
 0x9ca   :  { %v4067_v37 = vpop.f32.mrb[244].mxu1 }
 0x9cb   :  { %v4069_v19 = vpop.f32.mrb[245].mxu1 }
 0x9cc   :  { %v4070_v2 = vpop.f32.mrb[246].mxu1 }
 0x9cd   :  { %v4231_v41 = vpack.c.bf16 %v4070_v2, %v4067_v37  ;;  %v4072_v42 = vpop.f32.mrb[247].mxu1 }
 0x9cf   :  { %6134 = vst [vmem:[#allocation13 + $0x68] sm:$0xff] %v4231_v41   ;;  %6594 = vmatmul.mubr.bf16.gmra.mrb[96].mxu0 %v4231_v41 }
 0x9d2   :  { %v4075_v29 = vpop.f32.mrb[248].mxu1 }
 0x9d3   :  { %v4077_v39 = vpop.f32.mrb[249].mxu1 }
 0x9d4   :  { %v4078_v44 = vpop.f32.mrb[250].mxu1 }
 0x9d5   :  { %v4232_v46 = vpack.c.bf16 %v4078_v44, %v4075_v29  ;;  %v4080_v43 = vpop.f32.mrb[251].mxu1  ;;  %v4898_v44 = vlaneseq }
 0x9d7   :  { %6135 = vst [vmem:[#allocation13 + $0x70] sm:$0xff] %v4232_v46   ;;  %6597 = vmatprep.mubr.bf16.mxu0 %v4232_v46 }
 0x9da   :  { %v4083_v52 = vpop.f32.mrb[252].mxu1 }
 0x9db   :  { %v4085_v49 = vpop.f32.mrb[253].mxu1 }
 0x9dc   :  { %v4086_v45 = vpop.f32.mrb[254].mxu1 }
 0x9dd   :  { %v4233_v51 = vpack.c.bf16 %v4086_v45, %v4083_v52  ;;  %v4088_v55 = vpop.f32.mrb[255].mxu1  ;;  %v8913_v45 = vand.u32 127, %v4898_v44 }
 0x9df   :  { %6136 = vst [vmem:[#allocation13 + $0x78] sm:$0xff] %v4233_v51   ;;  %6598 = vmatmul.mubr.bf16.gmra.mrb[100].mxu0 %v4233_v51  ;;  %v8918_v51 = vld [vmem:[%s9658_s6] ss:$0 sm:$0xff]  ;;  %vm4900_vm0 = vcmp.lt.s32.totalorder %v8913_v45, 8  ;;  %s8149_s6 = smov [#allocation13]  }
 0x9e0   :  { %s5610_s22 = sshll.u32 %s8149_s6, 4  ;;  %s5611_s22 = int_to_ptr.vmem [resolvable:$true] %s5610_s22 }
 0x9e1   :  { %s8082_s12 = scalar_lea.vmem %s5611_s22, 4096  ;;  %p8087_p7 = scmp.lt.s32.totalorder %s5611_s22, %s5611_s22 }
 0x9e2   :  { %v4091_v50 = vpop.f32.mrb[56].mxu1  ;;  %p8083_p6 = scmp.ne.s32.totalorder %s5611_s22, %s8082_s12  ;;  %p8088_p8 = scmp.lt.s32.totalorder %s8082_s12, %s8082_s12 }
 0x9e3   :  { %v4093_v56 = vpop.f32.mrb[57].mxu1 }
 0x9e4   :  { %v4094_v54 = vpop.f32.mrb[58].mxu1  ;;  %p8089_p9 = por %p8088_p8, %p8087_p7 }
 0x9e5   :  { %v4234_v8 = vpack.c.bf16 %v4094_v54, %v4091_v50  ;;  %v4096_v61 = vpop.f32.mrb[59].mxu1 }
 0x9e6   :  { %p8090_p10 = pnand %p8089_p9, %p8083_p6 }
 0x9e7   :  { %6137 = vst [vmem:[#allocation13 + $0x80] sm:$0xff] %v4234_v8   ;;  %6601 = vmatprep.mubr.bf16.mxu0 %v4234_v8 }
 0x9ea   :  { %v4099_v63 = vpop.f32.mrb[60].mxu1 }
 0x9eb   :  { %v4101_v59 = vpop.f32.mrb[61].mxu1 }
 0x9ec   :  { %v4102_v1 = vpop.f32.mrb[62].mxu1 }
 0x9ed   :  { %v4235_v12 = vpack.c.bf16 %v4102_v1, %v4099_v63  ;;  %v4104_v3 = vpop.f32.mrb[63].mxu1 }
 0x9ef   :  { %6138 = vst [vmem:[#allocation13 + $0x88] sm:$0xff] %v4235_v12   ;;  %6602 = vmatmul.mubr.bf16.gmra.mrb[104].mxu0 %v4235_v12 }
 0x9f2   :  { %v4107_v62 = vpop.f32.mrb[64].mxu1 }
 0x9f3   :  { %v4109_v5 = vpop.f32.mrb[65].mxu1 }
 0x9f4   :  { %v4110_v4 = vpop.f32.mrb[66].mxu1 }
 0x9f5   :  { %v4236_v14 = vpack.c.bf16 %v4110_v4, %v4107_v62  ;;  %v4112_v10 = vpop.f32.mrb[67].mxu1 }
 0x9f7   :  { %6139 = vst [vmem:[#allocation13 + $0x90] sm:$0xff] %v4236_v14   ;;  %6605 = vmatprep.mubr.bf16.mxu0 %v4236_v14 }
 0x9fa   :  { %v4115_v11 = vpop.f32.mrb[68].mxu1 }
 0x9fb   :  { %v4117_v7 = vpop.f32.mrb[69].mxu1 }
 0x9fc   :  { %v4118_v18 = vpop.f32.mrb[70].mxu1 }
 0x9fd   :  { %v4237_v15 = vpack.c.bf16 %v4118_v18, %v4115_v11  ;;  %v4120_v13 = vpop.f32.mrb[71].mxu1 }
 0x9ff   :  { %6140 = vst [vmem:[#allocation13 + $0x98] sm:$0xff] %v4237_v15   ;;  %6606 = vmatmul.mubr.bf16.gmra.mrb[108].mxu0 %v4237_v15 }
 0xa02   :  { %v4123_v60 = vpop.f32.mrb[72].mxu1 }
 0xa03   :  { %v4125_v20 = vpop.f32.mrb[73].mxu1 }
 0xa04   :  { %v4126_v17 = vpop.f32.mrb[74].mxu1 }
 0xa05   :  { %v4238_v6 = vpack.c.bf16 %v4126_v17, %v4123_v60  ;;  %v4128_v31 = vpop.f32.mrb[75].mxu1 }
 0xa07   :  { %6141 = vst [vmem:[#allocation13 + $0xa0] sm:$0xff] %v4238_v6   ;;  %6609 = vmatprep.mubr.bf16.mxu0 %v4238_v6 }
 0xa0a   :  { %v4131_v26 = vpop.f32.mrb[76].mxu1 }
 0xa0b   :  { %v4133_v40 = vpop.f32.mrb[77].mxu1 }
 0xa0c   :  { %v4134_v21 = vpop.f32.mrb[78].mxu1 }
 0xa0d   :  { %v4239_v27 = vpack.c.bf16 %v4134_v21, %v4131_v26  ;;  %v4136_v9 = vpop.f32.mrb[79].mxu1 }
 0xa0f   :  { %6142 = vst [vmem:[#allocation13 + $0xa8] sm:$0xff] %v4239_v27   ;;  %6610 = vmatmul.mubr.bf16.gmra.mrb[112].mxu0 %v4239_v27 }
 0xa12   :  { %v4139_v36 = vpop.f32.mrb[80].mxu1 }
 0xa13   :  { %v4141_v38 = vpop.f32.mrb[81].mxu1 }
 0xa14   :  { %v4142_v32 = vpop.f32.mrb[82].mxu1 }
 0xa15   :  { %v4240_v58 = vpack.c.bf16 %v4142_v32, %v4139_v36  ;;  %v4144_v25 = vpop.f32.mrb[83].mxu1 }
 0xa17   :  { %6143 = vst [vmem:[#allocation13 + $0xb0] sm:$0xff] %v4240_v58   ;;  %6613 = vmatprep.mubr.bf16.mxu0 %v4240_v58 }
 0xa1a   :  { %v4147_v35 = vpop.f32.mrb[84].mxu1 }
 0xa1b   :  { %v4149_v16 = vpop.f32.mrb[85].mxu1 }
 0xa1c   :  { %v4150_v48 = vpop.f32.mrb[86].mxu1 }
 0xa1d   :  { %v4241_v23 = vpack.c.bf16 %v4150_v48, %v4147_v35  ;;  %v4152_v24 = vpop.f32.mrb[87].mxu1 }
 0xa1f   :  { %6144 = vst [vmem:[#allocation13 + $0xb8] sm:$0xff] %v4241_v23   ;;  %6614 = vmatmul.mubr.bf16.gmra.mrb[116].mxu0 %v4241_v23 }
 0xa22   :  { %v4155_v22 = vpop.f32.mrb[88].mxu1 }
 0xa23   :  { %v4157_v47 = vpop.f32.mrb[89].mxu1 }
 0xa24   :  { %v4158_v57 = vpop.f32.mrb[90].mxu1 }
 0xa25   :  { %v4242_v53 = vpack.c.bf16 %v4158_v57, %v4155_v22  ;;  %v4160_v0 = vpop.f32.mrb[91].mxu1 }
 0xa27   :  { %6145 = vst [vmem:[#allocation13 + $0xc0] sm:$0xff] %v4242_v53   ;;  %6617 = vmatprep.mubr.bf16.mxu0 %v4242_v53 }
 0xa2a   :  { %v4163_v28 = vpop.f32.mrb[92].mxu1 }
 0xa2b   :  { %v4165_v30 = vpop.f32.mrb[93].mxu1 }
 0xa2c   :  { %v4166_v33 = vpop.f32.mrb[94].mxu1 }
 0xa2d   :  { %v4243_v34 = vpack.c.bf16 %v4166_v33, %v4163_v28  ;;  %v4168_v37 = vpop.f32.mrb[95].mxu1 }
 0xa2f   :  { %6146 = vst [vmem:[#allocation13 + $0xc8] sm:$0xff] %v4243_v34   ;;  %6618 = vmatmul.mubr.bf16.gmra.mrb[120].mxu0 %v4243_v34 }
 0xa32   :  { %v4171_v19 = vpop.f32.mrb[96].mxu1 }
 0xa33   :  { %v4173_v2 = vpop.f32.mrb[97].mxu1 }
 0xa34   :  { %v4174_v41 = vpop.f32.mrb[98].mxu1 }
 0xa35   :  { %v4244_v42 = vpack.c.bf16 %v4174_v41, %v4171_v19  ;;  %v4176_v29 = vpop.f32.mrb[99].mxu1 }
 0xa37   :  { %6147 = vst [vmem:[#allocation13 + $0xd0] sm:$0xff] %v4244_v42   ;;  %6621 = vmatprep.mubr.bf16.mxu0 %v4244_v42 }
 0xa3a   :  { %v4179_v39 = vpop.f32.mrb[100].mxu1 }
 0xa3b   :  { %v4181_v46 = vpop.f32.mrb[101].mxu1 }
 0xa3c   :  { %v4182_v43 = vpop.f32.mrb[102].mxu1 }
 0xa3d   :  { %v4245_v52 = vpack.c.bf16 %v4182_v43, %v4179_v39  ;;  %v4184_v49 = vpop.f32.mrb[103].mxu1 }
 0xa3f   :  { %6148 = vst [vmem:[#allocation13 + $0xd8] sm:$0xff] %v4245_v52   ;;  %6622 = vmatmul.mubr.bf16.gmra.mrb[124].mxu0 %v4245_v52 }
 0xa42   :  { %v4187_v55 = vpop.f32.mrb[104].mxu1  ;;  %v6571_v50 = vpop.f32.mrb[72].mxu0 }
 0xa43   :  { %v4652_v56 = vadd.f32 %v6571_v50, %v8918_v51  ;;  %v4189_v54 = vpop.f32.mrb[105].mxu1  ;;  %v4643_v8 = vpop.f32.mrb[73].mxu0 }
 0xa44   :  { %v4644_v61 = vadd.f32 %v8918_v51, %v4643_v8  ;;  %v4190_v63 = vpop.f32.mrb[106].mxu1  ;;  %v6572_v59 = vpop.f32.mrb[74].mxu0 }
 0xa45   :  { %v4246_v1 = vpack.c.bf16 %v4190_v63, %v4187_v55  ;;  %v4655_v12 = vadd.f32 %v6572_v59, %v8918_v51  ;;  %v4192_v3 = vpop.f32.mrb[107].mxu1  ;;  %v4646_v62 = vpop.f32.mrb[75].mxu0  ;;  %v8926_v5 = vsel %vm4900_vm0, %v4652_v56, -1e+30 }
 0xa46   :  { %v4647_v4 = vadd.f32 %v8918_v51, %v4646_v62  ;;  %4969 = vmax.xlane.f32.xlu1 %v8926_v5  ;;  %v8932_v14 = vsel %vm4900_vm0, %v4644_v61, -1e+30 }
 0xa47   :  { %6149 = vst [vmem:[#allocation13 + $0xe0] sm:$0xff] %v4246_v1   ;;  %6625 = vmatprep.mubr.bf16.mxu0 %v4246_v1  ;;  %4965 = vmax.xlane.f32.xlu0 %v8932_v14  ;;  %v8937_v10 = vsel %vm4900_vm0, %v4655_v12, -1e+30 }
 0xa48   :  { %v8942_v7 = vsel %vm4900_vm0, %v4647_v4, -1e+30 }
 0xa4a   :  { %v4195_v11 = vpop.f32.mrb[108].mxu1  ;;  %4971 = vmax.xlane.f32.xlu1 %v8937_v10 }
 0xa4b   :  { %v4197_v18 = vpop.f32.mrb[109].mxu1  ;;  %4967 = vmax.xlane.f32.xlu0 %v8942_v7 }
 0xa4c   :  { %v4198_v15 = vpop.f32.mrb[110].mxu1 }
 0xa4d   :  { %v4247_v13 = vpack.c.bf16 %v4198_v15, %v4195_v11  ;;  %v4200_v60 = vpop.f32.mrb[111].mxu1 }
 0xa4f   :  { %6150 = vst [vmem:[#allocation13 + $0xe8] sm:$0xff] %v4247_v13   ;;  %6626 = vmatmul.mubr.bf16.gmra.mrb[128].mxu0 %v4247_v13 }
 0xa52   :  { %v4203_v20 = vpop.f32.mrb[112].mxu1  ;;  %v6575_v17 = vpop.f32.mrb[76].mxu0 }
 0xa53   :  { %v4668_v6 = vadd.f32 %v6575_v17, %v8918_v51  ;;  %v4205_v31 = vpop.f32.mrb[113].mxu1  ;;  %v4659_v26 = vpop.f32.mrb[77].mxu0 }
 0xa54   :  { %v4206_v40 = vpop.f32.mrb[114].mxu1  ;;  %v6576_v21 = vpop.f32.mrb[78].mxu0  ;;  %v4660_v27 = vadd.f32 %v8918_v51, %v4659_v26 }
 0xa55   :  { %v4248_v9 = vpack.c.bf16 %v4206_v40, %v4203_v20  ;;  %v4671_v36 = vadd.f32 %v6576_v21, %v8918_v51  ;;  %v4208_v38 = vpop.f32.mrb[115].mxu1  ;;  %v4662_v32 = vpop.f32.mrb[79].mxu0  ;;  %v8950_v58 = vsel %vm4900_vm0, %v4668_v6, -1e+30 }
 0xa56   :  { %4977 = vmax.xlane.f32.xlu0 %v8950_v58  ;;  %v4663_v25 = vadd.f32 %v8918_v51, %v4662_v32  ;;  %v8961_v16 = vsel %vm4900_vm0, %v4660_v27, -1e+30 }
 0xa57   :  { %6151 = vst [vmem:[#allocation13 + $0xf0] sm:$0xff] %v4248_v9   ;;  %6629 = vmatprep.mubr.bf16.mxu0 %v4248_v9  ;;  %v8956_v35 = vsel %vm4900_vm0, %v4671_v36, -1e+30 }
 0xa58   :  { %4979 = vmax.xlane.f32.xlu1 %v8956_v35  ;;  %v8966_v24 = vsel %vm4900_vm0, %v4663_v25, -1e+30 }
 0xa5a   :  { %v4211_v48 = vpop.f32.mrb[116].mxu1  ;;  %4973 = vmax.xlane.f32.xlu0 %v8961_v16 }
 0xa5b   :  { %v4213_v23 = vpop.f32.mrb[117].mxu1 }
 0xa5c   :  { %v4214_v22 = vpop.f32.mrb[118].mxu1  ;;  %4975 = vmax.xlane.f32.xlu1 %v8966_v24 }
 0xa5d   :  { %v4249_v47 = vpack.c.bf16 %v4214_v22, %v4211_v48  ;;  %v4216_v57 = vpop.f32.mrb[119].mxu1 }
 0xa5f   :  { %6152 = vst [vmem:[#allocation13 + $0xf8] sm:$0xff] %v4249_v47   ;;  %6630 = vmatmul.mubr.bf16.gmra.mrb[132].mxu0 %v4249_v47 }
 0xa62   :  { %v6579_v53 = vpop.f32.mrb[80].mxu0 }
 0xa63   :  { %v4684_v0 = vadd.f32 %v6579_v53, %v8918_v51  ;;  %v4675_v28 = vpop.f32.mrb[81].mxu0 }
 0xa64   :  { %v6580_v30 = vpop.f32.mrb[82].mxu0  ;;  %v4676_v33 = vadd.f32 %v8918_v51, %v4675_v28 }
 0xa65   :  { %v4687_v34 = vadd.f32 %v6580_v30, %v8918_v51  ;;  %v4678_v37 = vpop.f32.mrb[83].mxu0  ;;  %v8974_v19 = vsel %vm4900_vm0, %v4684_v0, -1e+30 }
 0xa66   :  { %4985 = vmax.xlane.f32.xlu0 %v8974_v19  ;;  %v4679_v2 = vadd.f32 %v8918_v51, %v4678_v37  ;;  %v8985_v42 = vsel %vm4900_vm0, %v4676_v33, -1e+30 }
 0xa67   :  { %v8980_v41 = vsel %vm4900_vm0, %v4687_v34, -1e+30 }
 0xa68   :  { %4987 = vmax.xlane.f32.xlu1 %v8980_v41  ;;  %v8990_v29 = vsel %vm4900_vm0, %v4679_v2, -1e+30 }
 0xa6a   :  { %4981 = vmax.xlane.f32.xlu0 %v8985_v42 }
 0xa6c   :  { %4983 = vmax.xlane.f32.xlu1 %v8990_v29 }
 0xa72   :  { %v6583_v39 = vpop.f32.mrb[84].mxu0 }
 0xa73   :  { %v4700_v44 = vadd.f32 %v6583_v39, %v8918_v51  ;;  %v4691_v46 = vpop.f32.mrb[85].mxu0 }
 0xa74   :  { %v6584_v43 = vpop.f32.mrb[86].mxu0  ;;  %v4692_v52 = vadd.f32 %v8918_v51, %v4691_v46 }
 0xa75   :  { %v4703_v49 = vadd.f32 %v6584_v43, %v8918_v51  ;;  %v4694_v55 = vpop.f32.mrb[87].mxu0  ;;  %v8998_v50 = vsel %vm4900_vm0, %v4700_v44, -1e+30 }
 0xa76   :  { %4993 = vmax.xlane.f32.xlu0 %v8998_v50  ;;  %v4695_v56 = vadd.f32 %v8918_v51, %v4694_v55  ;;  %v9009_v8 = vsel %vm4900_vm0, %v4692_v52, -1e+30 }
 0xa77   :  { %v9004_v54 = vsel %vm4900_vm0, %v4703_v49, -1e+30 }
 0xa78   :  { %4995 = vmax.xlane.f32.xlu1 %v9004_v54  ;;  %v9014_v61 = vsel %vm4900_vm0, %v4695_v56, -1e+30 }
 0xa7a   :  { %4989 = vmax.xlane.f32.xlu0 %v9009_v8 }
 0xa7c   :  { %4991 = vmax.xlane.f32.xlu1 %v9014_v61 }
 0xa82   :  { %v6587_v63 = vpop.f32.mrb[88].mxu0 }
 0xa83   :  { %v4716_v59 = vadd.f32 %v6587_v63, %v8918_v51  ;;  %v4707_v1 = vpop.f32.mrb[89].mxu0 }
 0xa84   :  { %v6588_v12 = vpop.f32.mrb[90].mxu0  ;;  %v4708_v3 = vadd.f32 %v8918_v51, %v4707_v1 }
 0xa85   :  { %v4719_v62 = vadd.f32 %v6588_v12, %v8918_v51  ;;  %v4710_v4 = vpop.f32.mrb[91].mxu0  ;;  %v9022_v11 = vsel %vm4900_vm0, %v4716_v59, -1e+30 }
 0xa86   :  { %5001 = vmax.xlane.f32.xlu0 %v9022_v11  ;;  %v4711_v18 = vadd.f32 %v8918_v51, %v4710_v4  ;;  %v9033_v13 = vsel %vm4900_vm0, %v4708_v3, -1e+30 }
 0xa87   :  { %v9028_v15 = vsel %vm4900_vm0, %v4719_v62, -1e+30 }
 0xa88   :  { %5003 = vmax.xlane.f32.xlu1 %v9028_v15  ;;  %v9038_v60 = vsel %vm4900_vm0, %v4711_v18, -1e+30 }
 0xa8a   :  { %4997 = vmax.xlane.f32.xlu0 %v9033_v13 }
 0xa8c   :  { %4999 = vmax.xlane.f32.xlu1 %v9038_v60 }
 0xa92   :  { %v6591_v20 = vpop.f32.mrb[92].mxu0 }
 0xa93   :  { %v4732_v17 = vadd.f32 %v6591_v20, %v8918_v51  ;;  %v4723_v6 = vpop.f32.mrb[93].mxu0 }
 0xa94   :  { %v6592_v31 = vpop.f32.mrb[94].mxu0  ;;  %v4724_v26 = vadd.f32 %v8918_v51, %v4723_v6 }
 0xa95   :  { %v4735_v40 = vadd.f32 %v6592_v31, %v8918_v51  ;;  %v4726_v21 = vpop.f32.mrb[95].mxu0  ;;  %v9046_v27 = vsel %vm4900_vm0, %v4732_v17, -1e+30 }
 0xa96   :  { %5009 = vmax.xlane.f32.xlu0 %v9046_v27  ;;  %v4727_v9 = vadd.f32 %v8918_v51, %v4726_v21  ;;  %v9057_v38 = vsel %vm4900_vm0, %v4724_v26, -1e+30 }
 0xa97   :  { %v9052_v36 = vsel %vm4900_vm0, %v4735_v40, -1e+30 }
 0xa98   :  { %5011 = vmax.xlane.f32.xlu1 %v9052_v36  ;;  %v9062_v32 = vsel %vm4900_vm0, %v4727_v9, -1e+30 }
 0xa9a   :  { %5005 = vmax.xlane.f32.xlu0 %v9057_v38 }
 0xa9c   :  { %5007 = vmax.xlane.f32.xlu1 %v9062_v32 }
 0xaa2   :  { %v6595_v25 = vpop.f32.mrb[96].mxu0 }
 0xaa3   :  { %v4748_v48 = vadd.f32 %v6595_v25, %v8918_v51  ;;  %v4739_v23 = vpop.f32.mrb[97].mxu0 }
 0xaa4   :  { %v6596_v22 = vpop.f32.mrb[98].mxu0  ;;  %v4740_v47 = vadd.f32 %v8918_v51, %v4739_v23 }
 0xaa5   :  { %v4751_v57 = vadd.f32 %v6596_v22, %v8918_v51  ;;  %v4742_v53 = vpop.f32.mrb[99].mxu0  ;;  %v9070_v0 = vsel %vm4900_vm0, %v4748_v48, -1e+30 }
 0xaa6   :  { %5017 = vmax.xlane.f32.xlu0 %v9070_v0  ;;  %v4743_v28 = vadd.f32 %v8918_v51, %v4742_v53  ;;  %v9081_v33 = vsel %vm4900_vm0, %v4740_v47, -1e+30 }
 0xaa7   :  { %v9076_v30 = vsel %vm4900_vm0, %v4751_v57, -1e+30 }
 0xaa8   :  { %5019 = vmax.xlane.f32.xlu1 %v9076_v30  ;;  %v9086_v34 = vsel %vm4900_vm0, %v4743_v28, -1e+30 }
 0xaaa   :  { %5013 = vmax.xlane.f32.xlu0 %v9081_v33 }
 0xaac   :  { %5015 = vmax.xlane.f32.xlu1 %v9086_v34 }
 0xab2   :  { %v6599_v37 = vpop.f32.mrb[100].mxu0 }
 0xab3   :  { %v4764_v2 = vadd.f32 %v6599_v37, %v8918_v51  ;;  %v4755_v39 = vpop.f32.mrb[101].mxu0 }
 0xab4   :  { %v6600_v44 = vpop.f32.mrb[102].mxu0  ;;  %v4756_v46 = vadd.f32 %v8918_v51, %v4755_v39 }
 0xab5   :  { %v4767_v43 = vadd.f32 %v6600_v44, %v8918_v51  ;;  %v4758_v52 = vpop.f32.mrb[103].mxu0  ;;  %v9094_v49 = vsel %vm4900_vm0, %v4764_v2, -1e+30 }
 0xab6   :  { %5025 = vmax.xlane.f32.xlu0 %v9094_v49  ;;  %v4759_v55 = vadd.f32 %v8918_v51, %v4758_v52  ;;  %v9105_v63 = vsel %vm4900_vm0, %v4756_v46, -1e+30 }
 0xab7   :  { %v9100_v56 = vsel %vm4900_vm0, %v4767_v43, -1e+30 }
 0xab8   :  { %5027 = vmax.xlane.f32.xlu1 %v9100_v56  ;;  %v9110_v59 = vsel %vm4900_vm0, %v4759_v55, -1e+30 }
 0xaba   :  { %5021 = vmax.xlane.f32.xlu0 %v9105_v63 }
 0xabc   :  { %5023 = vmax.xlane.f32.xlu1 %v9110_v59 }
 0xac2   :  { %v6603_v1 = vpop.f32.mrb[104].mxu0 }
 0xac3   :  { %v4780_v12 = vadd.f32 %v6603_v1, %v8918_v51  ;;  %v4771_v3 = vpop.f32.mrb[105].mxu0 }
 0xac4   :  { %v6604_v62 = vpop.f32.mrb[106].mxu0  ;;  %v4772_v4 = vadd.f32 %v8918_v51, %v4771_v3 }
 0xac5   :  { %v4783_v18 = vadd.f32 %v6604_v62, %v8918_v51  ;;  %v4774_v20 = vpop.f32.mrb[107].mxu0  ;;  %v9118_v17 = vsel %vm4900_vm0, %v4780_v12, -1e+30 }
 0xac6   :  { %5033 = vmax.xlane.f32.xlu0 %v9118_v17  ;;  %v4775_v6 = vadd.f32 %v8918_v51, %v4774_v20  ;;  %v9129_v26 = vsel %vm4900_vm0, %v4772_v4, -1e+30 }
 0xac7   :  { %v9124_v31 = vsel %vm4900_vm0, %v4783_v18, -1e+30 }
 0xac8   :  { %5035 = vmax.xlane.f32.xlu1 %v9124_v31  ;;  %v9134_v40 = vsel %vm4900_vm0, %v4775_v6, -1e+30 }
 0xaca   :  { %5029 = vmax.xlane.f32.xlu0 %v9129_v26 }
 0xacc   :  { %5031 = vmax.xlane.f32.xlu1 %v9134_v40 }
 0xad2   :  { %v6607_v21 = vpop.f32.mrb[108].mxu0 }
 0xad3   :  { %v4796_v9 = vadd.f32 %v6607_v21, %v8918_v51  ;;  %v4970_v25 = vpop.xlane.xlu1 %4969  ;;  %v4787_v48 = vpop.f32.mrb[109].mxu0 }
 0xad4   :  { %v5095_v23 = vsub.f32 %v8926_v5, %v4970_v25  ;;  %v6608_v22 = vpop.f32.mrb[110].mxu0  ;;  %v4966_v47 = vpop.xlane.xlu0 %4965  ;;  %v4788_v57 = vadd.f32 %v8918_v51, %v4787_v48 }
 0xad5   :  { %v4799_v53 = vadd.f32 %v6608_v22, %v8918_v51  ;;  %v5093_v28 = vsub.f32 %v8932_v14, %v4966_v47  ;;  %v4790_v37 = vpop.f32.mrb[111].mxu0  ;;  %v9144_v2 = vsel %vm4900_vm0, %v4796_v9, -1e+30 }
 0xad6   :  { %v5161_v39 = vmul.f32 1.442695, %v5095_v23  ;;  %5041 = vmax.xlane.f32.xlu0 %v9144_v2  ;;  %v4791_v46 = vadd.f32 %v8918_v51, %v4790_v37  ;;  %v9157_v1 = vsel %vm4900_vm0, %v4788_v57, -1e+30 }
 0xad7   :  { %v5157_v44 = vmul.f32 1.442695, %v5093_v28  ;;  %v4972_v5 = vpop.xlane.xlu1 %4971  ;;  %v9150_v43 = vsel %vm4900_vm0, %v4799_v53, -1e+30 }
 0xad8   :  { %7540 = vpow2.f32 %v5161_v39  ;;  %v5096_v52 = vsub.f32 %v8937_v10, %v4972_v5  ;;  %5043 = vmax.xlane.f32.xlu1 %v9150_v43  ;;  %v4968_v14 = vpop.xlane.xlu0 %4967  ;;  %v9162_v3 = vsel %vm4900_vm0, %v4791_v46, -1e+30 }
 0xad9   :  { %v5094_v55 = vsub.f32 %v8942_v7, %v4968_v14  ;;  %7542 = vpow2.f32 %v5157_v44 }
 0xada   :  { %v5163_v12 = vmul.f32 1.442695, %v5096_v52  ;;  %5037 = vmax.xlane.f32.xlu0 %v9157_v1 }
 0xadb   :  { %v5159_v62 = vmul.f32 1.442695, %v5094_v55 }
 0xadc   :  { %7544 = vpow2.f32 %v5163_v12  ;;  %5039 = vmax.xlane.f32.xlu1 %v9162_v3 }
 0xadd   :  { %7546 = vpow2.f32 %v5159_v62 }
 0xae2   :  { %v9165_v10 = vpop.eup %7540  ;;  %v6611_v7 = vpop.f32.mrb[112].mxu0 }
 0xae3   :  { %v4803_v4 = vpop.f32.mrb[113].mxu0  ;;  %5289 = vadd.xlane.f32.xlu0 %v9165_v10  ;;  %v4978_v18 = vpop.xlane.xlu0 %4977  ;;  %v4812_v23 = vadd.f32 %v6611_v7, %v8918_v51 }
 0xae4   :  { %v5099_v20 = vsub.f32 %v8950_v58, %v4978_v18  ;;  %v6612_v6 = vpop.f32.mrb[114].mxu0  ;;  %v9169_v21 = vpop.eup %7542  ;;  %v4804_v28 = vadd.f32 %v8918_v51, %v4803_v4 }
 0xae5   :  { %v4980_v9 = vpop.xlane.xlu1 %4979  ;;  %v4806_v25 = vpop.f32.mrb[115].mxu0  ;;  %v4815_v44 = vadd.f32 %v6612_v6, %v8918_v51 }
 0xae6   :  { %v9171_v48 = vpop.eup %7544  ;;  %v5169_v22 = vmul.f32 1.442695, %v5099_v20  ;;  %v5100_v47 = vsub.f32 %v8956_v35, %v4980_v9  ;;  %v9185_v35 = vsel %vm4900_vm0, %v4812_v23, -1e+30  ;;  %v4807_v52 = vadd.f32 %v8918_v51, %v4806_v25 }
 0xae7   :  { %5291 = vadd.xlane.f32.xlu1 %v9171_v48  ;;  %5285 = vadd.xlane.f32.xlu0 %v9169_v21  ;;  %v4974_v57 = vpop.xlane.xlu0 %4973  ;;  %v9179_v39 = vpop.eup %7546  ;;  %v9192_v14 = vsel %vm4900_vm0, %v4804_v28, -1e+30 }
 0xae8   :  { %7548 = vpow2.f32 %v5169_v22  ;;  %v5171_v53 = vmul.f32 1.442695, %v5100_v47  ;;  %v5097_v58 = vsub.f32 %v8961_v16, %v4974_v57  ;;  %v9204_v62 = vsel %vm4900_vm0, %v4807_v52, -1e+30 }
 0xae9   :  { %v4976_v37 = vpop.xlane.xlu1 %4975 }
 0xaea   :  { %v5165_v46 = vmul.f32 1.442695, %v5097_v58  ;;  %v5098_v5 = vsub.f32 %v8966_v24, %v4976_v37  ;;  %7550 = vpow2.f32 %v5171_v53  ;;  %v9196_v24 = vsel %vm4900_vm0, %v4815_v44, -1e+30 }
 0xaeb   :  { %5049 = vmax.xlane.f32.xlu0 %v9185_v35  ;;  %5287 = vadd.xlane.f32.xlu1 %v9179_v39 }
 0xaec   :  { %7552 = vpow2.f32 %v5165_v46  ;;  %v5167_v16 = vmul.f32 1.442695, %v5098_v5 }
 0xaee   :  { %7554 = vpow2.f32 %v5167_v16 }
 0xaef   :  { %5045 = vmax.xlane.f32.xlu0 %v9192_v14  ;;  %5051 = vmax.xlane.f32.xlu1 %v9196_v24 }
 0xaf2   :  { %v9200_v55 = vpop.eup %7548  ;;  %v6615_v12 = vpop.f32.mrb[116].mxu0 }
 0xaf3   :  { %v4819_v7 = vpop.f32.mrb[117].mxu0  ;;  %5047 = vmax.xlane.f32.xlu1 %v9204_v62  ;;  %5297 = vadd.xlane.f32.xlu0 %v9200_v55  ;;  %v4986_v4 = vpop.xlane.xlu0 %4985  ;;  %v4828_v22 = vadd.f32 %v6615_v12, %v8918_v51 }
 0xaf4   :  { %v5103_v18 = vsub.f32 %v8974_v19, %v4986_v4  ;;  %v6616_v20 = vpop.f32.mrb[118].mxu0  ;;  %v9209_v6 = vpop.eup %7550  ;;  %v4820_v28 = vadd.f32 %v8918_v51, %v4819_v7 }
 0xaf5   :  { %v4822_v9 = vpop.f32.mrb[119].mxu0  ;;  %v4988_v25 = vpop.xlane.xlu1 %4987  ;;  %v4831_v46 = vadd.f32 %v6616_v20, %v8918_v51 }
 0xaf6   :  { %v9211_v23 = vpop.eup %7552  ;;  %v5177_v47 = vmul.f32 1.442695, %v5103_v18  ;;  %v5104_v57 = vsub.f32 %v8980_v41, %v4988_v25  ;;  %v9225_v41 = vsel %vm4900_vm0, %v4828_v22, -1e+30  ;;  %v4823_v52 = vadd.f32 %v8918_v51, %v4822_v9 }
 0xaf7   :  { %5299 = vadd.xlane.f32.xlu1 %v9209_v6  ;;  %5293 = vadd.xlane.f32.xlu0 %v9211_v23  ;;  %v4982_v53 = vpop.xlane.xlu0 %4981  ;;  %v9232_v12 = vsel %vm4900_vm0, %v4831_v46, -1e+30 }
 0xaf8   :  { %7556 = vpow2.f32 %v5177_v47  ;;  %v5179_v58 = vmul.f32 1.442695, %v5104_v57  ;;  %v5101_v19 = vsub.f32 %v8985_v42, %v4982_v53  ;;  %v9219_v44 = vpop.eup %7554  ;;  %v9244_v18 = vsel %vm4900_vm0, %v4823_v52, -1e+30 }
 0xaf9   :  { %v4984_v37 = vpop.xlane.xlu1 %4983 }
 0xafa   :  { %v5173_v5 = vmul.f32 1.442695, %v5101_v19  ;;  %v5102_v16 = vsub.f32 %v8990_v29, %v4984_v37  ;;  %7558 = vpow2.f32 %v5179_v58  ;;  %v9236_v29 = vsel %vm4900_vm0, %v4820_v28, -1e+30 }
 0xafb   :  { %5295 = vadd.xlane.f32.xlu1 %v9219_v44  ;;  %5057 = vmax.xlane.f32.xlu0 %v9225_v41 }
 0xafc   :  { %7560 = vpow2.f32 %v5173_v5  ;;  %v5175_v42 = vmul.f32 1.442695, %v5102_v16 }
 0xafe   :  { %7562 = vpow2.f32 %v5175_v42 }
 0xaff   :  { %5059 = vmax.xlane.f32.xlu1 %v9232_v12  ;;  %5053 = vmax.xlane.f32.xlu0 %v9236_v29 }
 0xb02   :  { %v9240_v7 = vpop.eup %7556  ;;  %v6619_v4 = vpop.f32.mrb[120].mxu0 }
 0xb03   :  { %v4835_v20 = vpop.f32.mrb[121].mxu0  ;;  %5055 = vmax.xlane.f32.xlu1 %v9244_v18  ;;  %5305 = vadd.xlane.f32.xlu0 %v9240_v7  ;;  %v4994_v9 = vpop.xlane.xlu0 %4993  ;;  %v4844_v19 = vadd.f32 %v6619_v4, %v8918_v51 }
 0xb04   :  { %v5107_v25 = vsub.f32 %v8998_v50, %v4994_v9  ;;  %v6620_v22 = vpop.f32.mrb[122].mxu0  ;;  %v9249_v47 = vpop.eup %7558  ;;  %v4836_v16 = vadd.f32 %v8918_v51, %v4835_v20 }
 0xb05   :  { %v4838_v57 = vpop.f32.mrb[123].mxu0  ;;  %v4996_v53 = vpop.xlane.xlu1 %4995  ;;  %v4847_v9 = vadd.f32 %v6620_v22, %v8918_v51 }
 0xb06   :  { %v9251_v58 = vpop.eup %7560  ;;  %v5185_v28 = vmul.f32 1.442695, %v5107_v25  ;;  %v5108_v37 = vsub.f32 %v9004_v54, %v4996_v53  ;;  %v9265_v54 = vsel %vm4900_vm0, %v4844_v19, -1e+30  ;;  %v4839_v20 = vadd.f32 %v8918_v51, %v4838_v57 }
 0xb07   :  { %9855 = vst [vmem:[#allocation22_spill] sm:$0xff] %v9251_v58  ;;  %5307 = vadd.xlane.f32.xlu1 %v9249_v47  ;;  %5301 = vadd.xlane.f32.xlu0 %v9251_v58  ;;  %v4990_v46 = vpop.xlane.xlu0 %4989  ;;  %v9272_v53 = vsel %vm4900_vm0, %v4847_v9, -1e+30 }
 0xb08   :  { %7564 = vpow2.f32 %v5185_v28  ;;  %v5187_v5 = vmul.f32 1.442695, %v5108_v37  ;;  %v5105_v50 = vsub.f32 %v9009_v8, %v4990_v46  ;;  %v9259_v52 = vpop.eup %7562  ;;  %v9284_v28 = vsel %vm4900_vm0, %v4839_v20, -1e+30 }
 0xb09   :  { %v4992_v42 = vpop.xlane.xlu1 %4991  ;;  %9856 = vst [vmem:[#allocation23_spill] sm:$0xff] %v9259_v52  ;;  %9858 = vst [vmem:[#allocation25_spill] sm:$0xff] %v9284_v28 }
 0xb0a   :  { %v5181_v4 = vmul.f32 1.442695, %v5105_v50  ;;  %v5106_v25 = vsub.f32 %v9014_v61, %v4992_v42  ;;  %7566 = vpow2.f32 %v5187_v5  ;;  %v9276_v61 = vsel %vm4900_vm0, %v4836_v16, -1e+30 }
 0xb0b   :  { %5303 = vadd.xlane.f32.xlu1 %v9259_v52  ;;  %5065 = vmax.xlane.f32.xlu0 %v9265_v54 }
 0xb0c   :  { %7568 = vpow2.f32 %v5181_v4  ;;  %v5183_v8 = vmul.f32 1.442695, %v5106_v25 }
 0xb0e   :  { %7570 = vpow2.f32 %v5183_v8 }
 0xb0f   :  { %5067 = vmax.xlane.f32.xlu1 %v9272_v53  ;;  %5061 = vmax.xlane.f32.xlu0 %v9276_v61 }
 0xb12   :  { %v9280_v22 = vpop.eup %7564  ;;  %v6623_v19 = vpop.f32.mrb[124].mxu0 }
 0xb13   :  { %9857 = vst [vmem:[#allocation24_spill] sm:$0xff] %v9280_v22  ;;  %v4851_v57 = vpop.f32.mrb[125].mxu0  ;;  %5063 = vmax.xlane.f32.xlu1 %v9284_v28  ;;  %5313 = vadd.xlane.f32.xlu0 %v9280_v22  ;;  %v5002_v37 = vpop.xlane.xlu0 %5001  ;;  %v4860_v4 = vadd.f32 %v6623_v19, %v8918_v51 }
 0xb14   :  { %v5111_v46 = vsub.f32 %v9022_v11, %v5002_v37  ;;  %v6624_v5 = vpop.f32.mrb[126].mxu0  ;;  %v9289_v50 = vpop.eup %7566  ;;  %v4852_v37 = vadd.f32 %v8918_v51, %v4851_v57 }
 0xb15   :  { %v4854_v16 = vpop.f32.mrb[127].mxu0  ;;  %v5004_v42 = vpop.xlane.xlu1 %5003  ;;  %v4863_v28 = vadd.f32 %v6624_v5, %v8918_v51 }
 0xb16   :  { %v9291_v9 = vpop.eup %7568  ;;  %v5193_v25 = vmul.f32 1.442695, %v5111_v46  ;;  %v5112_v8 = vsub.f32 %v9028_v15, %v5004_v42  ;;  %v9305_v15 = vsel %vm4900_vm0, %v4860_v4, -1e+30  ;;  %v4855_v57 = vadd.f32 %v8918_v51, %v4854_v16 }
 0xb17   :  { %9859 = vst [vmem:[#allocation26_spill] sm:$0xff] %v9291_v9  ;;  %5315 = vadd.xlane.f32.xlu1 %v9289_v50  ;;  %5309 = vadd.xlane.f32.xlu0 %v9291_v9  ;;  %v4998_v20 = vpop.xlane.xlu0 %4997  ;;  %v9312_v42 = vsel %vm4900_vm0, %v4863_v28, -1e+30 }
 0xb18   :  { %7572 = vpow2.f32 %v5193_v25  ;;  %v5195_v22 = vmul.f32 1.442695, %v5112_v8  ;;  %v5109_v11 = vsub.f32 %v9033_v13, %v4998_v20  ;;  %v9299_v58 = vpop.eup %7570  ;;  %v9324_v5 = vsel %vm4900_vm0, %v4855_v57, -1e+30 }
 0xb19   :  { %v5000_v52 = vpop.xlane.xlu1 %4999  ;;  %9860 = vst [vmem:[#allocation27_spill] sm:$0xff] %v9299_v58 }
 0xb1a   :  { %v5189_v19 = vmul.f32 1.442695, %v5109_v11  ;;  %v5110_v46 = vsub.f32 %v9038_v60, %v5000_v52  ;;  %7574 = vpow2.f32 %v5195_v22  ;;  %v9316_v60 = vsel %vm4900_vm0, %v4852_v37, -1e+30 }
 0xb1b   :  { %5311 = vadd.xlane.f32.xlu1 %v9299_v58  ;;  %5073 = vmax.xlane.f32.xlu0 %v9305_v15 }
 0xb1c   :  { %7576 = vpow2.f32 %v5189_v19  ;;  %v5191_v13 = vmul.f32 1.442695, %v5110_v46 }
 0xb1e   :  { %7578 = vpow2.f32 %v5191_v13 }
 0xb1f   :  { %5075 = vmax.xlane.f32.xlu1 %v9312_v42  ;;  %5069 = vmax.xlane.f32.xlu0 %v9316_v60 }
 0xb22   :  { %v9320_v52 = vpop.eup %7572  ;;  %v6627_v22 = vpop.f32.mrb[128].mxu0 }
 0xb23   :  { %9861 = vst [vmem:[#allocation28_spill] sm:$0xff] %v9320_v52  ;;  %v4867_v16 = vpop.f32.mrb[129].mxu0  ;;  %5071 = vmax.xlane.f32.xlu1 %v9324_v5  ;;  %5321 = vadd.xlane.f32.xlu0 %v9320_v52  ;;  %v5010_v28 = vpop.xlane.xlu0 %5009  ;;  %v4876_v37 = vadd.f32 %v6627_v22, %v8918_v51 }
 0xb24   :  { %v6628_v4 = vpop.f32.mrb[130].mxu0  ;;  %v9328_v25 = vpop.eup %7574  ;;  %v4868_v13 = vadd.f32 %v8918_v51, %v4867_v16 }
 0xb25   :  { %9862 = vst [vmem:[#allocation29_spill] sm:$0xff] %v9328_v25  ;;  %v4870_v8 = vpop.f32.mrb[131].mxu0  ;;  %v5012_v20 = vpop.xlane.xlu1 %5011  ;;  %v4879_v57 = vadd.f32 %v6628_v4, %v8918_v51  ;;  %v9341_v58 = vsel %vm4900_vm0, %v4876_v37, -1e+30  ;;  %v5115_v37 = vsub.f32 %v9046_v27, %v5010_v28 }
 0xb26   :  { %v9330_v11 = vpop.eup %7576  ;;  %v9354_v4 = vsel %vm4900_vm0, %v4868_v13, -1e+30 }
 0xb27   :  { %9863 = vst [vmem:[#allocation30_spill] sm:$0xff] %v9330_v11  ;;  %5323 = vadd.xlane.f32.xlu1 %v9328_v25  ;;  %5317 = vadd.xlane.f32.xlu0 %v9330_v11  ;;  %v5006_v19 = vpop.xlane.xlu0 %5005  ;;  %v4871_v11 = vadd.f32 %v8918_v51, %v4870_v8  ;;  %v9350_v16 = vsel %vm4900_vm0, %v4879_v57, -1e+30 }
 0xb28   :  { %v9335_v46 = vpop.eup %7578  ;;  %v5113_v9 = vsub.f32 %v9057_v38, %v5006_v19  ;;  %v5116_v38 = vsub.f32 %v9052_v36, %v5012_v20  ;;  %v5201_v19 = vmul.f32 1.442695, %v5115_v37 }
 0xb29   :  { %9864 = vst [vmem:[#allocation31_spill] sm:$0xff] %v9335_v46  ;;  %v5008_v52 = vpop.xlane.xlu1 %5007  ;;  %v9362_v8 = vsel %vm4900_vm0, %v4871_v11, -1e+30 }
 0xb2a   :  { %v5114_v22 = vsub.f32 %v9062_v32, %v5008_v52  ;;  %v5197_v25 = vmul.f32 1.442695, %v5113_v9  ;;  %v5203_v9 = vmul.f32 1.442695, %v5116_v38 }
 0xb2b   :  { %5319 = vadd.xlane.f32.xlu1 %v9335_v46  ;;  %5081 = vmax.xlane.f32.xlu0 %v9341_v58 }
 0xb2c   :  { %v5199_v32 = vmul.f32 1.442695, %v5114_v22  ;;  %7580 = vpow2.f32 %v5197_v25 }
 0xb2e   :  { %7582 = vpow2.f32 %v5199_v32 }
 0xb2f   :  { %5083 = vmax.xlane.f32.xlu1 %v9350_v16  ;;  %5077 = vmax.xlane.f32.xlu0 %v9354_v4  ;;  %7584 = vpow2.f32 %v5201_v19 }
 0xb30   :  { %7586 = vpow2.f32 %v5203_v9 }
 0xb32   :  { %v6631_v52 = vpop.f32.mrb[132].mxu0 }
 0xb33   :  { %v4892_v13 = vadd.f32 %v6631_v52, %v8918_v51  ;;  %v4883_v57 = vpop.f32.mrb[133].mxu0  ;;  %5079 = vmax.xlane.f32.xlu1 %v9362_v8  ;;  %v5018_v27 = vpop.xlane.xlu0 %5017 }
 0xb34   :  { %v5119_v28 = vsub.f32 %v9070_v0, %v5018_v27  ;;  %v6632_v46 = vpop.f32.mrb[134].mxu0  ;;  %v4884_v36 = vadd.f32 %v8918_v51, %v4883_v57 }
 0xb35   :  { %v4895_v20 = vadd.f32 %v6632_v46, %v8918_v51  ;;  %v4886_v22 = vpop.f32.mrb[135].mxu0  ;;  %v5020_v11 = vpop.xlane.xlu1 %5019  ;;  %v9371_v25 = vsel %vm4900_vm0, %v4892_v13, -1e+30 }
 0xb36   :  { %v5120_v37 = vsub.f32 %v9076_v30, %v5020_v11  ;;  %5089 = vmax.xlane.f32.xlu0 %v9371_v25  ;;  %v5209_v38 = vmul.f32 1.442695, %v5119_v28  ;;  %v4887_v0 = vadd.f32 %v8918_v51, %v4886_v22  ;;  %v9384_v30 = vsel %vm4900_vm0, %v4884_v36, -1e+30 }
 0xb37   :  { %v5014_v52 = vpop.xlane.xlu0 %5013  ;;  %v9378_v32 = vsel %vm4900_vm0, %v4895_v20, -1e+30 }
 0xb38   :  { %v5117_v46 = vsub.f32 %v9081_v33, %v5014_v52  ;;  %5091 = vmax.xlane.f32.xlu1 %v9378_v32  ;;  %v5211_v13 = vmul.f32 1.442695, %v5120_v37  ;;  %7588 = vpow2.f32 %v5209_v38  ;;  %v9390_v27 = vsel %vm4900_vm0, %v4887_v0, -1e+30  ;;  %v9393_v33 = vpop.eup %7580 }
 0xb39   :  { %v5016_v57 = vpop.xlane.xlu1 %5015  ;;  %v9396_v28 = vpop.eup %7582 }
 0xb3a   :  { %v5118_v19 = vsub.f32 %v9086_v34, %v5016_v57  ;;  %5085 = vmax.xlane.f32.xlu0 %v9384_v30  ;;  %v5205_v51 = vmul.f32 1.442695, %v5117_v46  ;;  %7590 = vpow2.f32 %v5211_v13  ;;  %v9399_v34 = vpop.eup %7584 }
 0xb3b   :  { %v9402_v45 = vpop.eup %7586 }
 0xb3c   :  { %5087 = vmax.xlane.f32.xlu1 %v9390_v27  ;;  %v5207_v9 = vmul.f32 1.442695, %v5118_v19  ;;  %7592 = vpow2.f32 %v5205_v51 }
 0xb3e   :  { %5325 = vadd.xlane.f32.xlu0 %v9393_v33  ;;  %7594 = vpow2.f32 %v5207_v9 }
 0xb40   :  { %5327 = vadd.xlane.f32.xlu1 %v9396_v28 }
 0xb42   :  { %5329 = vadd.xlane.f32.xlu0 %v9399_v34  ;;  %v9406_v22 = vpop.eup %7588 }
 0xb43   :  { %v5026_v36 = vpop.xlane.xlu0 %5025 }
 0xb44   :  { %v5123_v20 = vsub.f32 %v9094_v49, %v5026_v36  ;;  %5331 = vadd.xlane.f32.xlu1 %v9402_v45  ;;  %v9410_v0 = vpop.eup %7590 }
 0xb45   :  { %v5028_v11 = vpop.xlane.xlu1 %5027 }
 0xb46   :  { %v5217_v37 = vmul.f32 1.442695, %v5123_v20  ;;  %v5124_v38 = vsub.f32 %v9100_v56, %v5028_v11  ;;  %5337 = vadd.xlane.f32.xlu0 %v9406_v22  ;;  %v9414_v49 = vpop.eup %7592 }
 0xb47   :  { %v5022_v52 = vpop.xlane.xlu0 %5021 }
 0xb48   :  { %7596 = vpow2.f32 %v5217_v37  ;;  %v5219_v46 = vmul.f32 1.442695, %v5124_v38  ;;  %v5121_v13 = vsub.f32 %v9105_v63, %v5022_v52  ;;  %5339 = vadd.xlane.f32.xlu1 %v9410_v0  ;;  %v9418_v56 = vpop.eup %7594 }
 0xb49   :  { %v5024_v57 = vpop.xlane.xlu1 %5023 }
 0xb4a   :  { %7598 = vpow2.f32 %v5219_v46  ;;  %v5213_v19 = vmul.f32 1.442695, %v5121_v13  ;;  %v5122_v51 = vsub.f32 %v9110_v59, %v5024_v57  ;;  %5333 = vadd.xlane.f32.xlu0 %v9414_v49 }
 0xb4c   :  { %7600 = vpow2.f32 %v5213_v19  ;;  %v5215_v9 = vmul.f32 1.442695, %v5122_v51  ;;  %5335 = vadd.xlane.f32.xlu1 %v9418_v56 }
 0xb4e   :  { %7602 = vpow2.f32 %v5215_v9 }
 0xb52   :  { %v9421_v36 = vpop.eup %7596 }
 0xb53   :  { %5345 = vadd.xlane.f32.xlu0 %v9421_v36  ;;  %v5034_v63 = vpop.xlane.xlu0 %5033 }
 0xb54   :  { %v9424_v20 = vpop.eup %7598  ;;  %v5127_v11 = vsub.f32 %v9118_v17, %v5034_v63 }
 0xb55   :  { %v5036_v37 = vpop.xlane.xlu1 %5035  ;;  %5347 = vadd.xlane.f32.xlu1 %v9424_v20 }
 0xb56   :  { %v9428_v59 = vpop.eup %7600  ;;  %v5225_v38 = vmul.f32 1.442695, %v5127_v11  ;;  %v5128_v52 = vsub.f32 %v9124_v31, %v5036_v37 }
 0xb57   :  { %5341 = vadd.xlane.f32.xlu0 %v9428_v59  ;;  %v5030_v46 = vpop.xlane.xlu0 %5029 }
 0xb58   :  { %v9432_v13 = vpop.eup %7602  ;;  %7604 = vpow2.f32 %v5225_v38  ;;  %v5227_v57 = vmul.f32 1.442695, %v5128_v52  ;;  %v5125_v19 = vsub.f32 %v9129_v26, %v5030_v46 }
 0xb59   :  { %v5032_v51 = vpop.xlane.xlu1 %5031  ;;  %5343 = vadd.xlane.f32.xlu1 %v9432_v13 }
 0xb5a   :  { %7606 = vpow2.f32 %v5227_v57  ;;  %v5221_v17 = vmul.f32 1.442695, %v5125_v19  ;;  %v5126_v9 = vsub.f32 %v9134_v40, %v5032_v51 }
 0xb5c   :  { %7608 = vpow2.f32 %v5221_v17  ;;  %v5223_v63 = vmul.f32 1.442695, %v5126_v9 }
 0xb5e   :  { %7610 = vpow2.f32 %v5223_v63 }
 0xb62   :  { %v9437_v31 = vpop.eup %7604 }
 0xb63   :  { %5353 = vadd.xlane.f32.xlu0 %v9437_v31  ;;  %v5042_v11 = vpop.xlane.xlu0 %5041 }
 0xb64   :  { %v9440_v37 = vpop.eup %7606  ;;  %v5131_v38 = vsub.f32 %v9144_v2, %v5042_v11 }
 0xb65   :  { %v5044_v26 = vpop.xlane.xlu1 %5043  ;;  %5355 = vadd.xlane.f32.xlu1 %v9440_v37 }
 0xb66   :  { %v9444_v52 = vpop.eup %7608  ;;  %v5233_v46 = vmul.f32 1.442695, %v5131_v38  ;;  %v5132_v40 = vsub.f32 %v9150_v43, %v5044_v26 }
 0xb67   :  { %5349 = vadd.xlane.f32.xlu0 %v9444_v52  ;;  %v5038_v57 = vpop.xlane.xlu0 %5037 }
 0xb68   :  { %v9448_v19 = vpop.eup %7610  ;;  %7612 = vpow2.f32 %v5233_v46  ;;  %v5235_v51 = vmul.f32 1.442695, %v5132_v40  ;;  %v5129_v17 = vsub.f32 %v9157_v1, %v5038_v57 }
 0xb69   :  { %v5040_v9 = vpop.xlane.xlu1 %5039  ;;  %5351 = vadd.xlane.f32.xlu1 %v9448_v19 }
 0xb6a   :  { %7614 = vpow2.f32 %v5235_v51  ;;  %v5229_v2 = vmul.f32 1.442695, %v5129_v17  ;;  %v5130_v63 = vsub.f32 %v9162_v3, %v5040_v9 }
 0xb6c   :  { %7616 = vpow2.f32 %v5229_v2  ;;  %v5231_v11 = vmul.f32 1.442695, %v5130_v63 }
 0xb6e   :  { %7618 = vpow2.f32 %v5231_v11 }
 0xb70   :  { %v5290_v43 = vpop.xlane.xlu0 %5289 }
 0xb71   :  { %7620 = vrcp.f32 %v5290_v43 }
 0xb72   :  { %v9453_v38 = vpop.eup %7612 }
 0xb73   :  { %9865 = vst [vmem:[#allocation32_spill] sm:$0xff] %v9453_v38  ;;  %5361 = vadd.xlane.f32.xlu0 %v9453_v38 }
 0xb74   :  { %v9456_v26 = vpop.eup %7614  ;;  %v5292_v46 = vpop.xlane.xlu1 %5291 }
 0xb75   :  { %9866 = vst [vmem:[#allocation33_spill] sm:$0xff] %v9456_v26  ;;  %v5286_v1 = vpop.xlane.xlu0 %5285  ;;  %7622 = vrcp.f32 %v5292_v46  ;;  %5363 = vadd.xlane.f32.xlu1 %v9456_v26 }
 0xb76   :  { %v9459_v40 = vpop.eup %7616  ;;  %7624 = vrcp.f32 %v5286_v1 }
 0xb77   :  { %9867 = vst [vmem:[#allocation34_spill] sm:$0xff] %v9459_v40  ;;  %5357 = vadd.xlane.f32.xlu0 %v9459_v40 }
 0xb78   :  { %v9462_v3 = vpop.eup %7618  ;;  %v5288_v57 = vpop.xlane.xlu1 %5287 }
 0xb79   :  { %9868 = vst [vmem:[#allocation35_spill] sm:$0xff] %v9462_v3  ;;  %v5050_v51 = vpop.xlane.xlu0 %5049  ;;  %7626 = vrcp.f32 %v5288_v57  ;;  %5359 = vadd.xlane.f32.xlu1 %v9462_v3 }
 0xb7a   :  { %v5135_v17 = vsub.f32 %v9185_v35, %v5050_v51 }
 0xb7b   :  { %v7621_v9 = vpop.eup %7620 }
 0xb7c   :  { %v5241_v2 = vmul.f32 1.442695, %v5135_v17  ;;  %v5418_v63 = vmul.f32 %v7621_v9, %v9165_v10  ;;  %v5052_v11 = vpop.xlane.xlu1 %5051 }
 0xb7d   :  { %v5046_v43 = vpop.xlane.xlu0 %5045  ;;  %v5136_v46 = vsub.f32 %v9196_v24, %v5052_v11 }
 0xb7e   :  { %7628 = vpow2.f32 %v5241_v2  ;;  %v5133_v1 = vsub.f32 %v9192_v14, %v5046_v43  ;;  %5543 = vst [vmem:[#allocation14 + $0x10] sm:$0xff] %v5418_v63 }
 0xb7f   :  { %v7623_v40 = vpop.eup %7622  ;;  %v5243_v26 = vmul.f32 1.442695, %v5136_v46 }
 0xb80   :  { %v5237_v38 = vmul.f32 1.442695, %v5133_v1  ;;  %v7625_v57 = vpop.eup %7624  ;;  %v5420_v35 = vmul.f32 %v7623_v40, %v9171_v48  ;;  %v5048_v51 = vpop.xlane.xlu1 %5047 }
 0xb81   :  { %v5298_v3 = vpop.xlane.xlu0 %5297  ;;  %v5414_v17 = vmul.f32 %v7625_v57, %v9169_v21  ;;  %7630 = vpow2.f32 %v5243_v26  ;;  %v5134_v10 = vsub.f32 %v9204_v62, %v5048_v51 }
 0xb82   :  { %5544 = vst [vmem:[#allocation14 + $0x18] sm:$0xff] %v5420_v35  ;;  %7632 = vpow2.f32 %v5237_v38 }
 0xb83   :  { %v7627_v9 = vpop.eup %7626  ;;  %5541 = vst [vmem:[#allocation14] sm:$0xff] %v5414_v17  ;;  %v5239_v24 = vmul.f32 1.442695, %v5134_v10  ;;  %7634 = vrcp.f32 %v5298_v3 }
 0xb84   :  { %v5416_v14 = vmul.f32 %v7627_v9, %v9179_v39  ;;  %v5300_v2 = vpop.xlane.xlu1 %5299 }
 0xb85   :  { %v5294_v63 = vpop.xlane.xlu0 %5293  ;;  %7636 = vpow2.f32 %v5239_v24 }
 0xb86   :  { %5542 = vst [vmem:[#allocation14 + $0x8] sm:$0xff] %v5416_v14  ;;  %7638 = vrcp.f32 %v5300_v2 }
 0xb87   :  { %7640 = vrcp.f32 %v5294_v63 }
 0xb88   :  { %v9473_v48 = vpop.eup %7628  ;;  %v5296_v21 = vpop.xlane.xlu1 %5295 }
 0xb89   :  { %5369 = vadd.xlane.f32.xlu0 %v9473_v48  ;;  %v5058_v62 = vpop.xlane.xlu0 %5057  ;;  %7642 = vrcp.f32 %v5296_v21 }
 0xb8a   :  { %v5139_v38 = vsub.f32 %v9225_v41, %v5058_v62 }
 0xb8b   :  { %v9477_v26 = vpop.eup %7630 }
 0xb8c   :  { %v5249_v40 = vmul.f32 1.442695, %v5139_v38  ;;  %v9479_v3 = vpop.eup %7632  ;;  %5371 = vadd.xlane.f32.xlu1 %v9477_v26  ;;  %v5060_v39 = vpop.xlane.xlu1 %5059 }
 0xb8d   :  { %v5054_v11 = vpop.xlane.xlu0 %5053  ;;  %v7635_v43 = vpop.eup %7634  ;;  %v5140_v46 = vsub.f32 %v9232_v12, %v5060_v39  ;;  %5365 = vadd.xlane.f32.xlu0 %v9479_v3 }
 0xb8e   :  { %7644 = vpow2.f32 %v5249_v40  ;;  %v5137_v1 = vsub.f32 %v9236_v29, %v5054_v11  ;;  %v5426_v57 = vmul.f32 %v7635_v43, %v9200_v55 }
 0xb8f   :  { %v9486_v41 = vpop.eup %7636  ;;  %v5251_v35 = vmul.f32 1.442695, %v5140_v46 }
 0xb90   :  { %v5245_v51 = vmul.f32 1.442695, %v5137_v1  ;;  %v7639_v17 = vpop.eup %7638  ;;  %5547 = vst [vmem:[#allocation14 + $0x30] sm:$0xff] %v5426_v57  ;;  %5367 = vadd.xlane.f32.xlu1 %v9486_v41  ;;  %v5056_v10 = vpop.xlane.xlu1 %5055 }
 0xb91   :  { %v5306_v9 = vpop.xlane.xlu0 %5305  ;;  %v7641_v24 = vpop.eup %7640  ;;  %v5428_v14 = vmul.f32 %v7639_v17, %v9209_v6  ;;  %7646 = vpow2.f32 %v5251_v35  ;;  %v5138_v12 = vsub.f32 %v9244_v18, %v5056_v10 }
 0xb92   :  { %v5422_v29 = vmul.f32 %v7641_v24, %v9211_v23  ;;  %7648 = vpow2.f32 %v5245_v51 }
 0xb93   :  { %v7643_v55 = vpop.eup %7642  ;;  %5548 = vst [vmem:[#allocation14 + $0x38] sm:$0xff] %v5428_v14  ;;  %v5247_v2 = vmul.f32 1.442695, %v5138_v12  ;;  %7650 = vrcp.f32 %v5306_v9 }
 0xb94   :  { %5545 = vst [vmem:[#allocation14 + $0x20] sm:$0xff] %v5422_v29  ;;  %v5424_v63 = vmul.f32 %v7643_v55, %v9219_v44  ;;  %v5308_v21 = vpop.xlane.xlu1 %5307  ;;  %v9870_v55 = vld [vmem:[#allocation22_spill] sm:$0xff] }
 0xb95   :  { %v5302_v62 = vpop.xlane.xlu0 %5301  ;;  %7652 = vpow2.f32 %v5247_v2 }
 0xb96   :  { %5546 = vst [vmem:[#allocation14 + $0x28] sm:$0xff] %v5424_v63  ;;  %7654 = vrcp.f32 %v5308_v21  ;;  %v9871_v63 = vld [vmem:[#allocation23_spill] sm:$0xff] }
 0xb97   :  { %7656 = vrcp.f32 %v5302_v62 }
 0xb98   :  { %v9493_v38 = vpop.eup %7644  ;;  %v5304_v6 = vpop.xlane.xlu1 %5303 }
 0xb99   :  { %5377 = vadd.xlane.f32.xlu0 %v9493_v38  ;;  %v5066_v23 = vpop.xlane.xlu0 %5065  ;;  %7658 = vrcp.f32 %v5304_v6 }
 0xb9a   :  { %v5143_v18 = vsub.f32 %v9265_v54, %v5066_v23 }
 0xb9b   :  { %v9497_v40 = vpop.eup %7646 }
 0xb9c   :  { %v5257_v39 = vmul.f32 1.442695, %v5143_v18  ;;  %v9499_v11 = vpop.eup %7648  ;;  %5379 = vadd.xlane.f32.xlu1 %v9497_v40  ;;  %v5068_v44 = vpop.xlane.xlu1 %5067 }
 0xb9d   :  { %v5062_v43 = vpop.xlane.xlu0 %5061  ;;  %v7651_v46 = vpop.eup %7650  ;;  %v5144_v1 = vsub.f32 %v9272_v53, %v5068_v44  ;;  %5373 = vadd.xlane.f32.xlu0 %v9499_v11  ;;  %v9869_v53 = vld [vmem:[#allocation25_spill] sm:$0xff] }
 0xb9e   :  { %7660 = vpow2.f32 %v5257_v39  ;;  %v5141_v57 = vsub.f32 %v9276_v61, %v5062_v43  ;;  %v5434_v35 = vmul.f32 %v7651_v46, %v9240_v7 }
 0xb9f   :  { %v9506_v54 = vpop.eup %7652  ;;  %v5259_v51 = vmul.f32 1.442695, %v5144_v1 }
 0xba0   :  { %v5253_v17 = vmul.f32 1.442695, %v5141_v57  ;;  %v7655_v10 = vpop.eup %7654  ;;  %5551 = vst [vmem:[#allocation14 + $0x50] sm:$0xff] %v5434_v35  ;;  %5375 = vadd.xlane.f32.xlu1 %v9506_v54  ;;  %v5064_v9 = vpop.xlane.xlu1 %5063 }
 0xba1   :  { %v5314_v24 = vpop.xlane.xlu0 %5313  ;;  %v7657_v14 = vpop.eup %7656  ;;  %v5436_v12 = vmul.f32 %v7655_v10, %v9249_v47  ;;  %7662 = vpow2.f32 %v5259_v51  ;;  %v5142_v29 = vsub.f32 %v9869_v53, %v5064_v9  ;;  %v9872_v10 = vld [vmem:[#allocation24_spill] sm:$0xff] }
 0xba2   :  { %v5430_v61 = vmul.f32 %v7657_v14, %v9870_v55  ;;  %7664 = vpow2.f32 %v5253_v17 }
 0xba3   :  { %v7659_v7 = vpop.eup %7658  ;;  %5552 = vst [vmem:[#allocation14 + $0x58] sm:$0xff] %v5436_v12  ;;  %v5255_v2 = vmul.f32 1.442695, %v5142_v29  ;;  %7666 = vrcp.f32 %v5314_v24 }
 0xba4   :  { %5549 = vst [vmem:[#allocation14 + $0x40] sm:$0xff] %v5430_v61  ;;  %v5432_v21 = vmul.f32 %v7659_v7, %v9871_v63  ;;  %v5316_v62 = vpop.xlane.xlu1 %5315  ;;  %v9873_v7 = vld [vmem:[#allocation26_spill] sm:$0xff] }
 0xba5   :  { %v5310_v6 = vpop.xlane.xlu0 %5309  ;;  %7668 = vpow2.f32 %v5255_v2 }
 0xba6   :  { %5550 = vst [vmem:[#allocation14 + $0x48] sm:$0xff] %v5432_v21  ;;  %7670 = vrcp.f32 %v5316_v62  ;;  %v9874_v21 = vld [vmem:[#allocation27_spill] sm:$0xff] }
 0xba7   :  { %7672 = vrcp.f32 %v5310_v6 }
 0xba8   :  { %v9513_v23 = vpop.eup %7660  ;;  %v5312_v47 = vpop.xlane.xlu1 %5311 }
 0xba9   :  { %5385 = vadd.xlane.f32.xlu0 %v9513_v23  ;;  %v5074_v18 = vpop.xlane.xlu0 %5073  ;;  %7674 = vrcp.f32 %v5312_v47 }
 0xbaa   :  { %v5147_v39 = vsub.f32 %v9305_v15, %v5074_v18 }
 0xbab   :  { %v9517_v44 = vpop.eup %7662 }
 0xbac   :  { %v5265_v43 = vmul.f32 1.442695, %v5147_v39  ;;  %v9519_v46 = vpop.eup %7664  ;;  %5387 = vadd.xlane.f32.xlu1 %v9517_v44  ;;  %v5076_v1 = vpop.xlane.xlu1 %5075 }
 0xbad   :  { %v5070_v57 = vpop.xlane.xlu0 %5069  ;;  %v7667_v35 = vpop.eup %7666  ;;  %v5148_v51 = vsub.f32 %v9312_v42, %v5076_v1  ;;  %5381 = vadd.xlane.f32.xlu0 %v9519_v46 }
 0xbae   :  { %7676 = vpow2.f32 %v5265_v43  ;;  %v5145_v17 = vsub.f32 %v9316_v60, %v5070_v57  ;;  %v5442_v9 = vmul.f32 %v7667_v35, %v9872_v10 }
 0xbaf   :  { %v9526_v15 = vpop.eup %7668  ;;  %v5267_v24 = vmul.f32 1.442695, %v5148_v51 }
 0xbb0   :  { %v5261_v14 = vmul.f32 1.442695, %v5145_v17  ;;  %v7671_v12 = vpop.eup %7670  ;;  %5555 = vst [vmem:[#allocation14 + $0x70] sm:$0xff] %v5442_v9  ;;  %5383 = vadd.xlane.f32.xlu1 %v9526_v15  ;;  %v5072_v53 = vpop.xlane.xlu1 %5071 }
 0xbb1   :  { %v5322_v29 = vpop.xlane.xlu0 %5321  ;;  %v7673_v55 = vpop.eup %7672  ;;  %v5444_v61 = vmul.f32 %v7671_v12, %v9289_v50  ;;  %7678 = vpow2.f32 %v5267_v24  ;;  %v5146_v42 = vsub.f32 %v9324_v5, %v5072_v53  ;;  %v9875_v24 = vld [vmem:[#allocation28_spill] sm:$0xff] }
 0xbb2   :  { %v5438_v60 = vmul.f32 %v7673_v55, %v9873_v7  ;;  %7680 = vpow2.f32 %v5261_v14 }
 0xbb3   :  { %v7675_v2 = vpop.eup %7674  ;;  %5556 = vst [vmem:[#allocation14 + $0x78] sm:$0xff] %v5444_v61  ;;  %v5263_v63 = vmul.f32 1.442695, %v5146_v42  ;;  %7682 = vrcp.f32 %v5322_v29  ;;  %v9876_v42 = vld [vmem:[#allocation29_spill] sm:$0xff] }
 0xbb4   :  { %5553 = vst [vmem:[#allocation14 + $0x60] sm:$0xff] %v5438_v60  ;;  %v5440_v62 = vmul.f32 %v7675_v2, %v9874_v21  ;;  %v5324_v6 = vpop.xlane.xlu1 %5323  ;;  %v9877_v60 = vld [vmem:[#allocation30_spill] sm:$0xff] }
 0xbb5   :  { %v5318_v47 = vpop.xlane.xlu0 %5317  ;;  %7684 = vpow2.f32 %v5263_v63 }
 0xbb6   :  { %5554 = vst [vmem:[#allocation14 + $0x68] sm:$0xff] %v5440_v62  ;;  %7686 = vrcp.f32 %v5324_v6  ;;  %v9878_v62 = vld [vmem:[#allocation31_spill] sm:$0xff] }
 0xbb7   :  { %7688 = vrcp.f32 %v5318_v47 }
 0xbb8   :  { %v9533_v18 = vpop.eup %7676  ;;  %v5320_v50 = vpop.xlane.xlu1 %5319 }
 0xbb9   :  { %5393 = vadd.xlane.f32.xlu0 %v9533_v18  ;;  %v5082_v5 = vpop.xlane.xlu0 %5081  ;;  %7690 = vrcp.f32 %v5320_v50 }
 0xbba   :  { %v5151_v39 = vsub.f32 %v9341_v58, %v5082_v5 }
 0xbbb   :  { %v9537_v43 = vpop.eup %7678 }
 0xbbc   :  { %v5273_v1 = vmul.f32 1.442695, %v5151_v39  ;;  %v9539_v57 = vpop.eup %7680  ;;  %5395 = vadd.xlane.f32.xlu1 %v9537_v43  ;;  %v5084_v35 = vpop.xlane.xlu1 %5083 }
 0xbbd   :  { %v5078_v51 = vpop.xlane.xlu0 %5077  ;;  %v7683_v17 = vpop.eup %7682  ;;  %v5152_v10 = vsub.f32 %v9350_v16, %v5084_v35  ;;  %5389 = vadd.xlane.f32.xlu0 %v9539_v57 }
 0xbbe   :  { %7692 = vpow2.f32 %v5273_v1  ;;  %v5149_v9 = vsub.f32 %v9354_v4, %v5078_v51  ;;  %v5450_v14 = vmul.f32 %v7683_v17, %v9875_v24 }
 0xbbf   :  { %v9546_v58 = vpop.eup %7684  ;;  %v5275_v12 = vmul.f32 1.442695, %v5152_v10 }
 0xbc0   :  { %v5269_v53 = vmul.f32 1.442695, %v5149_v9  ;;  %v7687_v29 = vpop.eup %7686  ;;  %5559 = vst [vmem:[#allocation14 + $0x90] sm:$0xff] %v5450_v14  ;;  %5391 = vadd.xlane.f32.xlu1 %v9546_v58  ;;  %v5080_v55 = vpop.xlane.xlu1 %5079 }
 0xbc1   :  { %v7689_v61 = vpop.eup %7688  ;;  %v5452_v7 = vmul.f32 %v7687_v29, %v9876_v42  ;;  %7694 = vpow2.f32 %v5275_v12  ;;  %v5150_v16 = vsub.f32 %v9362_v8, %v5080_v55 }
 0xbc2   :  { %v5446_v2 = vmul.f32 %v7689_v61, %v9877_v60  ;;  %7696 = vpow2.f32 %v5269_v53 }
 0xbc3   :  { %v7691_v4 = vpop.eup %7690  ;;  %5560 = vst [vmem:[#allocation14 + $0x98] sm:$0xff] %v5452_v7  ;;  %v5271_v63 = vmul.f32 1.442695, %v5150_v16  ;;  %v5090_v21 = vpop.xlane.xlu0 %5089 }
 0xbc4   :  { %5557 = vst [vmem:[#allocation14 + $0x80] sm:$0xff] %v5446_v2  ;;  %v5448_v6 = vmul.f32 %v7691_v4, %v9878_v62  ;;  %v5155_v47 = vsub.f32 %v9371_v25, %v5090_v21 }
 0xbc5   :  { %7698 = vpow2.f32 %v5271_v63  ;;  %v5092_v50 = vpop.xlane.xlu1 %5091 }
 0xbc6   :  { %5558 = vst [vmem:[#allocation14 + $0x88] sm:$0xff] %v5448_v6  ;;  %v5281_v39 = vmul.f32 1.442695, %v5155_v47  ;;  %v5156_v35 = vsub.f32 %v9378_v32, %v5092_v50 }
 0xbc7   :  { %v5086_v1 = vpop.xlane.xlu0 %5085 }
 0xbc8   :  { %v9554_v5 = vpop.eup %7692  ;;  %v5153_v8 = vsub.f32 %v9384_v30, %v5086_v1  ;;  %7700 = vpow2.f32 %v5281_v39  ;;  %v5283_v12 = vmul.f32 1.442695, %v5156_v35 }
 0xbc9   :  { %5401 = vadd.xlane.f32.xlu0 %v9554_v5  ;;  %v5088_v51 = vpop.xlane.xlu1 %5087 }
 0xbca   :  { %v5277_v17 = vmul.f32 1.442695, %v5153_v8  ;;  %v5154_v10 = vsub.f32 %v9390_v27, %v5088_v51 }
 0xbcb   :  { %v9560_v9 = vpop.eup %7694  ;;  %v5326_v25 = vpop.xlane.xlu0 %5325 }
 0xbcc   :  { %v9562_v24 = vpop.eup %7696  ;;  %7702 = vpow2.f32 %v5277_v17  ;;  %v5279_v14 = vmul.f32 1.442695, %v5154_v10  ;;  %5403 = vadd.xlane.f32.xlu1 %v9560_v9 }
 0xbcd   :  { %7704 = vrcp.f32 %v5326_v25  ;;  %5397 = vadd.xlane.f32.xlu0 %v9562_v24  ;;  %v5328_v30 = vpop.xlane.xlu1 %5327 }
 0xbce   :  { %7706 = vpow2.f32 %v5279_v14 }
 0xbcf   :  { %v9566_v32 = vpop.eup %7698  ;;  %7708 = vrcp.f32 %v5328_v30  ;;  %v5330_v27 = vpop.xlane.xlu0 %5329 }
 0xbd0   :  { %7710 = vrcp.f32 %v5330_v27  ;;  %5399 = vadd.xlane.f32.xlu1 %v9566_v32 }
 0xbd1   :  { %7712 = vpow2.f32 %v5283_v12  ;;  %v5332_v53 = vpop.xlane.xlu1 %5331 }
 0xbd2   :  { %7714 = vrcp.f32 %v5332_v53  ;;  %v9569_v55 = vpop.eup %7700 }
 0xbd3   :  { %v5338_v29 = vpop.xlane.xlu0 %5337 }
 0xbd4   :  { %7716 = vrcp.f32 %v5338_v29 }
 0xbd5   :  { %v5340_v61 = vpop.xlane.xlu1 %5339 }
 0xbd6   :  { %v9571_v42 = vpop.eup %7702  ;;  %7718 = vrcp.f32 %v5340_v61 }
 0xbd7   :  { %v7705_v7 = vpop.eup %7704  ;;  %5405 = vadd.xlane.f32.xlu0 %v9571_v42  ;;  %v5334_v16 = vpop.xlane.xlu0 %5333 }
 0xbd8   :  { %v9574_v60 = vpop.eup %7706  ;;  %v5454_v2 = vmul.f32 %v7705_v7, %v9393_v33  ;;  %7720 = vrcp.f32 %v5334_v16 }
 0xbd9   :  { %v7709_v4 = vpop.eup %7708  ;;  %5407 = vadd.xlane.f32.xlu1 %v9574_v60  ;;  %v5336_v63 = vpop.xlane.xlu1 %5335 }
 0xbda   :  { %v7711_v21 = vpop.eup %7710  ;;  %5561 = vst [vmem:[#allocation14 + $0xa0] sm:$0xff] %v5454_v2  ;;  %v5456_v62 = vmul.f32 %v7709_v4, %v9396_v28  ;;  %7722 = vrcp.f32 %v5336_v63 }
 0xbdb   :  { %v9579_v6 = vpop.eup %7712  ;;  %v5458_v47 = vmul.f32 %v7711_v21, %v9399_v34  ;;  %5409 = vadd.xlane.f32.xlu0 %v9569_v55 }
 0xbdc   :  { %v7715_v50 = vpop.eup %7714  ;;  %5562 = vst [vmem:[#allocation14 + $0xa8] sm:$0xff] %v5456_v62 }
 0xbdd   :  { %5563 = vst [vmem:[#allocation14 + $0xb0] sm:$0xff] %v5458_v47  ;;  %v5460_v33 = vmul.f32 %v7715_v50, %v9402_v45  ;;  %5411 = vadd.xlane.f32.xlu1 %v9579_v6 }
 0xbde   :  { %v7717_v39 = vpop.eup %7716 }
 0xbdf   :  { %5564 = vst [vmem:[#allocation14 + $0xb8] sm:$0xff] %v5460_v33  ;;  %v5466_v1 = vmul.f32 %v7717_v39, %v9406_v22 }
 0xbe0   :  { %v7719_v8 = vpop.eup %7718  ;;  %v5346_v28 = vpop.xlane.xlu0 %5345 }
 0xbe1   :  { %5567 = vst [vmem:[#allocation14 + $0xd0] sm:$0xff] %v5466_v1  ;;  %v5468_v35 = vmul.f32 %v7719_v8, %v9410_v0  ;;  %7724 = vrcp.f32 %v5346_v28 }
 0xbe2   :  { %v7721_v34 = vpop.eup %7720  ;;  %v5348_v51 = vpop.xlane.xlu1 %5347 }
 0xbe3   :  { %5568 = vst [vmem:[#allocation14 + $0xd8] sm:$0xff] %v5468_v35  ;;  %v5462_v17 = vmul.f32 %v7721_v34, %v9414_v49  ;;  %7726 = vrcp.f32 %v5348_v51 }
 0xbe4   :  { %v7723_v10 = vpop.eup %7722  ;;  %v5342_v45 = vpop.xlane.xlu0 %5341 }
 0xbe5   :  { %5565 = vst [vmem:[#allocation14 + $0xc0] sm:$0xff] %v5462_v17  ;;  %v5464_v25 = vmul.f32 %v7723_v10, %v9418_v56  ;;  %7728 = vrcp.f32 %v5342_v45 }
 0xbe6   :  { %v5344_v14 = vpop.xlane.xlu1 %5343 }
 0xbe7   :  { %5566 = vst [vmem:[#allocation14 + $0xc8] sm:$0xff] %v5464_v25  ;;  %7730 = vrcp.f32 %v5344_v14 }
 0xbeb   :  { %v7725_v22 = vpop.eup %7724 }
 0xbec   :  { %v5474_v12 = vmul.f32 %v7725_v22, %v9421_v36 }
 0xbed   :  { %v7727_v0 = vpop.eup %7726 }
 0xbee   :  { %5571 = vst [vmem:[#allocation14 + $0xf0] sm:$0xff] %v5474_v12  ;;  %v5476_v30 = vmul.f32 %v7727_v0, %v9424_v20 }
 0xbef   :  { %v7729_v27 = vpop.eup %7728 }
 0xbf0   :  { %5572 = vst [vmem:[#allocation14 + $0xf8] sm:$0xff] %v5476_v30  ;;  %v5470_v49 = vmul.f32 %v7729_v27, %v9428_v59  ;;  %v5354_v53 = vpop.xlane.xlu0 %5353 }
 0xbf1   :  { %v7731_v29 = vpop.eup %7730  ;;  %7732 = vrcp.f32 %v5354_v53 }
 0xbf2   :  { %5569 = vst [vmem:[#allocation14 + $0xe0] sm:$0xff] %v5470_v49  ;;  %v5472_v56 = vmul.f32 %v7731_v29, %v9432_v13  ;;  %v5356_v61 = vpop.xlane.xlu1 %5355 }
 0xbf3   :  { %7734 = vrcp.f32 %v5356_v61 }
 0xbf4   :  { %5570 = vst [vmem:[#allocation14 + $0xe8] sm:$0xff] %v5472_v56  ;;  %v5350_v7 = vpop.xlane.xlu0 %5349 }
 0xbf5   :  { %7736 = vrcp.f32 %v5350_v7 }
 0xbf6   :  { %v5352_v36 = vpop.xlane.xlu1 %5351 }
 0xbf7   :  { %7738 = vrcp.f32 %v5352_v36 }
 0xbfb   :  { %v7733_v20 = vpop.eup %7732 }
 0xbfc   :  { %8093 = shalt.err (!%p8090_p10)
}
 0xbfd   :  { %s8094_s15 = scalar_lea.hbm %s9659_s7, 4096 }
 0xbfe   :  { %p8095_p11 = scmp.ne.s32.totalorder %s9659_s7, %s8094_s15  ;;  %p8098_p12 = scmp.lt.u32.totalorder %s8094_s15, %s9659_s7 }
 0xc00   :  { %p8100_p13 = pnand %p8098_p12, %p8095_p11 }
 0xc02   :  { %8103 = shalt.err (!%p8100_p13)
}
 0xc03   :  { %5616 = dma.vmem_to_hbm [thread:$0]  %s5611_s22, 4096, %s9659_s7, [#allocation4], %s8143_s28, %s8143_s28, %s8144_s9   ;;  %v5482_v59 = vmul.f32 %v7733_v20, %v9437_v31  ;;  %v7735_v13 = vpop.eup %7734  ;;  %v5362_v63 = vpop.xlane.xlu0 %5361  ;;  %v9879_v39 = vld [vmem:[#allocation32_spill] sm:$0xff]  ;;  %v9880_v8 = vld [vmem:[#allocation33_spill] sm:$0xff]  ;;  %v9881_v35 = vld [vmem:[#allocation34_spill] sm:$0xff] }
 0xc04   :  { %v5484_v16 = vmul.f32 %v7735_v13, %v9440_v37  ;;  %v7737_v2 = vpop.eup %7736  ;;  %7740 = vrcp.f32 %v5362_v63  ;;  %v5364_v47 = vpop.xlane.xlu1 %5363  ;;  %s8150_s7 = smov [#allocation14]  }
 0xc05   :  { %5575 = vst [vmem:[#allocation14 + $0x110] sm:$0xff] %v5482_v59  ;;  %v5478_v4 = vmul.f32 %v7737_v2, %v9444_v52  ;;  %v7739_v21 = vpop.eup %7738  ;;  %7742 = vrcp.f32 %v5364_v47  ;;  %s5622_s28 = sshll.u32 %s8150_s7, 4  ;;  %s5623_s28 = int_to_ptr.vmem [resolvable:$true] %s5622_s28 }
 0xc06   :  { %5576 = vst [vmem:[#allocation14 + $0x118] sm:$0xff] %v5484_v16  ;;  %v5480_v62 = vmul.f32 %v7739_v21, %v9448_v19  ;;  %v9882_v19 = vld [vmem:[#allocation35_spill] sm:$0xff]  ;;  %s8104_s9 = scalar_lea.vmem %s5623_s28, 8192  ;;  %p8109_p1 = scmp.lt.s32.totalorder %s5623_s28, %s5623_s28 }
 0xc07   :  { %5573 = vst [vmem:[#allocation14 + $0x100] sm:$0xff] %v5478_v4  ;;  %v5358_v50 = vpop.xlane.xlu0 %5357  ;;  %p8105_p0 = scmp.ne.s32.totalorder %s5623_s28, %s8104_s9  ;;  %p8110_p2 = scmp.lt.s32.totalorder %s8104_s9, %s8104_s9 }
 0xc08   :  { %5574 = vst [vmem:[#allocation14 + $0x108] sm:$0xff] %v5480_v62  ;;  %7744 = vrcp.f32 %v5358_v50  ;;  %v5360_v31 = vpop.xlane.xlu1 %5359 }
 0xc09   :  { %7746 = vrcp.f32 %v5360_v31  ;;  %p8111_p3 = por %p8110_p2, %p8109_p1 }
 0xc0b   :  { %p8112_p4 = pnand %p8111_p3, %p8105_p0 }
 0xc0e   :  { %v7741_v33 = vpop.eup %7740 }
 0xc0f   :  { %v5490_v37 = vmul.f32 %v7741_v33, %v9879_v39  ;;  %v7743_v1 = vpop.eup %7742 }
 0xc10   :  { %v5492_v52 = vmul.f32 %v7743_v1, %v9880_v8 }
 0xc11   :  { %5579 = vst [vmem:[#allocation14 + $0x130] sm:$0xff] %v5490_v37 }
 0xc12   :  { %v7745_v28 = vpop.eup %7744  ;;  %5580 = vst [vmem:[#allocation14 + $0x138] sm:$0xff] %v5492_v52 }
 0xc13   :  { %v5486_v34 = vmul.f32 %v7745_v28, %v9881_v35  ;;  %v7747_v51 = vpop.eup %7746 }
 0xc14   :  { %v5488_v17 = vmul.f32 %v7747_v51, %v9882_v19 }
 0xc15   :  { %5577 = vst [vmem:[#allocation14 + $0x120] sm:$0xff] %v5486_v34 }
 0xc16   :  { %5578 = vst [vmem:[#allocation14 + $0x128] sm:$0xff] %v5488_v17  ;;  %v5370_v10 = vpop.xlane.xlu0 %5369 }
 0xc17   :  { %7748 = vrcp.f32 %v5370_v10 }
 0xc19   :  { %v5372_v45 = vpop.xlane.xlu1 %5371 }
 0xc1a   :  { %7750 = vrcp.f32 %v5372_v45  ;;  %v5366_v25 = vpop.xlane.xlu0 %5365 }
 0xc1b   :  { %7752 = vrcp.f32 %v5366_v25 }
 0xc1d   :  { %v5368_v14 = vpop.xlane.xlu1 %5367 }
 0xc1e   :  { %7754 = vrcp.f32 %v5368_v14 }
 0xc21   :  { %v7749_v22 = vpop.eup %7748 }
 0xc22   :  { %v5498_v12 = vmul.f32 %v7749_v22, %v9473_v48 }
 0xc24   :  { %5583 = vst [vmem:[#allocation14 + $0x150] sm:$0xff] %v5498_v12  ;;  %v7751_v0 = vpop.eup %7750 }
 0xc25   :  { %v7753_v30 = vpop.eup %7752  ;;  %v5500_v27 = vmul.f32 %v7751_v0, %v9477_v26 }
 0xc26   :  { %v5378_v49 = vpop.xlane.xlu0 %5377  ;;  %v5494_v53 = vmul.f32 %v7753_v30, %v9479_v3 }
 0xc27   :  { %7756 = vrcp.f32 %v5378_v49  ;;  %5584 = vst [vmem:[#allocation14 + $0x158] sm:$0xff] %v5500_v27 }
 0xc28   :  { %v7755_v29 = vpop.eup %7754  ;;  %5581 = vst [vmem:[#allocation14 + $0x140] sm:$0xff] %v5494_v53 }
 0xc29   :  { %v5496_v56 = vmul.f32 %v7755_v29, %v9486_v41  ;;  %v5380_v61 = vpop.xlane.xlu1 %5379 }
 0xc2a   :  { %7758 = vrcp.f32 %v5380_v61  ;;  %v5374_v7 = vpop.xlane.xlu0 %5373 }
 0xc2b   :  { %5582 = vst [vmem:[#allocation14 + $0x148] sm:$0xff] %v5496_v56  ;;  %7760 = vrcp.f32 %v5374_v7 }
 0xc2d   :  { %v5376_v48 = vpop.xlane.xlu1 %5375 }
 0xc2e   :  { %7762 = vrcp.f32 %v5376_v48 }
 0xc31   :  { %v7757_v36 = vpop.eup %7756 }
 0xc32   :  { %v5506_v20 = vmul.f32 %v7757_v36, %v9493_v38 }
 0xc34   :  { %5587 = vst [vmem:[#allocation14 + $0x170] sm:$0xff] %v5506_v20  ;;  %v7759_v26 = vpop.eup %7758 }
 0xc35   :  { %v7761_v59 = vpop.eup %7760  ;;  %v5508_v3 = vmul.f32 %v7759_v26, %v9497_v40 }
 0xc36   :  { %v5386_v13 = vpop.xlane.xlu0 %5385  ;;  %v5502_v16 = vmul.f32 %v7761_v59, %v9499_v11 }
 0xc37   :  { %7764 = vrcp.f32 %v5386_v13  ;;  %5588 = vst [vmem:[#allocation14 + $0x178] sm:$0xff] %v5508_v3 }
 0xc38   :  { %v7763_v41 = vpop.eup %7762  ;;  %5585 = vst [vmem:[#allocation14 + $0x160] sm:$0xff] %v5502_v16 }
 0xc39   :  { %v5504_v2 = vmul.f32 %v7763_v41, %v9506_v54  ;;  %v5388_v4 = vpop.xlane.xlu1 %5387 }
 0xc3a   :  { %7766 = vrcp.f32 %v5388_v4  ;;  %v5382_v63 = vpop.xlane.xlu0 %5381 }
 0xc3b   :  { %5586 = vst [vmem:[#allocation14 + $0x168] sm:$0xff] %v5504_v2  ;;  %7768 = vrcp.f32 %v5382_v63 }
 0xc3d   :  { %v5384_v38 = vpop.xlane.xlu1 %5383 }
 0xc3e   :  { %7770 = vrcp.f32 %v5384_v38 }
 0xc41   :  { %v7765_v21 = vpop.eup %7764 }
 0xc42   :  { %v5514_v62 = vmul.f32 %v7765_v21, %v9513_v23 }
 0xc44   :  { %5591 = vst [vmem:[#allocation14 + $0x190] sm:$0xff] %v5514_v62  ;;  %v7767_v40 = vpop.eup %7766 }
 0xc45   :  { %v7769_v47 = vpop.eup %7768  ;;  %v5516_v11 = vmul.f32 %v7767_v40, %v9517_v44 }
 0xc46   :  { %v5394_v50 = vpop.xlane.xlu0 %5393  ;;  %v5510_v31 = vmul.f32 %v7769_v47, %v9519_v46 }
 0xc47   :  { %7772 = vrcp.f32 %v5394_v50  ;;  %5592 = vst [vmem:[#allocation14 + $0x198] sm:$0xff] %v5516_v11 }
 0xc48   :  { %v7771_v54 = vpop.eup %7770  ;;  %5589 = vst [vmem:[#allocation14 + $0x180] sm:$0xff] %v5510_v31 }
 0xc49   :  { %v5512_v33 = vmul.f32 %v7771_v54, %v9526_v15  ;;  %v5396_v39 = vpop.xlane.xlu1 %5395 }
 0xc4a   :  { %7774 = vrcp.f32 %v5396_v39  ;;  %v5390_v37 = vpop.xlane.xlu0 %5389 }
 0xc4b   :  { %5590 = vst [vmem:[#allocation14 + $0x188] sm:$0xff] %v5512_v33  ;;  %7776 = vrcp.f32 %v5390_v37 }
 0xc4d   :  { %v5392_v23 = vpop.xlane.xlu1 %5391 }
 0xc4e   :  { %7778 = vrcp.f32 %v5392_v23 }
 0xc51   :  { %v7773_v1 = vpop.eup %7772 }
 0xc52   :  { %v5522_v8 = vmul.f32 %v7773_v1, %v9533_v18 }
 0xc54   :  { %5595 = vst [vmem:[#allocation14 + $0x1b0] sm:$0xff] %v5522_v8  ;;  %v7775_v44 = vpop.eup %7774 }
 0xc55   :  { %v7777_v52 = vpop.eup %7776  ;;  %v5524_v46 = vmul.f32 %v7775_v44, %v9537_v43 }
 0xc56   :  { %v5402_v28 = vpop.xlane.xlu0 %5401  ;;  %v5518_v35 = vmul.f32 %v7777_v52, %v9539_v57 }
 0xc57   :  { %7780 = vrcp.f32 %v5402_v28  ;;  %5596 = vst [vmem:[#allocation14 + $0x1b8] sm:$0xff] %v5524_v46 }
 0xc58   :  { %v7779_v15 = vpop.eup %7778  ;;  %5593 = vst [vmem:[#allocation14 + $0x1a0] sm:$0xff] %v5518_v35 }
 0xc59   :  { %v5520_v34 = vmul.f32 %v7779_v15, %v9546_v58  ;;  %v5404_v51 = vpop.xlane.xlu1 %5403 }
 0xc5a   :  { %7782 = vrcp.f32 %v5404_v51  ;;  %v5398_v19 = vpop.xlane.xlu0 %5397 }
 0xc5b   :  { %5594 = vst [vmem:[#allocation14 + $0x1a8] sm:$0xff] %v5520_v34  ;;  %7784 = vrcp.f32 %v5398_v19 }
 0xc5d   :  { %v5400_v18 = vpop.xlane.xlu1 %5399 }
 0xc5e   :  { %7786 = vrcp.f32 %v5400_v18 }
 0xc61   :  { %v7781_v17 = vpop.eup %7780 }
 0xc62   :  { %v5530_v10 = vmul.f32 %v7781_v17, %v9554_v5 }
 0xc64   :  { %5599 = vst [vmem:[#allocation14 + $0x1d0] sm:$0xff] %v5530_v10  ;;  %v7783_v43 = vpop.eup %7782  ;;  %v5406_v45 = vpop.xlane.xlu0 %5405 }
 0xc65   :  { %v7785_v57 = vpop.eup %7784  ;;  %v5532_v25 = vmul.f32 %v7783_v43, %v9560_v9  ;;  %7788 = vrcp.f32 %v5406_v45 }
 0xc66   :  { %v5526_v14 = vmul.f32 %v7785_v57, %v9562_v24  ;;  %v5408_v58 = vpop.xlane.xlu1 %5407 }
 0xc67   :  { %5600 = vst [vmem:[#allocation14 + $0x1d8] sm:$0xff] %v5532_v25  ;;  %7790 = vrcp.f32 %v5408_v58 }
 0xc68   :  { %v7787_v22 = vpop.eup %7786  ;;  %5597 = vst [vmem:[#allocation14 + $0x1c0] sm:$0xff] %v5526_v14  ;;  %v5410_v12 = vpop.xlane.xlu0 %5409 }
 0xc69   :  { %v5528_v0 = vmul.f32 %v7787_v22, %v9566_v32  ;;  %7792 = vrcp.f32 %v5410_v12 }
 0xc6a   :  { %v5412_v30 = vpop.xlane.xlu1 %5411 }
 0xc6b   :  { %5598 = vst [vmem:[#allocation14 + $0x1c8] sm:$0xff] %v5528_v0  ;;  %7794 = vrcp.f32 %v5412_v30 }
 0xc6f   :  { %v7789_v5 = vpop.eup %7788 }
 0xc70   :  { %v5534_v27 = vmul.f32 %v7789_v5, %v9571_v42 }
 0xc71   :  { %v7791_v49 = vpop.eup %7790 }
 0xc72   :  { %5601 = vst [vmem:[#allocation14 + $0x1e0] sm:$0xff] %v5534_v27  ;;  %v5536_v9 = vmul.f32 %v7791_v49, %v9574_v60 }
 0xc73   :  { %v7793_v24 = vpop.eup %7792 }
 0xc74   :  { %5602 = vst [vmem:[#allocation14 + $0x1e8] sm:$0xff] %v5536_v9  ;;  %v5538_v53 = vmul.f32 %v7793_v24, %v9569_v55 }
 0xc75   :  { %v7795_v29 = vpop.eup %7794 }
 0xc76   :  { %5603 = vst [vmem:[#allocation14 + $0x1f0] sm:$0xff] %v5538_v53  ;;  %v5540_v32 = vmul.f32 %v7795_v29, %v9579_v6 }
 0xc78   :  { %5604 = vst [vmem:[#allocation14 + $0x1f8] sm:$0xff] %v5540_v32 }
 0xc79   :  { %8115 = shalt.err (!%p8112_p4)
}
 0xc7a   :  { %s8116_s23 = scalar_lea.hbm %s9660_s8, 8192 }
 0xc7b   :  { %p8117_p5 = scmp.ne.s32.totalorder %s9660_s8, %s8116_s23  ;;  %p8120_p6 = scmp.lt.u32.totalorder %s8116_s23, %s9660_s8 }
 0xc7d   :  { %p8122_p7 = pnand %p8120_p6, %p8117_p5 }
 0xc7f   :  { %8125 = shalt.err (!%p8122_p7)
}
 0xc80   :  { %s8151_s30 = smov 128   ;;  %s8152_s1 = smov 8  }
 0xc81   :  { %5628 = dma.vmem_to_hbm [thread:$0]  %s5623_s28, 8192, %s9660_s8, [#allocation15], %s8151_s30, %s8151_s30, %s8152_s1  }
 0xc82   :  { %8134 = dma.done.wait [#allocation4], 4096  }
 0xc83   :  { %8135 = vsyncadd [#allocation4], 4294963200 }
 0xc84   :  { %8136 = dma.done.wait [#allocation15], 8192  }
 0xc85   :  { %8137 = vsyncadd [#allocation15], 4294959104 }
 0xc86   :  { %5635 = vsyncpa [#allocation3], 1 }
 0xc87   :  { %5636 = vsyncpa [#allocation6], 1 }
 0xc88   :  { %5637 = vsyncpa [#allocation9], 1 }
 0xc89   :  { %5638 = vsyncpa [#allocation12], 1 }
 0xc8a   :  { %5639 = vsyncpa [#allocation4], 1 }
 0xc8b   :  { %5640 = vsyncpa [#allocation15], 1 }

</bundles_post_ra>
